<compile_context>
chip_gen: v6e
topology: v6e:2x2x1
jax: 0.10.0
libtpu: 0.0.40
codegen_flags: <defaults>
</compile_context>

<pallas_src>
import functools

import jax
import jax.numpy as jnp
import numpy as np
from jax import lax
from jax.experimental import pallas as pl
from jax.experimental.pallas import tpu as pltpu

# ---- DragonNet default dimensions (from the PyTorch module) -------------------
INPUT = 128          # input_size
HIDDEN = 200         # hidden_size
HEAD_H = HIDDEN // 2 # 100, per-head hidden
N_TREAT = 7          # num_treatments
OUT_SIZE = 2         # output_size per y-head
N_HEADS = 7          # y0 .. y6
HEAD_W = N_HEADS * HEAD_H        # 700  (fused per-head hidden width)
Y_W = N_HEADS * OUT_SIZE         # 14   (fused y outputs)
OUT_COLS = 128                   # lane-dense padded output width (>=128 for unmasked stores)
BIAS_COLS = 768                  # bias-blob lane width (multiple of 128, covers 700)


def _elu(x):
    # ELU(alpha=1). exp(x)-1 matches the reference; select() discards the inf for x > 0.
    return jnp.where(x > 0, x, jnp.exp(x) - 1.0)


# ---- fused kernel --------------------------------------------------------------
def dragonnet_kernel(x_ref, wr1_ref, wr2_ref, wr3_ref, wh1_ref, wh2_ref,
                     wfh_ref, wfr_ref, bias_ref, out_ref):
    x = x_ref[...]                      # (TB, INPUT) f32

    def dot(a, w_ref):
        w = w_ref[...]
        return jnp.dot(a.astype(w.dtype), w, preferred_element_type=jnp.float32)

    bias = bias_ref[...]                # (8, BIAS_COLS) f32, one DMA for all biases
    br1 = bias[0:1, :HIDDEN]
    br2 = bias[1:2, :HIDDEN]
    br3 = bias[2:3, :HIDDEN]
    bh1 = bias[3:4, :HEAD_W]
    bh2 = bias[4:5, :HEAD_W]
    bfin = bias[5:6, :OUT_COLS]

    # representation: 3x (Linear + ELU)
    r = _elu(dot(x, wr1_ref) + br1)     # (TB, HIDDEN)
    r = _elu(dot(r, wr2_ref) + br2)
    r = _elu(dot(r, wr3_ref) + br3)

    # all 7 y-heads fused: layer1 concat, layer2 block-diagonal
    h = _elu(dot(r, wh1_ref) + bh1)     # (TB, HEAD_W)
    h = _elu(dot(h, wh2_ref) + bh2)     # (TB, HEAD_W)

    # Lane-dense (TB, 128) output: cols [0:14] = y-heads (block-diag layer-3),
    # cols [14:21] = t_predictions (folded into wfr), cols [21:128] = 0.
    out_ref[...] = dot(h, wfh_ref) + (dot(r, wfr_ref) + bfin)


# ---- host-side parameter packing (call ONCE, reuse across forwards) --------------
def pack_params(p, weight_dtype=jnp.float32):
    f32 = jnp.float32
    heads = p["heads"]
    wh1 = jnp.concatenate([hd["w1"] for hd in heads], axis=1)                    # (HIDDEN, 700)
    bh1 = jnp.concatenate([hd["b1"] for hd in heads], axis=0)                    # (700,)
    wh2 = jax.scipy.linalg.block_diag(*[hd["w2"] for hd in heads])               # (700, 700)
    bh2 = jnp.concatenate([hd["b2"] for hd in heads], axis=0)                    # (700,)
    wh3_bd = jax.scipy.linalg.block_diag(*[hd["w3"] for hd in heads])            # (700, 14)
    bh3 = jnp.concatenate([hd["b3"] for hd in heads], axis=0)                    # (14,)

    # Fused, 128-lane-wide final weights: y-heads in cols [0:14], t-head in [14:21].
    wfh = jnp.pad(wh3_bd, ((0, 0), (0, OUT_COLS - Y_W)))                         # (700, 128)
    wfr = jnp.pad(p["wt"], ((0, 0), (Y_W, OUT_COLS - Y_W - N_TREAT)))            # (200, 128)
    bfin = jnp.pad(jnp.concatenate([bh3, p["bt"]], axis=0),
                   (0, OUT_COLS - Y_W - N_TREAT))                                # (128,)

    def row(b):
        return jnp.pad(b, (0, BIAS_COLS - b.shape[0]))[None, :]

    bias = jnp.concatenate(
        [row(p["br1"]), row(p["br2"]), row(p["br3"]),
         row(bh1), row(bh2), row(bfin), jnp.zeros((2, BIAS_COLS), f32)], axis=0)  # (8, 768)

    wd = weight_dtype
    kp = dict(
        wr1=p["wr1"].astype(wd), wr2=p["wr2"].astype(wd), wr3=p["wr3"].astype(wd),
        wh1=wh1.astype(wd), wh2=wh2.astype(wd),
        wfh=wfh.astype(wd), wfr=wfr.astype(wd),
        bias=bias.astype(f32),
    )
    return jax.block_until_ready(kp)   # materialize once; never rebuilt per forward


def default_weight_dtype():
    # bf16 weights by default on v6e/v7x (full MXU rate + half the weight DMA);
    # f32 on v5e and anything unrecognized. No fp8/int8 (not a drop-in on v7x).
    kind = jax.devices()[0].device_kind.lower()
    if any(tag in kind for tag in ("v6", "v7", "7x")):
        return jnp.bfloat16
    return jnp.float32


# ---- pallas_call wrapper ---------------------------------------------------------
def _choose_block_b(B):
    if B <= 1024:
        return B                      # single grid step for small/medium batches
    for tb in (1024, 512, 256, 128, 64, 32, 16, 8):
        if B % tb == 0:
            return tb
    return B


@functools.partial(jax.jit, static_argnames=("block_b",))
def dragonnet_heads(x, kp, *, block_b):
    B = x.shape[0]
    assert B % block_b == 0 and block_b % 8 == 0
    n_steps = B // block_b

    weights = (kp["wr1"], kp["wr2"], kp["wr3"], kp["wh1"], kp["wh2"], kp["wfh"], kp["wfr"])

    def const_spec(a):  # whole-array block, VMEM-resident across grid steps
        return pl.BlockSpec(a.shape, lambda i: (0, 0))

    # Megacore-shard the batch axis only when each core gets real work; otherwise
    # keep it on one TensorCore (avoids replicating ~MBs of weight DMA per core).
    if n_steps >= 2 and block_b >= 256:
        sem = ("parallel",)
    else:
        sem = ("arbitrary",)

    out = pl.pallas_call(
        dragonnet_kernel,
        out_shape=jax.ShapeDtypeStruct((B, OUT_COLS), jnp.float32),
        grid=(n_steps,),
        in_specs=[pl.BlockSpec((block_b, INPUT), lambda i: (i, 0))]
                 + [const_spec(w) for w in weights]
                 + [const_spec(kp["bias"])],
        out_specs=pl.BlockSpec((block_b, OUT_COLS), lambda i: (i, 0)),
        compiler_params=pltpu.CompilerParams(dimension_semantics=sem),
    )(x, *weights, kp["bias"])

    # Single slice + reshape (packed heads), single slice for t.
    y_all = out[:, :Y_W].reshape(B, N_HEADS, OUT_SIZE)     # (B, 7, 2)
    t_pred = out[:, Y_W:Y_W + N_TREAT]                     # (B, 7)
    return y_all, t_pred


def dragonnet_forward(x, kp, eps_key, *, block_b=None):
    """Returns the original module's 9-tuple: (y0..y6, t_pred, epsilons)."""
    if block_b is None:
        block_b = _choose_block_b(x.shape[0])
    y_all, t_pred = dragonnet_heads(x, kp, block_b=block_b)
    # EpsilonLayer: fresh standard-normal noise shaped like t_pred (input-independent).
    epsilons = jax.random.normal(eps_key, t_pred.shape, t_pred.dtype)
    ys = tuple(y_all[:, i, :] for i in range(N_HEADS))
    return (*ys, t_pred, epsilons)


# ---- init + pure-JAX reference ----------------------------------------------------
def init_params(key):
    ks = iter(jax.random.split(key, 25))

    def lin(fi, fo):
        kw, kb = jax.random.split(next(ks))
        s = 1.0 / np.sqrt(fi)
        w = jax.random.uniform(kw, (fi, fo), jnp.float32, -s, s)
        b = jax.random.uniform(kb, (fo,), jnp.float32, -s, s)
        return w, b

    p = {}
    p["wr1"], p["br1"] = lin(INPUT, HIDDEN)
    p["wr2"], p["br2"] = lin(HIDDEN, HIDDEN)
    p["wr3"], p["br3"] = lin(HIDDEN, HIDDEN)
    p["wt"], p["bt"] = lin(HIDDEN, N_TREAT)
    heads = []
    for _ in range(N_HEADS):
        w1, b1 = lin(HIDDEN, HEAD_H)
        w2, b2 = lin(HEAD_H, HEAD_H)
        w3, b3 = lin(HEAD_H, OUT_SIZE)
        heads.append(dict(w1=w1, b1=b1, w2=w2, b2=b2, w3=w3, b3=b3))
    p["heads"] = heads
    return p


def reference_forward(x, p):
    dot = functools.partial(jnp.dot, precision=lax.Precision.HIGHEST)
    elu = lambda v: jnp.where(v > 0, v, jnp.exp(v) - 1.0)
    r = elu(dot(x, p["wr1"]) + p["br1"])
    r = elu(dot(r, p["wr2"]) + p["br2"])
    r = elu(dot(r, p["wr3"]) + p["br3"])
    t = dot(r, p["wt"]) + p["bt"]
    ys = []
    for hd in p["heads"]:
        h = elu(dot(r, hd["w1"]) + hd["b1"])
        h = elu(dot(h, hd["w2"]) + hd["b2"])
        ys.append(dot(h, hd["w3"]) + hd["b3"])
    return ys, t


if __name__ == "__main__":
    B = 64
    key = jax.random.PRNGKey(0)
    kx, kparam, ke = jax.random.split(key, 3)

    x = jax.random.normal(kx, (B, INPUT), jnp.float32)
    params = init_params(kparam)

    # Packed weights are built ONCE (hoisted out of the forward) and reused.
    kp_f32 = pack_params(params, jnp.float32)

    # f32 path (strict correctness check).
    outs = jax.block_until_ready(dragonnet_forward(x, kp_f32, ke))
    *ys, t_pred, epsilons = outs

    ys_ref, t_ref = reference_forward(x, params)
    for y, yr in zip(ys, ys_ref):
        np.testing.assert_allclose(np.asarray(y), np.asarray(yr), rtol=1e-4, atol=1e-4)
    np.testing.assert_allclose(np.asarray(t_pred), np.asarray(t_ref), rtol=1e-4, atol=1e-4)
    assert all(y.shape == (B, OUT_SIZE) for y in ys)
    assert t_pred.shape == (B, N_TREAT) and epsilons.shape == (B, N_TREAT)

    # Generation-dependent default weight dtype: bf16 on v6e/v7x, f32 on v5e.
    # The bf16 path is accuracy-checked against the f32 reference (relaxed tolerance).
    wd = default_weight_dtype()
    if wd != jnp.float32:
        kp_fast = pack_params(params, wd)
        *ys_b, t_b, _ = jax.block_until_ready(dragonnet_forward(x, kp_fast, ke))
        for y, yr in zip(ys_b, ys_ref):
            np.testing.assert_allclose(np.asarray(y), np.asarray(yr), rtol=5e-2, atol=5e-2)
        np.testing.assert_allclose(np.asarray(t_b), np.asarray(t_ref), rtol=5e-2, atol=5e-2)

    print("KERNEL_OK")
</pallas_src>

<mosaic_0001>
module attributes {stable_mosaic.version = 11 : i64} {
  func.func @dragonnet_kernel(%arg0: i32, %arg1: memref<64x128xf32, #tpu.memory_space<vmem>>, %arg2: memref<128x200xf32, #tpu.memory_space<vmem>>, %arg3: memref<200x200xf32, #tpu.memory_space<vmem>>, %arg4: memref<200x200xf32, #tpu.memory_space<vmem>>, %arg5: memref<200x700xf32, #tpu.memory_space<vmem>>, %arg6: memref<700x700xf32, #tpu.memory_space<vmem>>, %arg7: memref<700x128xf32, #tpu.memory_space<vmem>>, %arg8: memref<200x128xf32, #tpu.memory_space<vmem>>, %arg9: memref<8x768xf32, #tpu.memory_space<vmem>>, %arg10: memref<64x128xf32, #tpu.memory_space<vmem>>) attributes {dimension_semantics = [#tpu.dimension_semantics<arbitrary>], iteration_bounds = array<i64: 1>, scalar_prefetch = 0 : i64, scratch_operands = 0 : i64, tpu.core_type = #tpu.core_type<tc>, window_params = [{transform_indices = @transform_0, window_bounds = array<i64: 64, 128>}, {pipeline_mode = #tpu.pipeline_mode<synchronous>, transform_indices = @transform_1, window_bounds = array<i64: 128, 200>}, {pipeline_mode = #tpu.pipeline_mode<synchronous>, transform_indices = @transform_2, window_bounds = array<i64: 200, 200>}, {pipeline_mode = #tpu.pipeline_mode<synchronous>, transform_indices = @transform_3, window_bounds = array<i64: 200, 200>}, {pipeline_mode = #tpu.pipeline_mode<synchronous>, transform_indices = @transform_4, window_bounds = array<i64: 200, 700>}, {pipeline_mode = #tpu.pipeline_mode<synchronous>, transform_indices = @transform_5, window_bounds = array<i64: 700, 700>}, {pipeline_mode = #tpu.pipeline_mode<synchronous>, transform_indices = @transform_6, window_bounds = array<i64: 700, 128>}, {pipeline_mode = #tpu.pipeline_mode<synchronous>, transform_indices = @transform_7, window_bounds = array<i64: 200, 128>}, {pipeline_mode = #tpu.pipeline_mode<synchronous>, transform_indices = @transform_8, window_bounds = array<i64: 8, 768>}, {transform_indices = @transform_9, window_bounds = array<i64: 64, 128>}]} {
    %c0 = arith.constant 0 : index
    %c0_0 = arith.constant 0 : index
    %0 = vector.load %arg1[%c0, %c0_0] : memref<64x128xf32, #tpu.memory_space<vmem>>, vector<64x128xf32>
    %c0_1 = arith.constant 0 : index
    %c0_2 = arith.constant 0 : index
    %1 = vector.load %arg9[%c0_1, %c0_2] : memref<8x768xf32, #tpu.memory_space<vmem>>, vector<8x768xf32>
    %2 = vector.extract_strided_slice %1 {offsets = [0, 0], sizes = [1, 200], strides = [1, 1]} : vector<8x768xf32> to vector<1x200xf32>
    %3 = vector.extract_strided_slice %1 {offsets = [1, 0], sizes = [1, 200], strides = [1, 1]} : vector<8x768xf32> to vector<1x200xf32>
    %4 = vector.extract_strided_slice %1 {offsets = [2, 0], sizes = [1, 200], strides = [1, 1]} : vector<8x768xf32> to vector<1x200xf32>
    %5 = vector.extract_strided_slice %1 {offsets = [3, 0], sizes = [1, 700], strides = [1, 1]} : vector<8x768xf32> to vector<1x700xf32>
    %6 = vector.extract_strided_slice %1 {offsets = [4, 0], sizes = [1, 700], strides = [1, 1]} : vector<8x768xf32> to vector<1x700xf32>
    %7 = vector.extract_strided_slice %1 {offsets = [5, 0], sizes = [1, 128], strides = [1, 1]} : vector<8x768xf32> to vector<1x128xf32>
    %c0_3 = arith.constant 0 : index
    %c0_4 = arith.constant 0 : index
    %8 = vector.load %arg2[%c0_3, %c0_4] : memref<128x200xf32, #tpu.memory_space<vmem>>, vector<128x200xf32>
    %cst = arith.constant dense<0.000000e+00> : vector<64x200xf32>
    %9 = tpu.matmul %0, %8, %cst {dimension_numbers = #tpu.dot_dimension_numbers<[1], [0], [0], [1], [0, 0, 1, 1], [], []>} : vector<64x128xf32>, vector<128x200xf32>, vector<64x200xf32> -> vector<64x200xf32>
    %10 = vector.broadcast %2 : vector<1x200xf32> to vector<64x200xf32>
    %11 = arith.addf %9, %10 : vector<64x200xf32>
    %cst_5 = arith.constant 0.000000e+00 : f32
    %12 = vector.broadcast %cst_5 : f32 to vector<64x200xf32>
    %13 = arith.cmpf ogt, %11, %12 : vector<64x200xf32>
    %14 = math.exp %11 : vector<64x200xf32>
    %cst_6 = arith.constant 1.000000e+00 : f32
    %15 = vector.broadcast %cst_6 : f32 to vector<64x200xf32>
    %16 = arith.subf %14, %15 : vector<64x200xf32>
    %17 = arith.select %13, %11, %16 : vector<64x200xi1>, vector<64x200xf32>
    %c0_7 = arith.constant 0 : index
    %c0_8 = arith.constant 0 : index
    %18 = vector.load %arg3[%c0_7, %c0_8] : memref<200x200xf32, #tpu.memory_space<vmem>>, vector<200x200xf32>
    %cst_9 = arith.constant dense<0.000000e+00> : vector<64x200xf32>
    %19 = tpu.matmul %17, %18, %cst_9 {dimension_numbers = #tpu.dot_dimension_numbers<[1], [0], [0], [1], [0, 0, 1, 1], [], []>} : vector<64x200xf32>, vector<200x200xf32>, vector<64x200xf32> -> vector<64x200xf32>
    %20 = vector.broadcast %3 : vector<1x200xf32> to vector<64x200xf32>
    %21 = arith.addf %19, %20 : vector<64x200xf32>
    %cst_10 = arith.constant 0.000000e+00 : f32
    %22 = vector.broadcast %cst_10 : f32 to vector<64x200xf32>
    %23 = arith.cmpf ogt, %21, %22 : vector<64x200xf32>
    %24 = math.exp %21 : vector<64x200xf32>
    %cst_11 = arith.constant 1.000000e+00 : f32
    %25 = vector.broadcast %cst_11 : f32 to vector<64x200xf32>
    %26 = arith.subf %24, %25 : vector<64x200xf32>
    %27 = arith.select %23, %21, %26 : vector<64x200xi1>, vector<64x200xf32>
    %c0_12 = arith.constant 0 : index
    %c0_13 = arith.constant 0 : index
    %28 = vector.load %arg4[%c0_12, %c0_13] : memref<200x200xf32, #tpu.memory_space<vmem>>, vector<200x200xf32>
    %cst_14 = arith.constant dense<0.000000e+00> : vector<64x200xf32>
    %29 = tpu.matmul %27, %28, %cst_14 {dimension_numbers = #tpu.dot_dimension_numbers<[1], [0], [0], [1], [0, 0, 1, 1], [], []>} : vector<64x200xf32>, vector<200x200xf32>, vector<64x200xf32> -> vector<64x200xf32>
    %30 = vector.broadcast %4 : vector<1x200xf32> to vector<64x200xf32>
    %31 = arith.addf %29, %30 : vector<64x200xf32>
    %cst_15 = arith.constant 0.000000e+00 : f32
    %32 = vector.broadcast %cst_15 : f32 to vector<64x200xf32>
    %33 = arith.cmpf ogt, %31, %32 : vector<64x200xf32>
    %34 = math.exp %31 : vector<64x200xf32>
    %cst_16 = arith.constant 1.000000e+00 : f32
    %35 = vector.broadcast %cst_16 : f32 to vector<64x200xf32>
    %36 = arith.subf %34, %35 : vector<64x200xf32>
    %37 = arith.select %33, %31, %36 : vector<64x200xi1>, vector<64x200xf32>
    %c0_17 = arith.constant 0 : index
    %c0_18 = arith.constant 0 : index
    %38 = vector.load %arg5[%c0_17, %c0_18] : memref<200x700xf32, #tpu.memory_space<vmem>>, vector<200x700xf32>
    %cst_19 = arith.constant dense<0.000000e+00> : vector<64x700xf32>
    %39 = tpu.matmul %37, %38, %cst_19 {dimension_numbers = #tpu.dot_dimension_numbers<[1], [0], [0], [1], [0, 0, 1, 1], [], []>} : vector<64x200xf32>, vector<200x700xf32>, vector<64x700xf32> -> vector<64x700xf32>
    %40 = vector.broadcast %5 : vector<1x700xf32> to vector<64x700xf32>
    %41 = arith.addf %39, %40 : vector<64x700xf32>
    %cst_20 = arith.constant 0.000000e+00 : f32
    %42 = vector.broadcast %cst_20 : f32 to vector<64x700xf32>
    %43 = arith.cmpf ogt, %41, %42 : vector<64x700xf32>
    %44 = math.exp %41 : vector<64x700xf32>
    %cst_21 = arith.constant 1.000000e+00 : f32
    %45 = vector.broadcast %cst_21 : f32 to vector<64x700xf32>
    %46 = arith.subf %44, %45 : vector<64x700xf32>
    %47 = arith.select %43, %41, %46 : vector<64x700xi1>, vector<64x700xf32>
    %c0_22 = arith.constant 0 : index
    %c0_23 = arith.constant 0 : index
    %48 = vector.load %arg6[%c0_22, %c0_23] : memref<700x700xf32, #tpu.memory_space<vmem>>, vector<700x700xf32>
    %cst_24 = arith.constant dense<0.000000e+00> : vector<64x700xf32>
    %49 = tpu.matmul %47, %48, %cst_24 {dimension_numbers = #tpu.dot_dimension_numbers<[1], [0], [0], [1], [0, 0, 1, 1], [], []>} : vector<64x700xf32>, vector<700x700xf32>, vector<64x700xf32> -> vector<64x700xf32>
    %50 = vector.broadcast %6 : vector<1x700xf32> to vector<64x700xf32>
    %51 = arith.addf %49, %50 : vector<64x700xf32>
    %cst_25 = arith.constant 0.000000e+00 : f32
    %52 = vector.broadcast %cst_25 : f32 to vector<64x700xf32>
    %53 = arith.cmpf ogt, %51, %52 : vector<64x700xf32>
    %54 = math.exp %51 : vector<64x700xf32>
    %cst_26 = arith.constant 1.000000e+00 : f32
    %55 = vector.broadcast %cst_26 : f32 to vector<64x700xf32>
    %56 = arith.subf %54, %55 : vector<64x700xf32>
    %57 = arith.select %53, %51, %56 : vector<64x700xi1>, vector<64x700xf32>
    %c0_27 = arith.constant 0 : index
    %c0_28 = arith.constant 0 : index
    %58 = vector.load %arg7[%c0_27, %c0_28] : memref<700x128xf32, #tpu.memory_space<vmem>>, vector<700x128xf32>
    %cst_29 = arith.constant dense<0.000000e+00> : vector<64x128xf32>
    %59 = tpu.matmul %57, %58, %cst_29 {dimension_numbers = #tpu.dot_dimension_numbers<[1], [0], [0], [1], [0, 0, 1, 1], [], []>} : vector<64x700xf32>, vector<700x128xf32>, vector<64x128xf32> -> vector<64x128xf32>
    %c0_30 = arith.constant 0 : index
    %c0_31 = arith.constant 0 : index
    %60 = vector.load %arg8[%c0_30, %c0_31] : memref<200x128xf32, #tpu.memory_space<vmem>>, vector<200x128xf32>
    %cst_32 = arith.constant dense<0.000000e+00> : vector<64x128xf32>
    %61 = tpu.matmul %37, %60, %cst_32 {dimension_numbers = #tpu.dot_dimension_numbers<[1], [0], [0], [1], [0, 0, 1, 1], [], []>} : vector<64x200xf32>, vector<200x128xf32>, vector<64x128xf32> -> vector<64x128xf32>
    %62 = vector.broadcast %7 : vector<1x128xf32> to vector<64x128xf32>
    %63 = arith.addf %61, %62 : vector<64x128xf32>
    %64 = arith.addf %59, %63 : vector<64x128xf32>
    %c0_33 = arith.constant 0 : index
    %c0_34 = arith.constant 0 : index
    %65 = vector.load %arg10[%c0_33, %c0_34] : memref<64x128xf32, #tpu.memory_space<vmem>>, vector<64x128xf32>
    tpu.vector_store %arg10[%c0_33, %c0_34], %64 {strides = array<i32>} : memref<64x128xf32, #tpu.memory_space<vmem>>, vector<64x128xf32>,
    return
  }
  func.func @transform_0(%arg0: i32) -> (i32, i32) {
    %c0_i32 = arith.constant 0 : i32
    %c0_i32_0 = arith.constant 0 : i32
    return %arg0, %c0_i32 : i32, i32
  }
  func.func @transform_1(%arg0: i32) -> (i32, i32) {
    %c0_i32 = arith.constant 0 : i32
    %c0_i32_0 = arith.constant 0 : i32
    %c0_i32_1 = arith.constant 0 : i32
    return %c0_i32, %c0_i32_0 : i32, i32
  }
  func.func @transform_2(%arg0: i32) -> (i32, i32) {
    %c0_i32 = arith.constant 0 : i32
    %c0_i32_0 = arith.constant 0 : i32
    %c0_i32_1 = arith.constant 0 : i32
    return %c0_i32, %c0_i32_0 : i32, i32
  }
  func.func @transform_3(%arg0: i32) -> (i32, i32) {
    %c0_i32 = arith.constant 0 : i32
    %c0_i32_0 = arith.constant 0 : i32
    %c0_i32_1 = arith.constant 0 : i32
    return %c0_i32, %c0_i32_0 : i32, i32
  }
  func.func @transform_4(%arg0: i32) -> (i32, i32) {
    %c0_i32 = arith.constant 0 : i32
    %c0_i32_0 = arith.constant 0 : i32
    %c0_i32_1 = arith.constant 0 : i32
    return %c0_i32, %c0_i32_0 : i32, i32
  }
  func.func @transform_5(%arg0: i32) -> (i32, i32) {
    %c0_i32 = arith.constant 0 : i32
    %c0_i32_0 = arith.constant 0 : i32
    %c0_i32_1 = arith.constant 0 : i32
    return %c0_i32, %c0_i32_0 : i32, i32
  }
  func.func @transform_6(%arg0: i32) -> (i32, i32) {
    %c0_i32 = arith.constant 0 : i32
    %c0_i32_0 = arith.constant 0 : i32
    %c0_i32_1 = arith.constant 0 : i32
    return %c0_i32, %c0_i32_0 : i32, i32
  }
  func.func @transform_7(%arg0: i32) -> (i32, i32) {
    %c0_i32 = arith.constant 0 : i32
    %c0_i32_0 = arith.constant 0 : i32
    %c0_i32_1 = arith.constant 0 : i32
    return %c0_i32, %c0_i32_0 : i32, i32
  }
  func.func @transform_8(%arg0: i32) -> (i32, i32) {
    %c0_i32 = arith.constant 0 : i32
    %c0_i32_0 = arith.constant 0 : i32
    %c0_i32_1 = arith.constant 0 : i32
    return %c0_i32, %c0_i32_0 : i32, i32
  }
  func.func @transform_9(%arg0: i32) -> (i32, i32) {
    %c0_i32 = arith.constant 0 : i32
    %c0_i32_0 = arith.constant 0 : i32
    return %arg0, %c0_i32 : i32, i32
  }
}

</mosaic_0001>

<bundles_post_ra>
// kernel: dragonnet_heads.1
= control target key start
LH: loop header
LB: loop body
LE: loop exit
PB: predicated region body
PF: predicated region fallthrough
CT: control target
= control target key end

     0   :  { %14 = vsyncpa [#allocation3], 0  ;;  %s7058_s0 = inlined_call_operand.hbm [shape: f32[64,128], index: 0, kind: input, shape index: {}]   ;;  %s7059_s1 = inlined_call_operand.vmem [shape: f32[128,200], index: 1, kind: input, shape index: {}]   ;;  %s7060_s2 = inlined_call_operand.hbm [shape: f32[200,200], index: 2, kind: input, shape index: {}]   ;;  %s7061_s3 = inlined_call_operand.hbm [shape: f32[200,200], index: 3, kind: input, shape index: {}]   ;;  %s7062_s4 = inlined_call_operand.hbm [shape: f32[200,700], index: 4, kind: input, shape index: {}]   ;;  %s7063_s5 = inlined_call_operand.hbm [shape: f32[700,700], index: 5, kind: input, shape index: {}]   ;;  %s7064_s6 = inlined_call_operand.hbm [shape: f32[700,128], index: 6, kind: input, shape index: {}]   ;;  %s7065_s7 = inlined_call_operand.hbm [shape: f32[200,128], index: 7, kind: input, shape index: {}]   ;;  %s7066_s8 = inlined_call_operand.hbm [shape: f32[8,768], index: 8, kind: input, shape index: {}]   ;;  %s7067_s9 = inlined_call_operand.vmem [shape: f32[64,128], index: 9, kind: output, shape index: {}]  }
   0x1   :  { %15 = vsyncpa [#allocation5], 0 }
   0x2   :  { %16 = vsyncpa [#allocation8], 0 }
   0x3   :  { %17 = vsyncpa [#allocation11], 0 }
   0x4   :  { %18 = vsyncpa [#allocation14], 0  ;;  %s5023_s30 = smov [#allocation4]  }
   0x5   :  { %s38_s10 = sshll.u32 %s5023_s30, 4  ;;  %s39_s10 = int_to_ptr.vmem [resolvable:$true] %s38_s10 }
   0x6   :  { %s4861_s11 = scalar_lea.vmem %s39_s10, 6400  ;;  %p4866_p1 = scmp.lt.s32.totalorder %s39_s10, %s39_s10 }
   0x7   :  { %p4862_p0 = scmp.ne.s32.totalorder %s39_s10, %s4861_s11  ;;  %p4867_p2 = scmp.lt.s32.totalorder %s4861_s11, %s4861_s11 }
   0x9   :  { %p4868_p3 = por %p4867_p2, %p4866_p1 }
   0xb   :  { %p4869_p4 = pnand %p4868_p3, %p4862_p0 }
   0xd   :  { %4872 = shalt.err (!%p4869_p4)
}
   0xe   :  { %s5024_s12 = smov 256   ;;  %s5025_s13 = smov 16  }
   0xf   :  { %44 = dma.hbm_to_vmem [thread:$0]  %s7060_s2, 6400, %s39_s10, [#allocation5], %s5024_s12, %s5024_s12, %s5025_s13  }
  0x10   :  { %s5026_s16 = smov [#allocation7]  }
  0x11   :  { %s62_s17 = sshll.u32 %s5026_s16, 4  ;;  %s63_s17 = int_to_ptr.vmem [resolvable:$true] %s62_s17 }
  0x12   :  { %s4881_s18 = scalar_lea.vmem %s63_s17, 19200  ;;  %p4886_p6 = scmp.lt.s32.totalorder %s63_s17, %s63_s17 }
  0x13   :  { %p4882_p5 = scmp.ne.s32.totalorder %s63_s17, %s4881_s18  ;;  %p4887_p7 = scmp.lt.s32.totalorder %s4881_s18, %s4881_s18 }
  0x15   :  { %p4888_p8 = por %p4887_p7, %p4886_p6 }
  0x17   :  { %p4889_p9 = pnand %p4888_p8, %p4882_p5 }
  0x19   :  { %4892 = shalt.err (!%p4889_p9)
}
  0x1a   :  { %s5027_s19 = smov 768   ;;  %s5028_s20 = smov 48  }
  0x1b   :  { %68 = dma.hbm_to_vmem [thread:$0]  %s7062_s4, 19200, %s63_s17, [#allocation8], %s5027_s19, %s5027_s19, %s5028_s20  }
  0x1c   :  { %s5029_s2 = smov [#allocation10]   ;;  %s5030_s24 = smov [#allocation2]  }
  0x1d   :  { %s86_s23 = sshll.u32 %s5029_s2, 4  ;;  %s24_s25 = sshll.u32 %s5030_s24, 4  ;;  %s87_s23 = int_to_ptr.vmem [resolvable:$true] %s86_s23  ;;  %s25_s25 = int_to_ptr.vmem [resolvable:$true] %s24_s25 }
  0x1e   :  { %s4901_s26 = scalar_lea.vmem %s87_s23, 11264  ;;  %p4906_p11 = scmp.lt.s32.totalorder %s87_s23, %s87_s23 }
  0x1f   :  { %p4902_p10 = scmp.ne.s32.totalorder %s87_s23, %s4901_s26  ;;  %p4907_p12 = scmp.lt.s32.totalorder %s4901_s26, %s4901_s26 }
  0x21   :  { %p4908_p13 = por %p4907_p12, %p4906_p11 }
  0x23   :  { %p4909_p0 = pnand %p4908_p13, %p4902_p10 }
  0x25   :  { %4912 = shalt.err (!%p4909_p0)
}
  0x26   :  { %s5031_s27 = smov 128   ;;  %s5032_s28 = smov 8  }
  0x27   :  { %92 = dma.hbm_to_vmem [thread:$0]  %s7064_s6, 11264, %s87_s23, [#allocation11], %s5031_s27, %s5031_s27, %s5032_s28  }
  0x28   :  { %s4921_s30 = scalar_lea.vmem %s25_s25, 1024  ;;  %p4926_p2 = scmp.lt.s32.totalorder %s25_s25, %s25_s25 }
  0x29   :  { %p4922_p1 = scmp.ne.s32.totalorder %s25_s25, %s4921_s30  ;;  %p4927_p3 = scmp.lt.s32.totalorder %s4921_s30, %s4921_s30 }
  0x2b   :  { %p4928_p4 = por %p4927_p3, %p4926_p2 }
  0x2d   :  { %p4929_p5 = pnand %p4928_p4, %p4922_p1 }
  0x2f   :  { %4932 = shalt.err (!%p4929_p5)
}
  0x30   :  { %30 = dma.hbm_to_vmem [thread:$0]  %s7058_s0, 1024, %s25_s25, [#allocation3], %s5031_s27, %s5031_s27, %s5032_s28  }
  0x31   :  { %s5033_s14 = smov [#allocation6]   ;;  %s5034_s16 = smov [#allocation9]  }
  0x32   :  { %s50_s15 = sshll.u32 %s5033_s14, 4  ;;  %s74_s17 = sshll.u32 %s5034_s16, 4  ;;  %s51_s15 = int_to_ptr.vmem [resolvable:$true] %s50_s15  ;;  %s75_s17 = int_to_ptr.vmem [resolvable:$true] %s74_s17 }
  0x33   :  { %s4941_s6 = scalar_lea.vmem %s51_s15, 6400  ;;  %p4946_p7 = scmp.lt.s32.totalorder %s51_s15, %s51_s15 }
  0x34   :  { %p4942_p6 = scmp.ne.s32.totalorder %s51_s15, %s4941_s6  ;;  %p4947_p8 = scmp.lt.s32.totalorder %s4941_s6, %s4941_s6 }
  0x36   :  { %p4948_p9 = por %p4947_p8, %p4946_p7 }
  0x38   :  { %p4949_p10 = pnand %p4948_p9, %p4942_p6 }
  0x3a   :  { %4952 = shalt.err (!%p4949_p10)
}
  0x3b   :  { %56 = dma.hbm_to_vmem [thread:$0]  %s7061_s3, 6400, %s51_s15, [#allocation5], %s5024_s12, %s5024_s12, %s5025_s13  }
  0x3c   :  { %s4961_s0 = scalar_lea.vmem %s75_s17, 67584  ;;  %p4966_p12 = scmp.lt.s32.totalorder %s75_s17, %s75_s17 }
  0x3d   :  { %p4962_p11 = scmp.ne.s32.totalorder %s75_s17, %s4961_s0  ;;  %p4967_p13 = scmp.lt.s32.totalorder %s4961_s0, %s4961_s0 }
  0x3f   :  { %p4968_p0 = por %p4967_p13, %p4966_p12 }
  0x41   :  { %p4969_p1 = pnand %p4968_p0, %p4962_p11 }
  0x43   :  { %4972 = shalt.err (!%p4969_p1)
}
  0x44   :  { %80 = dma.hbm_to_vmem [thread:$0]  %s7063_s5, 67584, %s75_s17, [#allocation8], %s5027_s19, %s5027_s19, %s5028_s20  }
  0x45   :  { %s5035_s23 = smov [#allocation12]   ;;  %s5036_s25 = smov [#allocation13]  }
  0x46   :  { %s98_s24 = sshll.u32 %s5035_s23, 4  ;;  %s111_s26 = sshll.u32 %s5036_s25, 4  ;;  %s99_s24 = int_to_ptr.vmem [resolvable:$true] %s98_s24  ;;  %s112_s26 = int_to_ptr.vmem [resolvable:$true] %s111_s26 }
  0x47   :  { %s4981_s3 = scalar_lea.vmem %s99_s24, 3200  ;;  %p4986_p3 = scmp.lt.s32.totalorder %s99_s24, %s99_s24 }
  0x48   :  { %p4982_p2 = scmp.ne.s32.totalorder %s99_s24, %s4981_s3  ;;  %p4987_p4 = scmp.lt.s32.totalorder %s4981_s3, %s4981_s3 }
  0x4a   :  { %p4988_p5 = por %p4987_p4, %p4986_p3 }
  0x4c   :  { %p4989_p6 = pnand %p4988_p5, %p4982_p2 }
  0x4e   :  { %4992 = shalt.err (!%p4989_p6)
}
  0x4f   :  { %104 = dma.hbm_to_vmem [thread:$0]  %s7065_s7, 3200, %s99_s24, [#allocation11], %s5031_s27, %s5031_s27, %s5032_s28  }
  0x50   :  { %s5001_s5 = scalar_lea.vmem %s112_s26, 768  ;;  %p5006_p8 = scmp.lt.s32.totalorder %s112_s26, %s112_s26 }
  0x51   :  { %p5002_p7 = scmp.ne.s32.totalorder %s112_s26, %s5001_s5  ;;  %p5007_p9 = scmp.lt.s32.totalorder %s5001_s5, %s5001_s5 }
  0x53   :  { %p5008_p10 = por %p5007_p9, %p5006_p8 }
  0x55   :  { %p5009_p11 = pnand %p5008_p10, %p5002_p7 }
  0x57   :  { %5012 = shalt.err (!%p5009_p11)
}
  0x58   :  { %114 = dma.hbm_to_vmem [thread:$0]  %s7066_s8, 768, %s112_s26, [#allocation14]  }
  0x59   :  { %5013 = dma.done.wait [#allocation3], 1024  }
  0x5a   :  { %5014 = vsyncadd [#allocation3], 4294966272 }
  0x5b   :  { %5015 = dma.done.wait [#allocation5], 12800  }
  0x5c   :  { %5016 = vsyncadd [#allocation5], 4294954496 }
  0x5d   :  { %5017 = dma.done.wait [#allocation8], 86784  }
  0x5e   :  { %5018 = vsyncadd [#allocation8], 4294880512 }
  0x5f   :  { %5019 = dma.done.wait [#allocation11], 14464  }
  0x60   :  { %5020 = vsyncadd [#allocation11], 4294952832 }
  0x61   :  { %5021 = dma.done.wait [#allocation14], 768  }
  0x62   :  { %5022 = vsyncadd [#allocation14], 4294966528  ;;  %v7068_v0 = vmov 0.0   ;;  %v184_v1 = vld [vmem:[%s7059_s1 + $0xf8] sm:$0xff]  ;;  %v183_v2 = vld [vmem:[%s7059_s1 + $0xf0] sm:$0xff]  ;;  %vm444_vm0 = vcmask 588800  }
  0x63   :  { %257 = vmatprep.mubr.f32.mxu0 %v7068_v0  ;;  %v182_v3 = vld [vmem:[%s7059_s1 + $0xe8] sm:$0xff]  ;;  %193 = vmatprep.subr.mxu0 %v184_v1  ;;  %v181_v4 = vld [vmem:[%s7059_s1 + $0xe0] sm:$0xff]  ;;  %v180_v5 = vld [vmem:[%s7059_s1 + $0xd8] sm:$0xff] }
  0x64   :  { %194 = vmatpush1.msra.mxu0 %v183_v2  ;;  %v179_v6 = vld [vmem:[%s7059_s1 + $0xd0] sm:$0xff]  ;;  %v178_v7 = vld [vmem:[%s7059_s1 + $0xc8] sm:$0xff]  ;;  %v177_v8 = vld [vmem:[%s7059_s1 + $0xc0] sm:$0xff] }
  0x65   :  { %195 = vmatprep.subr.mxu0 %v182_v3  ;;  %v176_v9 = vld [vmem:[%s7059_s1 + $0xb8] sm:$0xff]  ;;  %v175_v10 = vld [vmem:[%s7059_s1 + $0xb0] sm:$0xff]  ;;  %v174_v11 = vld [vmem:[%s7059_s1 + $0xa8] sm:$0xff] }
  0x66   :  { %196 = vmatpush1.msra.mxu0 %v181_v4  ;;  %v173_v12 = vld [vmem:[%s7059_s1 + $0xa0] sm:$0xff]  ;;  %v172_v13 = vld [vmem:[%s7059_s1 + $0x98] sm:$0xff]  ;;  %v171_v14 = vld [vmem:[%s7059_s1 + $0x90] sm:$0xff] }
  0x67   :  { %197 = vmatprep.subr.mxu0 %v180_v5  ;;  %v170_v15 = vld [vmem:[%s7059_s1 + $0x88] sm:$0xff]  ;;  %v169_v16 = vld [vmem:[%s7059_s1 + $0x80] sm:$0xff]  ;;  %v417_v17 = vld [vmem:[#allocation4 + $0xf8] sm:$0xff] }
  0x68   :  { %198 = vmatpush1.msra.mxu0 %v179_v6  ;;  %v416_v18 = vld [vmem:[#allocation4 + $0xf0] sm:$0xff]  ;;  %v168_v19 = vld [vmem:[%s7059_s1 + $0x78] sm:$0xff]  ;;  %469 = vmatprep.subr.mxu1 %v417_v17  ;;  %v415_v20 = vld [vmem:[#allocation4 + $0xe8] sm:$0xff] }
  0x69   :  { %199 = vmatprep.subr.mxu0 %v178_v7  ;;  %v414_v21 = vld [vmem:[#allocation4 + $0xe0] sm:$0xff]  ;;  %v167_v22 = vld [vmem:[%s7059_s1 + $0x70] sm:$0xff]  ;;  %470 = vmatpush1.msra.mxu1 %v416_v18  ;;  %v413_v23 = vld [vmem:[#allocation4 + $0xd8] sm:$0xff] }
  0x6a   :  { %200 = vmatpush1.msra.mxu0 %v177_v8  ;;  %v166_v24 = vld [vmem:[%s7059_s1 + $0x68] sm:$0xff]  ;;  %471 = vmatprep.subr.mxu1 %v415_v20  ;;  %v412_v25 = vld [vmem:[#allocation4 + $0xd0] sm:$0xff]  ;;  %v165_v26 = vld [vmem:[%s7059_s1 + $0x60] sm:$0xff] }
  0x6b   :  { %201 = vmatprep.subr.mxu0 %v176_v9  ;;  %472 = vmatpush1.msra.mxu1 %v414_v21  ;;  %v411_v27 = vld [vmem:[#allocation4 + $0xc8] sm:$0xff]  ;;  %v164_v28 = vld [vmem:[%s7059_s1 + $0x58] sm:$0xff]  ;;  %v410_v29 = vld [vmem:[#allocation4 + $0xc0] sm:$0xff] }
  0x6c   :  { %202 = vmatpush1.msra.mxu0 %v175_v10  ;;  %473 = vmatprep.subr.mxu1 %v413_v23  ;;  %v163_v30 = vld [vmem:[%s7059_s1 + $0x50] sm:$0xff]  ;;  %v409_v31 = vld [vmem:[#allocation4 + $0xb8] sm:$0xff]  ;;  %v162_v32 = vld [vmem:[%s7059_s1 + $0x48] sm:$0xff] }
  0x6d   :  { %203 = vmatprep.subr.mxu0 %v174_v11  ;;  %474 = vmatpush1.msra.mxu1 %v412_v25  ;;  %v408_v33 = vld [vmem:[#allocation4 + $0xb0] sm:$0xff]  ;;  %v161_v34 = vld [vmem:[%s7059_s1 + $0x40] sm:$0xff]  ;;  %v407_v35 = vld [vmem:[#allocation4 + $0xa8] sm:$0xff] }
  0x6e   :  { %204 = vmatpush1.msra.mxu0 %v173_v12  ;;  %475 = vmatprep.subr.mxu1 %v411_v27  ;;  %v160_v36 = vld [vmem:[%s7059_s1 + $0x38] sm:$0xff]  ;;  %v406_v37 = vld [vmem:[#allocation4 + $0xa0] sm:$0xff]  ;;  %v159_v38 = vld [vmem:[%s7059_s1 + $0x30] sm:$0xff] }
  0x6f   :  { %205 = vmatprep.subr.mxu0 %v172_v13  ;;  %476 = vmatpush1.msra.mxu1 %v410_v29  ;;  %v405_v39 = vld [vmem:[#allocation4 + $0x98] sm:$0xff]  ;;  %v158_v40 = vld [vmem:[%s7059_s1 + $0x28] sm:$0xff]  ;;  %v404_v41 = vld [vmem:[#allocation4 + $0x90] sm:$0xff] }
  0x70   :  { %206 = vmatpush1.msra.mxu0 %v171_v14  ;;  %477 = vmatprep.subr.mxu1 %v409_v31  ;;  %v157_v42 = vld [vmem:[%s7059_s1 + $0x20] sm:$0xff]  ;;  %v403_v43 = vld [vmem:[#allocation4 + $0x88] sm:$0xff]  ;;  %v156_v44 = vld [vmem:[%s7059_s1 + $0x18] sm:$0xff] }
  0x71   :  { %207 = vmatprep.subr.mxu0 %v170_v15  ;;  %478 = vmatpush1.msra.mxu1 %v408_v33  ;;  %v402_v45 = vld [vmem:[#allocation4 + $0x80] sm:$0xff]  ;;  %v155_v46 = vld [vmem:[%s7059_s1 + $0x10] sm:$0xff]  ;;  %v401_v47 = vld [vmem:[#allocation4 + $0x78] sm:$0xff] }
  0x72   :  { %208 = vmatpush1.msra.mxu0 %v169_v16  ;;  %479 = vmatprep.subr.mxu1 %v407_v35  ;;  %v154_v48 = vld [vmem:[%s7059_s1 + $0x8] sm:$0xff]  ;;  %v400_v49 = vld [vmem:[#allocation4 + $0x70] sm:$0xff]  ;;  %v153_v50 = vld [vmem:[%s7059_s1] sm:$0xff] }
  0x73   :  { %209 = vmatprep.subr.mxu0 %v168_v19  ;;  %480 = vmatpush1.msra.mxu1 %v406_v37  ;;  %v399_v51 = vld [vmem:[#allocation4 + $0x68] sm:$0xff]  ;;  %v139_v52 = vld [vmem:[#allocation2] sm:$0xff]  ;;  %v397_v54 = vld [vmem:[#allocation4 + $0x58] sm:$0xff] }
  0x74   :  { %210 = vmatpush1.msra.mxu0 %v167_v22  ;;  %481 = vmatprep.subr.mxu1 %v405_v39  ;;  %v398_v53 = vld [vmem:[#allocation4 + $0x60] sm:$0xff]  ;;  %v396_v55 = vld [vmem:[#allocation4 + $0x50] sm:$0xff]  ;;  %v395_v56 = vld [vmem:[#allocation4 + $0x48] sm:$0xff] }
  0x75   :  { %211 = vmatprep.subr.mxu0 %v166_v24  ;;  %482 = vmatpush1.msra.mxu1 %v404_v41  ;;  %v140_v57 = vld [vmem:[#allocation2 + $0x8] sm:$0xff]  ;;  %v394_v58 = vld [vmem:[#allocation4 + $0x40] sm:$0xff]  ;;  %v393_v59 = vld [vmem:[#allocation4 + $0x38] sm:$0xff] }
  0x76   :  { %212 = vmatpush1.msra.mxu0 %v165_v26  ;;  %483 = vmatprep.subr.mxu1 %v403_v43  ;;  %v141_v60 = vld [vmem:[#allocation2 + $0x10] sm:$0xff]  ;;  %v142_v61 = vld [vmem:[#allocation2 + $0x18] sm:$0xff]  ;;  %v143_v62 = vld [vmem:[#allocation2 + $0x20] sm:$0xff] }
  0x77   :  { %213 = vmatprep.subr.mxu0 %v164_v28  ;;  %484 = vmatpush1.msra.mxu1 %v402_v45  ;;  %v144_v63 = vld [vmem:[#allocation2 + $0x28] sm:$0xff]  ;;  %v145_v1 = vld [vmem:[#allocation2 + $0x30] sm:$0xff]  ;;  %v146_v2 = vld [vmem:[#allocation2 + $0x38] sm:$0xff] }
  0x78   :  { %214 = vmatpush1.msra.mxu0 %v163_v30  ;;  %485 = vmatprep.subr.mxu1 %v401_v47  ;;  %v392_v3 = vld [vmem:[#allocation4 + $0x30] sm:$0xff]  ;;  %v391_v4 = vld [vmem:[#allocation4 + $0x28] sm:$0xff]  ;;  %v390_v5 = vld [vmem:[#allocation4 + $0x20] sm:$0xff] }
  0x79   :  { %215 = vmatprep.subr.mxu0 %v162_v32  ;;  %486 = vmatpush1.msra.mxu1 %v400_v49  ;;  %v389_v6 = vld [vmem:[#allocation4 + $0x18] sm:$0xff]  ;;  %v388_v7 = vld [vmem:[#allocation4 + $0x10] sm:$0xff]  ;;  %v387_v8 = vld [vmem:[#allocation4 + $0x8] sm:$0xff] }
  0x7a   :  { %216 = vmatpush1.msra.mxu0 %v161_v34  ;;  %487 = vmatprep.subr.mxu1 %v399_v51  ;;  %v386_v9 = vld [vmem:[#allocation4] sm:$0xff]  ;;  %v435_v10 = vld [vmem:[#allocation4 + $0x188] sm:$0xff]  ;;  %v433_v12 = vld [vmem:[#allocation4 + $0x178] sm:$0xff] }
  0x7b   :  { %217 = vmatprep.subr.mxu0 %v160_v36  ;;  %488 = vmatpush1.msra.mxu1 %v398_v53  ;;  %v434_v11 = vld [vmem:[#allocation4 + $0x180] sm:$0xff]  ;;  %v432_v13 = vld [vmem:[#allocation4 + $0x170] sm:$0xff]  ;;  %v431_v14 = vld [vmem:[#allocation4 + $0x168] sm:$0xff]  ;;  %v185_v53 = vlaneseq }
  0x7c   :  { %218 = vmatpush1.msra.mxu0 %v159_v38  ;;  %489 = vmatprep.subr.mxu1 %v397_v54  ;;  %v430_v15 = vld [vmem:[#allocation4 + $0x160] sm:$0xff]  ;;  %v429_v16 = vld [vmem:[#allocation4 + $0x158] sm:$0xff]  ;;  %v428_v17 = vld [vmem:[#allocation4 + $0x150] sm:$0xff] }
  0x7d   :  { %219 = vmatprep.subr.mxu0 %v158_v40  ;;  %490 = vmatpush1.msra.mxu1 %v396_v55  ;;  %v427_v18 = vld [vmem:[#allocation4 + $0x148] sm:$0xff]  ;;  %v426_v19 = vld [vmem:[#allocation4 + $0x140] sm:$0xff]  ;;  %v425_v20 = vld [vmem:[#allocation4 + $0x138] sm:$0xff]  ;;  %v5237_v54 = vshrl.u32 %v185_v53, 7 }
  0x7e   :  { %220 = vmatpush1.msra.mxu0 %v157_v42  ;;  %491 = vmatprep.subr.mxu1 %v395_v56  ;;  %v424_v21 = vld [vmem:[#allocation4 + $0x130] sm:$0xff]  ;;  %v423_v22 = vld [vmem:[#allocation4 + $0x128] sm:$0xff]  ;;  %v422_v23 = vld [vmem:[#allocation4 + $0x120] sm:$0xff] }
  0x7f   :  { %221 = vmatprep.subr.mxu0 %v156_v44  ;;  %492 = vmatpush1.msra.mxu1 %v394_v58  ;;  %v421_v24 = vld [vmem:[#allocation4 + $0x118] sm:$0xff]  ;;  %v420_v25 = vld [vmem:[#allocation4 + $0x110] sm:$0xff]  ;;  %v419_v26 = vld [vmem:[#allocation4 + $0x108] sm:$0xff]  ;;  %7100 = vst [vmem:[#allocation20_spill] sm:$0xff] %v5237_v54  ;;  %v187_v55 = vsub.s32 0, %v5237_v54 }
  0x80   :  { %222 = vmatpush1.msra.mxu0 %v155_v46  ;;  %493 = vmatprep.subr.mxu1 %v393_v59  ;;  %v418_v27 = vld [vmem:[#allocation4 + $0x100] sm:$0xff]  ;;  %v693_v28 = vld [vmem:[#allocation6 + $0xf8] sm:$0xff]  ;;  %v691_v30 = vld [vmem:[#allocation6 + $0xe8] sm:$0xff] }
  0x81   :  { %223 = vmatprep.subr.mxu0 %v154_v48  ;;  %494 = vmatpush1.msra.mxu1 %v392_v3  ;;  %v692_v29 = vld [vmem:[#allocation6 + $0xf0] sm:$0xff]  ;;  %v690_v31 = vld [vmem:[#allocation6 + $0xe0] sm:$0xff]  ;;  %v689_v32 = vld [vmem:[#allocation6 + $0xd8] sm:$0xff] }
  0x82   :  { %224 = vmatpush1.msra.mxu0 %v153_v50  ;;  %495 = vmatprep.subr.mxu1 %v391_v4  ;;  %v688_v33 = vld [vmem:[#allocation6 + $0xd0] sm:$0xff]  ;;  %v687_v34 = vld [vmem:[#allocation6 + $0xc8] sm:$0xff]  ;;  %v686_v35 = vld [vmem:[#allocation6 + $0xc0] sm:$0xff] }
  0x83   :  { %258 = vmatmul.mubr.f32.vlgmr.msra.gmra.mxu0 %v139_v52  ;;  %496 = vmatpush1.msra.mxu1 %v390_v5  ;;  %v685_v36 = vld [vmem:[#allocation6 + $0xb8] sm:$0xff]  ;;  %v684_v37 = vld [vmem:[#allocation6 + $0xb0] sm:$0xff]  ;;  %v683_v38 = vld [vmem:[#allocation6 + $0xa8] sm:$0xff] }
  0x84   :  { %263 = vmatprep.mubr.f32.mxu0 %v7068_v0  ;;  %497 = vmatprep.subr.mxu1 %v389_v6  ;;  %v682_v39 = vld [vmem:[#allocation6 + $0xa0] sm:$0xff]  ;;  %v681_v40 = vld [vmem:[#allocation6 + $0x98] sm:$0xff]  ;;  %v680_v41 = vld [vmem:[#allocation6 + $0x90] sm:$0xff] }
  0x85   :  { %498 = vmatpush1.msra.mxu1 %v388_v7  ;;  %744 = vmatprep.subr.mxu0 %v693_v28  ;;  %v679_v42 = vld [vmem:[#allocation6 + $0x88] sm:$0xff]  ;;  %v678_v43 = vld [vmem:[#allocation6 + $0x80] sm:$0xff]  ;;  %v677_v44 = vld [vmem:[#allocation6 + $0x78] sm:$0xff] }
  0x86   :  { %499 = vmatprep.subr.mxu1 %v387_v8  ;;  %745 = vmatpush1.msra.mxu0 %v692_v29  ;;  %v676_v45 = vld [vmem:[#allocation6 + $0x70] sm:$0xff]  ;;  %v675_v46 = vld [vmem:[#allocation6 + $0x68] sm:$0xff]  ;;  %v674_v47 = vld [vmem:[#allocation6 + $0x60] sm:$0xff] }
  0x87   :  { %264 = vmatmul.mubr.f32.gmra.mxu0 %v140_v57  ;;  %500 = vmatpush1.msra.mxu1 %v386_v9  ;;  %v673_v48 = vld [vmem:[#allocation6 + $0x58] sm:$0xff]  ;;  %v672_v49 = vld [vmem:[#allocation6 + $0x50] sm:$0xff]  ;;  %v671_v50 = vld [vmem:[#allocation6 + $0x48] sm:$0xff] }
  0x88   :  { %269 = vmatprep.mubr.f32.mxu0 %v7068_v0  ;;  %515 = vmatprep.subr.mxu1 %v435_v10  ;;  %v670_v51 = vld [vmem:[#allocation6 + $0x40] sm:$0xff]  ;;  %v669_v52 = vld [vmem:[#allocation6 + $0x38] sm:$0xff]  ;;  %v5240_v56 = vld [vmem:[#allocation13] sm:$0xff] }
  0x89   :  { %516 = vmatpush2.msra.mxu1 %v434_v11  ;;  %746 = vmatprep.subr.mxu0 %v691_v30  ;;  %v5242_v57 = vld [vmem:[#allocation13 + $0x8] sm:$0xff]  ;;  %v5245_v58 = vrot.slane %v5240_v56, %v187_v55 }
  0x8a   :  { %517 = vmatprep.subr.mxu1 %v433_v12  ;;  %747 = vmatpush1.msra.mxu0 %v690_v31  ;;  %v5248_v59 = vrot.slane %v5242_v57, %v187_v55 }
  0x8b   :  { %270 = vmatmul.mubr.f32.gmra.mxu0 %v141_v60  ;;  %518 = vmatpush2.msra.mxu1 %v432_v13 }
  0x8c   :  { %275 = vmatprep.mubr.f32.mxu0 %v7068_v0  ;;  %519 = vmatprep.subr.mxu1 %v431_v14 }
  0x8d   :  { %520 = vmatpush2.msra.mxu1 %v430_v15  ;;  %748 = vmatprep.subr.mxu0 %v689_v32 }
  0x8e   :  { %521 = vmatprep.subr.mxu1 %v429_v16  ;;  %749 = vmatpush1.msra.mxu0 %v688_v33 }
  0x8f   :  { %276 = vmatmul.mubr.f32.gmra.mxu0 %v142_v61  ;;  %522 = vmatpush2.msra.mxu1 %v428_v17 }
  0x90   :  { %281 = vmatprep.mubr.f32.mxu0 %v7068_v0  ;;  %523 = vmatprep.subr.mxu1 %v427_v18 }
  0x91   :  { %524 = vmatpush2.msra.mxu1 %v426_v19  ;;  %750 = vmatprep.subr.mxu0 %v687_v34 }
  0x92   :  { %525 = vmatprep.subr.mxu1 %v425_v20  ;;  %751 = vmatpush1.msra.mxu0 %v686_v35 }
  0x93   :  { %282 = vmatmul.mubr.f32.gmra.mxu0 %v143_v62  ;;  %526 = vmatpush2.msra.mxu1 %v424_v21 }
  0x94   :  { %287 = vmatprep.mubr.f32.mxu0 %v7068_v0  ;;  %527 = vmatprep.subr.mxu1 %v423_v22 }
  0x95   :  { %528 = vmatpush2.msra.mxu1 %v422_v23  ;;  %752 = vmatprep.subr.mxu0 %v685_v36 }
  0x96   :  { %529 = vmatprep.subr.mxu1 %v421_v24  ;;  %753 = vmatpush1.msra.mxu0 %v684_v37 }
  0x97   :  { %288 = vmatmul.mubr.f32.gmra.mxu0 %v144_v63  ;;  %530 = vmatpush2.msra.mxu1 %v420_v25 }
  0x98   :  { %293 = vmatprep.mubr.f32.mxu0 %v7068_v0  ;;  %531 = vmatprep.subr.mxu1 %v419_v26 }
  0x99   :  { %532 = vmatpush2.msra.mxu1 %v418_v27  ;;  %754 = vmatprep.subr.mxu0 %v683_v38 }
  0x9a   :  { %755 = vmatpush1.msra.mxu0 %v682_v39 }
  0x9b   :  { %294 = vmatmul.mubr.f32.gmra.mxu0 %v145_v1  ;;  %756 = vmatprep.subr.mxu0 %v681_v40 }
  0x9c   :  { %299 = vmatprep.mubr.f32.mxu0 %v7068_v0  ;;  %757 = vmatpush1.msra.mxu0 %v680_v41 }
  0x9d   :  { %758 = vmatprep.subr.mxu0 %v679_v42 }
  0x9e   :  { %759 = vmatpush1.msra.mxu0 %v678_v43 }
  0x9f   :  { %300 = vmatmul.mubr.f32.gmra.mxu0 %v146_v2  ;;  %760 = vmatprep.subr.mxu0 %v677_v44 }
  0xa0   :  { %761 = vmatpush1.msra.mxu0 %v676_v45 }
  0xa1   :  { %762 = vmatprep.subr.mxu0 %v675_v46 }
  0xa2   :  { %763 = vmatpush1.msra.mxu0 %v674_v47 }
  0xa3   :  { %764 = vmatprep.subr.mxu0 %v673_v48 }
  0xa4   :  { %765 = vmatpush1.msra.mxu0 %v672_v49 }
  0xa5   :  { %766 = vmatprep.subr.mxu0 %v671_v50 }
  0xa6   :  { %767 = vmatpush1.msra.mxu0 %v670_v51 }
  0xa7   :  { %768 = vmatprep.subr.mxu0 %v669_v52 }
 0x143   :  { %v259_v60 = vpop.f32.mrf.mxu0 }
 0x144   :  { %v260_v61 = vadd.f32 %v259_v60, %v5245_v58 }
 0x145   :  { %v261_v62 = vpop.f32.mrf.mxu0 }
 0x146   :  { %v322_v63 = vmul.f32 1.442695, %v260_v61  ;;  %v262_v1 = vadd.f32 %v261_v62, %v5248_v59  ;;  %vm306_vm2 = vcmp.gt.f32.partialorder %v260_v61, 0.0 }
 0x147   :  { %v265_v2 = vpop.f32.mrf.mxu0 }
 0x148   :  { %4554 = vpow2.f32 %v322_v63  ;;  %v324_v3 = vmul.f32 1.442695, %v262_v1  ;;  %v5253_v4 = vadd.f32 %v265_v2, %v5245_v58  ;;  %vm307_vm1 = vcmp.gt.f32.partialorder %v262_v1, 0.0 }
 0x149   :  { %v267_v5 = vpop.f32.mrf.mxu0 }
 0x14a   :  { %4556 = vpow2.f32 %v324_v3  ;;  %v326_v6 = vmul.f32 1.442695, %v5253_v4  ;;  %v268_v7 = vadd.f32 %v267_v5, %v5248_v59  ;;  %vm308_vm3 = vcmp.gt.f32.partialorder %v5253_v4, 0.0 }
 0x14b   :  { %v271_v8 = vpop.f32.mrf.mxu0 }
 0x14c   :  { %4558 = vpow2.f32 %v326_v6  ;;  %v328_v9 = vmul.f32 1.442695, %v268_v7  ;;  %v5258_v10 = vadd.f32 %v271_v8, %v5245_v58  ;;  %vm309_vm4 = vcmp.gt.f32.partialorder %v268_v7, 0.0 }
 0x14d   :  { %v273_v11 = vpop.f32.mrf.mxu0 }
 0x14e   :  { %4560 = vpow2.f32 %v328_v9  ;;  %v330_v12 = vmul.f32 1.442695, %v5258_v10  ;;  %v5262_v13 = vadd.f32 %v273_v11, %v5248_v59  ;;  %vm310_vm5 = vcmp.gt.f32.partialorder %v5258_v10, 0.0 }
 0x14f   :  { %v277_v14 = vpop.f32.mrf.mxu0 }
 0x150   :  { %4562 = vpow2.f32 %v330_v12  ;;  %v332_v15 = vmul.f32 1.442695, %v5262_v13  ;;  %v5266_v16 = vadd.f32 %v277_v14, %v5245_v58  ;;  %vm311_vm6 = vcmp.gt.f32.partialorder %v5262_v13, 0.0 }
 0x151   :  { %v279_v17 = vpop.f32.mrf.mxu0 }
 0x152   :  { %4564 = vpow2.f32 %v332_v15  ;;  %v334_v18 = vmul.f32 1.442695, %v5266_v16  ;;  %v5270_v19 = vadd.f32 %v279_v17, %v5248_v59  ;;  %vm312_vm7 = vcmp.gt.f32.partialorder %v5266_v16, 0.0 }
 0x153   :  { %v283_v20 = vpop.f32.mrf.mxu0 }
 0x154   :  { %4566 = vpow2.f32 %v334_v18  ;;  %v336_v21 = vmul.f32 1.442695, %v5270_v19  ;;  %v5274_v22 = vadd.f32 %v283_v20, %v5245_v58  ;;  %vm313_vm8 = vcmp.gt.f32.partialorder %v5270_v19, 0.0 }
 0x155   :  { %v4555_v23 = vpop.eup %4554  ;;  %v285_v24 = vpop.f32.mrf.mxu0 }
 0x156   :  { %4568 = vpow2.f32 %v336_v21  ;;  %v338_v25 = vmul.f32 1.442695, %v5274_v22  ;;  %v5278_v26 = vadd.f32 %v285_v24, %v5248_v59  ;;  %v4148_v29 = vadd.f32 -1.0, %v4555_v23 }
 0x157   :  { %v4557_v27 = vpop.eup %4556  ;;  %v289_v28 = vpop.f32.mrf.mxu0  ;;  %vm314_vm9 = vcmp.gt.f32.partialorder %v5274_v22, 0.0 }
 0x158   :  { %4570 = vpow2.f32 %v338_v25  ;;  %v340_v30 = vmul.f32 1.442695, %v5278_v26  ;;  %v5282_v31 = vadd.f32 %v289_v28, %v5245_v58  ;;  %v4149_v32 = vadd.f32 -1.0, %v4557_v27 }
 0x159   :  { %v4559_v33 = vpop.eup %4558  ;;  %v291_v34 = vpop.f32.mrf.mxu0  ;;  %v370_v40 = vsel %vm306_vm2, %v260_v61, %v4148_v29  ;;  %vm315_vm10 = vcmp.gt.f32.partialorder %v5278_v26, 0.0 }
 0x15a   :  { %4572 = vpow2.f32 %v340_v30  ;;  %v342_v35 = vmul.f32 1.442695, %v5282_v31  ;;  %v5286_v36 = vadd.f32 %v291_v34, %v5248_v59  ;;  %v371_v37 = vsel %vm307_vm1, %v262_v1, %v4149_v32  ;;  %v667_v34 = vld [vmem:[#allocation6 + $0x28] sm:$0xff] }
 0x15b   :  { %v4561_v38 = vpop.eup %4560  ;;  %v295_v39 = vpop.f32.mrf.mxu0  ;;  %4164 = vmatprep.mubr.msk.f32.mxu1 %vm444_vm0, %v371_v37  ;;  %v4150_v41 = vadd.f32 -1.0, %v4559_v33  ;;  %vm316_vm11 = vcmp.gt.f32.partialorder %v5282_v31, 0.0  ;;  %v668_v33 = vld [vmem:[#allocation6 + $0x30] sm:$0xff] }
 0x15c   :  { %4574 = vpow2.f32 %v342_v35  ;;  %v344_v42 = vmul.f32 1.442695, %v5286_v36  ;;  %v5292_v43 = vadd.f32 %v295_v39, %v5245_v58  ;;  %534 = vmatmul.mubr.f32.vlgmr.msra.gmra.mxu1 %v370_v40  ;;  %v4151_v44 = vadd.f32 -1.0, %v4561_v38  ;;  %769 = vmatpush1.msra.mxu0 %v668_v33  ;;  %v666_v35 = vld [vmem:[#allocation6 + $0x20] sm:$0xff]  ;;  %v664_v37 = vld [vmem:[#allocation6 + $0x10] sm:$0xff]  ;;  %v663_v38 = vld [vmem:[#allocation6 + $0x8] sm:$0xff] }
 0x15d   :  { %v4563_v45 = vpop.eup %4562  ;;  %v297_v46 = vpop.f32.mrf.mxu0  ;;  %v372_v52 = vsel %vm308_vm3, %v5253_v4, %v4150_v41  ;;  %vm317_vm12 = vcmp.gt.f32.partialorder %v5286_v36, 0.0  ;;  %770 = vmatprep.subr.mxu0 %v667_v34  ;;  %v662_v39 = vld [vmem:[#allocation6] sm:$0xff]  ;;  %v711_v40 = vld [vmem:[#allocation6 + $0x188] sm:$0xff] }
 0x15e   :  { %4576 = vpow2.f32 %v344_v42  ;;  %v346_v47 = vmul.f32 1.442695, %v5292_v43  ;;  %v5296_v48 = vadd.f32 %v297_v46, %v5248_v59  ;;  %v373_v49 = vsel %vm309_vm4, %v268_v7, %v4151_v44  ;;  %771 = vmatpush1.msra.mxu0 %v666_v35  ;;  %v710_v41 = vld [vmem:[#allocation6 + $0x180] sm:$0xff]  ;;  %v709_v42 = vld [vmem:[#allocation6 + $0x178] sm:$0xff]  ;;  %v707_v44 = vld [vmem:[#allocation6 + $0x168] sm:$0xff] }
 0x15f   :  { %v4565_v50 = vpop.eup %4564  ;;  %v301_v51 = vpop.f32.mrf.mxu0  ;;  %4165 = vmatprep.mubr.msk.f32.mxu1 %vm444_vm0, %v373_v49  ;;  %v4152_v53 = vadd.f32 -1.0, %v4563_v45  ;;  %vm318_vm13 = vcmp.gt.f32.partialorder %v5292_v43, 0.0  ;;  %v706_v45 = vld [vmem:[#allocation6 + $0x160] sm:$0xff]  ;;  %v705_v46 = vld [vmem:[#allocation6 + $0x158] sm:$0xff] }
 0x160   :  { %4578 = vpow2.f32 %v346_v47  ;;  %v348_v55 = vmul.f32 1.442695, %v5296_v48  ;;  %v5305_v60 = vadd.f32 %v301_v51, %v5245_v58  ;;  %540 = vmatmul.mubr.f32.gmra.mxu1 %v372_v52  ;;  %v4153_v61 = vadd.f32 -1.0, %v4565_v50  ;;  %v704_v47 = vld [vmem:[#allocation6 + $0x150] sm:$0xff]  ;;  %v702_v49 = vld [vmem:[#allocation6 + $0x140] sm:$0xff]  ;;  %v701_v50 = vld [vmem:[#allocation6 + $0x138] sm:$0xff] }
 0x161   :  { %v4567_v62 = vpop.eup %4566  ;;  %v303_v63 = vpop.f32.mrf.mxu0  ;;  %v374_v58 = vsel %vm310_vm5, %v5258_v10, %v4152_v53  ;;  %vm319_vm14 = vcmp.gt.f32.partialorder %v5296_v48, 0.0  ;;  %v700_v51 = vld [vmem:[#allocation6 + $0x130] sm:$0xff]  ;;  %v699_v52 = vld [vmem:[#allocation6 + $0x128] sm:$0xff]  ;;  %v698_v53 = vld [vmem:[#allocation6 + $0x120] sm:$0xff] }
 0x162   :  { %4580 = vpow2.f32 %v348_v55  ;;  %v350_v1 = vmul.f32 1.442695, %v5305_v60  ;;  %v304_v2 = vadd.f32 %v303_v63, %v5248_v59  ;;  %v375_v3 = vsel %vm311_vm6, %v5262_v13, %v4153_v61  ;;  %v697_v55 = vld [vmem:[#allocation6 + $0x118] sm:$0xff]  ;;  %v695_v61 = vld [vmem:[#allocation6 + $0x108] sm:$0xff] }
 0x163   :  { %v4569_v4 = vpop.eup %4568  ;;  %4166 = vmatprep.mubr.msk.f32.mxu1 %vm444_vm0, %v375_v3  ;;  %v4154_v5 = vadd.f32 -1.0, %v4567_v62  ;;  %vm320_vm15 = vcmp.gt.f32.partialorder %v5305_v60, 0.0  ;;  %v694_v62 = vld [vmem:[#allocation6 + $0x100] sm:$0xff]  ;;  %v1028_v63 = vld [vmem:[#allocation7 + $0x2d8] sm:$0xff]  ;;  %v1022_v3 = vld [vmem:[#allocation7 + $0x2a8] sm:$0xff] }
 0x164   :  { %4582 = vpow2.f32 %v350_v1  ;;  %v352_v6 = vmul.f32 1.442695, %v304_v2  ;;  %546 = vmatmul.mubr.f32.gmra.mxu1 %v374_v58  ;;  %v4155_v7 = vadd.f32 -1.0, %v4569_v4  ;;  %vm321_vm1 = vcmp.gt.f32.partialorder %v304_v2, 0.0  ;;  %v1027_v1 = vld [vmem:[#allocation7 + $0x2d0] sm:$0xff]  ;;  %1135 = vmatprep.subr.mxu1 %v1028_v63  ;;  %v1021_v4 = vld [vmem:[#allocation7 + $0x2a0] sm:$0xff] }
 0x165   :  { %v4571_v8 = vpop.eup %4570  ;;  %v376_v11 = vsel %vm312_vm7, %v5266_v16, %v4154_v5  ;;  %1136 = vmatpush1.msra.mxu1 %v1027_v1  ;;  %v1016_v58 = vld [vmem:[#allocation7 + $0x278] sm:$0xff]  ;;  %v1015_v5 = vld [vmem:[#allocation7 + $0x270] sm:$0xff] }
 0x166   :  { %4584 = vpow2.f32 %v352_v6  ;;  %v377_v59 = vsel %vm313_vm8, %v5270_v19, %v4155_v7  ;;  %v4156_v12 = vadd.f32 -1.0, %v4571_v8  ;;  %1137 = vmatprep.subr.mxu1 %v1022_v3  ;;  %v1010_v6 = vld [vmem:[#allocation7 + $0x248] sm:$0xff]  ;;  %v1009_v7 = vld [vmem:[#allocation7 + $0x240] sm:$0xff]  ;;  %v1004_v8 = vld [vmem:[#allocation7 + $0x218] sm:$0xff] }
 0x167   :  { %v4573_v9 = vpop.eup %4572  ;;  %4167 = vmatprep.mubr.msk.f32.mxu1 %vm444_vm0, %v377_v59  ;;  %1138 = vmatpush1.msra.mxu1 %v1021_v4  ;;  %v1003_v59 = vld [vmem:[#allocation7 + $0x210] sm:$0xff] }
 0x168   :  { %552 = vmatmul.mubr.f32.gmra.mxu1 %v376_v11  ;;  %v4157_v10 = vadd.f32 -1.0, %v4573_v9  ;;  %v378_v17 = vsel %vm314_vm9, %v5274_v22, %v4156_v12  ;;  %1139 = vmatprep.subr.mxu1 %v1016_v58  ;;  %v998_v9 = vld [vmem:[#allocation7 + $0x1e8] sm:$0xff]  ;;  %v997_v11 = vld [vmem:[#allocation7 + $0x1e0] sm:$0xff]  ;;  %v992_v12 = vld [vmem:[#allocation7 + $0x1b8] sm:$0xff] }
 0x169   :  { %v4575_v13 = vpop.eup %4574  ;;  %1140 = vmatpush1.msra.mxu1 %v1015_v5 }
 0x16a   :  { %v379_v14 = vsel %vm315_vm10, %v5278_v26, %v4157_v10  ;;  %v4158_v18 = vadd.f32 -1.0, %v4575_v13  ;;  %1141 = vmatprep.subr.mxu1 %v1010_v6  ;;  %v991_v10 = vld [vmem:[#allocation7 + $0x1b0] sm:$0xff]  ;;  %v986_v13 = vld [vmem:[#allocation7 + $0x188] sm:$0xff] }
 0x16b   :  { %v4577_v15 = vpop.eup %4576  ;;  %4168 = vmatprep.mubr.msk.f32.mxu1 %vm444_vm0, %v379_v14  ;;  %1142 = vmatpush1.msra.mxu1 %v1009_v7  ;;  %v985_v14 = vld [vmem:[#allocation7 + $0x180] sm:$0xff] }
 0x16c   :  { %558 = vmatmul.mubr.f32.gmra.mxu1 %v378_v17  ;;  %v4159_v19 = vadd.f32 -1.0, %v4577_v15  ;;  %v380_v23 = vsel %vm316_vm11, %v5282_v31, %v4158_v18  ;;  %1143 = vmatprep.subr.mxu1 %v1004_v8  ;;  %v980_v15 = vld [vmem:[#allocation7 + $0x158] sm:$0xff]  ;;  %v979_v17 = vld [vmem:[#allocation7 + $0x150] sm:$0xff]  ;;  %v974_v18 = vld [vmem:[#allocation7 + $0x128] sm:$0xff] }
 0x16d   :  { %v4579_v16 = vpop.eup %4578  ;;  %1144 = vmatpush1.msra.mxu1 %v1003_v59 }
 0x16e   :  { %v381_v20 = vsel %vm317_vm12, %v5286_v36, %v4159_v19  ;;  %v4160_v24 = vadd.f32 -1.0, %v4579_v16  ;;  %v665_v36 = vld [vmem:[#allocation6 + $0x18] sm:$0xff]  ;;  %1145 = vmatprep.subr.mxu1 %v998_v9  ;;  %v973_v19 = vld [vmem:[#allocation7 + $0x120] sm:$0xff]  ;;  %v968_v16 = vld [vmem:[#allocation7 + $0xf8] sm:$0xff] }
 0x16f   :  { %v4581_v21 = vpop.eup %4580  ;;  %4169 = vmatprep.mubr.msk.f32.mxu1 %vm444_vm0, %v381_v20  ;;  %772 = vmatprep.subr.mxu0 %v665_v36  ;;  %v967_v20 = vld [vmem:[#allocation7 + $0xf0] sm:$0xff] }
 0x170   :  { %564 = vmatmul.mubr.f32.gmra.mxu1 %v380_v23  ;;  %v4161_v25 = vadd.f32 -1.0, %v4581_v21  ;;  %v382_v28 = vsel %vm318_vm13, %v5292_v43, %v4160_v24  ;;  %773 = vmatpush1.msra.mxu0 %v664_v37  ;;  %v708_v43 = vld [vmem:[#allocation6 + $0x170] sm:$0xff]  ;;  %v962_v21 = vld [vmem:[#allocation7 + $0xc8] sm:$0xff]  ;;  %v956_v24 = vld [vmem:[#allocation7 + $0x98] sm:$0xff] }
 0x171   :  { %v4583_v22 = vpop.eup %4582  ;;  %774 = vmatprep.subr.mxu0 %v663_v38  ;;  %1146 = vmatpush1.msra.mxu1 %v997_v11  ;;  %v961_v23 = vld [vmem:[#allocation7 + $0xc0] sm:$0xff] }
 0x172   :  { %v383_v26 = vsel %vm319_vm14, %v5296_v48, %v4161_v25  ;;  %v4162_v29 = vadd.f32 -1.0, %v4583_v22  ;;  %775 = vmatpush1.msra.mxu0 %v662_v39  ;;  %v703_v48 = vld [vmem:[#allocation6 + $0x148] sm:$0xff]  ;;  %1147 = vmatprep.subr.mxu1 %v992_v12  ;;  %v955_v25 = vld [vmem:[#allocation7 + $0x90] sm:$0xff]  ;;  %v438_v22 = vsub.s32 1, %v5237_v54  ;;  %v1029_v12 = vld [vmem:[#allocation7 + $0x2e0] sm:$0xff] }
 0x173   :  { %v4585_v27 = vpop.eup %4584  ;;  %4170 = vmatprep.mubr.msk.f32.mxu1 %vm444_vm0, %v383_v26  ;;  %790 = vmatprep.subr.mxu0 %v711_v40 }
 0x174   :  { %570 = vmatmul.mubr.f32.gmra.mxu1 %v382_v28  ;;  %v4163_v30 = vadd.f32 -1.0, %v4585_v27  ;;  %v384_v32 = vsel %vm320_vm15, %v5305_v60, %v4162_v29  ;;  %791 = vmatpush2.msra.mxu0 %v710_v41  ;;  %v696_v60 = vld [vmem:[#allocation6 + $0x110] sm:$0xff]  ;;  %v5340_v26 = vrot.slane %v5240_v56, %v438_v22  ;;  %v5343_v27 = vrot.slane %v5242_v57, %v438_v22 }
 0x175   :  { %792 = vmatprep.subr.mxu0 %v709_v42  ;;  %1148 = vmatpush1.msra.mxu1 %v991_v10 }
 0x176   :  { %v385_v31 = vsel %vm321_vm1, %v304_v2, %v4163_v30  ;;  %793 = vmatpush2.msra.mxu0 %v708_v43  ;;  %v1030_v2 = vld [vmem:[#allocation7 + $0x2e8] sm:$0xff]  ;;  %1149 = vmatprep.subr.mxu1 %v986_v13 }
 0x177   :  { %4171 = vmatprep.mubr.msk.f32.mxu1 %vm444_vm0, %v385_v31  ;;  %794 = vmatprep.subr.mxu0 %v707_v44 }
 0x178   :  { %576 = vmatmul.mubr.f32.gmra.mxu1 %v384_v32  ;;  %795 = vmatpush2.msra.mxu0 %v706_v45 }
 0x179   :  { %796 = vmatprep.subr.mxu0 %v705_v46  ;;  %1150 = vmatpush1.msra.mxu1 %v985_v14 }
 0x17a   :  { %797 = vmatpush2.msra.mxu0 %v704_v47  ;;  %1151 = vmatprep.subr.mxu1 %v980_v15  ;;  %v1024_v15 = vld [vmem:[#allocation7 + $0x2b8] sm:$0xff] }
 0x17b   :  { %798 = vmatprep.subr.mxu0 %v703_v48  ;;  %1152 = vmatpush1.msra.mxu1 %v979_v17 }
 0x17c   :  { %799 = vmatpush2.msra.mxu0 %v702_v49  ;;  %1153 = vmatprep.subr.mxu1 %v974_v18 }
 0x17d   :  { %800 = vmatprep.subr.mxu0 %v701_v50  ;;  %1154 = vmatpush1.msra.mxu1 %v973_v19  ;;  %v1023_v19 = vld [vmem:[#allocation7 + $0x2b0] sm:$0xff] }
 0x17e   :  { %801 = vmatpush2.msra.mxu0 %v700_v51  ;;  %1155 = vmatprep.subr.mxu1 %v968_v16 }
 0x17f   :  { %802 = vmatprep.subr.mxu0 %v699_v52  ;;  %1156 = vmatpush1.msra.mxu1 %v967_v20 }
 0x180   :  { %803 = vmatpush2.msra.mxu0 %v698_v53  ;;  %1157 = vmatprep.subr.mxu1 %v962_v21 }
 0x181   :  { %804 = vmatprep.subr.mxu0 %v697_v55  ;;  %1158 = vmatpush1.msra.mxu1 %v961_v23  ;;  %v1018_v23 = vld [vmem:[#allocation7 + $0x288] sm:$0xff] }
 0x182   :  { %805 = vmatpush2.msra.mxu0 %v696_v60  ;;  %1159 = vmatprep.subr.mxu1 %v956_v24 }
 0x183   :  { %806 = vmatprep.subr.mxu0 %v695_v61  ;;  %1160 = vmatpush1.msra.mxu1 %v955_v25 }
 0x184   :  { %807 = vmatpush2.msra.mxu0 %v694_v62 }
 0x185   :  { %1248 = vmatprep.subr.mxu0 %v1030_v2 }
 0x21c   :  { %v535_v28 = vpop.f32.mrf.mxu1 }
 0x21d   :  { %v536_v29 = vadd.f32 %v535_v28, %v5340_v26 }
 0x21e   :  { %v537_v30 = vpop.f32.mrf.mxu1 }
 0x21f   :  { %v598_v31 = vmul.f32 1.442695, %v536_v29  ;;  %v538_v32 = vadd.f32 %v537_v30, %v5343_v27  ;;  %vm582_vm2 = vcmp.gt.f32.partialorder %v536_v29, 0.0 }
 0x220   :  { %v541_v33 = vpop.f32.mrf.mxu1 }
 0x221   :  { %4586 = vpow2.f32 %v598_v31  ;;  %v600_v34 = vmul.f32 1.442695, %v538_v32  ;;  %v5348_v35 = vadd.f32 %v541_v33, %v5340_v26  ;;  %vm583_vm3 = vcmp.gt.f32.partialorder %v538_v32, 0.0  ;;  %v1012_v33 = vld [vmem:[#allocation7 + $0x258] sm:$0xff] }
 0x222   :  { %v543_v36 = vpop.f32.mrf.mxu1 }
 0x223   :  { %4588 = vpow2.f32 %v600_v34  ;;  %v602_v56 = vmul.f32 1.442695, %v5348_v35  ;;  %v544_v57 = vadd.f32 %v543_v36, %v5343_v27  ;;  %vm584_vm5 = vcmp.gt.f32.partialorder %v5348_v35, 0.0 }
 0x224   :  { %v547_v37 = vpop.f32.mrf.mxu1 }
 0x225   :  { %4590 = vpow2.f32 %v602_v56  ;;  %v604_v38 = vmul.f32 1.442695, %v544_v57  ;;  %v5353_v39 = vadd.f32 %v547_v37, %v5340_v26  ;;  %vm585_vm4 = vcmp.gt.f32.partialorder %v544_v57, 0.0  ;;  %v1006_v37 = vld [vmem:[#allocation7 + $0x228] sm:$0xff] }
 0x226   :  { %v549_v40 = vpop.f32.mrf.mxu1 }
 0x227   :  { %4592 = vpow2.f32 %v604_v38  ;;  %v606_v41 = vmul.f32 1.442695, %v5353_v39  ;;  %v5357_v42 = vadd.f32 %v549_v40, %v5343_v27  ;;  %vm586_vm7 = vcmp.gt.f32.partialorder %v5353_v39, 0.0 }
 0x228   :  { %v553_v43 = vpop.f32.mrf.mxu1 }
 0x229   :  { %4594 = vpow2.f32 %v606_v41  ;;  %v608_v44 = vmul.f32 1.442695, %v5357_v42  ;;  %v5361_v45 = vadd.f32 %v553_v43, %v5340_v26  ;;  %vm587_vm6 = vcmp.gt.f32.partialorder %v5357_v42, 0.0  ;;  %v1005_v41 = vld [vmem:[#allocation7 + $0x220] sm:$0xff] }
 0x22a   :  { %v555_v46 = vpop.f32.mrf.mxu1 }
 0x22b   :  { %4596 = vpow2.f32 %v608_v44  ;;  %v610_v47 = vmul.f32 1.442695, %v5361_v45  ;;  %v5365_v48 = vadd.f32 %v555_v46, %v5343_v27  ;;  %vm588_vm9 = vcmp.gt.f32.partialorder %v5361_v45, 0.0 }
 0x22c   :  { %v559_v49 = vpop.f32.mrf.mxu1 }
 0x22d   :  { %4598 = vpow2.f32 %v610_v47  ;;  %v612_v50 = vmul.f32 1.442695, %v5365_v48  ;;  %v5369_v51 = vadd.f32 %v559_v49, %v5340_v26  ;;  %v1000_v47 = vld [vmem:[#allocation7 + $0x1f8] sm:$0xff]  ;;  %vm589_vm8 = vcmp.gt.f32.partialorder %v5365_v48, 0.0 }
 0x22e   :  { %v4587_v52 = vpop.eup %4586  ;;  %v561_v53 = vpop.f32.mrf.mxu1 }
 0x22f   :  { %4600 = vpow2.f32 %v612_v50  ;;  %v614_v55 = vmul.f32 1.442695, %v5369_v51  ;;  %v5373_v60 = vadd.f32 %v561_v53, %v5343_v27  ;;  %v4172_v62 = vadd.f32 -1.0, %v4587_v52  ;;  %v993_v52 = vld [vmem:[#allocation7 + $0x1c0] sm:$0xff] }
 0x230   :  { %v4589_v61 = vpop.eup %4588  ;;  %v565_v63 = vpop.f32.mrf.mxu1  ;;  %vm590_vm11 = vcmp.gt.f32.partialorder %v5369_v51, 0.0 }
 0x231   :  { %4602 = vpow2.f32 %v614_v55  ;;  %v616_v1 = vmul.f32 1.442695, %v5373_v60  ;;  %v5377_v2 = vadd.f32 %v565_v63, %v5340_v26  ;;  %v4173_v58 = vadd.f32 -1.0, %v4589_v61 }
 0x232   :  { %v4591_v3 = vpop.eup %4590  ;;  %v567_v4 = vpop.f32.mrf.mxu1  ;;  %v646_v8 = vsel %vm582_vm2, %v536_v29, %v4172_v62  ;;  %v1017_v29 = vld [vmem:[#allocation7 + $0x280] sm:$0xff]  ;;  %v988_v62 = vld [vmem:[#allocation7 + $0x198] sm:$0xff]  ;;  %vm591_vm10 = vcmp.gt.f32.partialorder %v5373_v60, 0.0 }
 0x233   :  { %4604 = vpow2.f32 %v616_v1  ;;  %v618_v5 = vmul.f32 1.442695, %v5377_v2  ;;  %v5381_v6 = vadd.f32 %v567_v4, %v5343_v27  ;;  %v647_v9 = vsel %vm583_vm3, %v538_v32, %v4173_v58 }
 0x234   :  { %v4593_v7 = vpop.eup %4592  ;;  %v571_v59 = vpop.f32.mrf.mxu1  ;;  %v4174_v11 = vadd.f32 -1.0, %v4591_v3  ;;  %4188 = vmatprep.mubr.msk.f32.mxu0 %vm444_vm0, %v647_v9  ;;  %v982_v3 = vld [vmem:[#allocation7 + $0x168] sm:$0xff]  ;;  %vm592_vm13 = vcmp.gt.f32.partialorder %v5377_v2, 0.0 }
 0x235   :  { %4606 = vpow2.f32 %v618_v5  ;;  %v620_v10 = vmul.f32 1.442695, %v5381_v6  ;;  %v5385_v13 = vadd.f32 %v571_v59, %v5340_v26  ;;  %v4175_v14 = vadd.f32 -1.0, %v4593_v7  ;;  %809 = vmatmul.mubr.f32.vlgmr.msra.gmra.mxu0 %v646_v8  ;;  %v976_v8 = vld [vmem:[#allocation7 + $0x138] sm:$0xff] }
 0x236   :  { %v4595_v17 = vpop.eup %4594  ;;  %v573_v18 = vpop.f32.mrf.mxu1  ;;  %1249 = vmatpush1.msra.mxu0 %v1029_v12  ;;  %v648_v22 = vsel %vm584_vm5, %v5348_v35, %v4174_v11  ;;  %v1011_v35 = vld [vmem:[#allocation7 + $0x250] sm:$0xff]  ;;  %vm593_vm12 = vcmp.gt.f32.partialorder %v5381_v6, 0.0  ;;  %v970_v11 = vld [vmem:[#allocation7 + $0x108] sm:$0xff] }
 0x237   :  { %4608 = vpow2.f32 %v620_v10  ;;  %v622_v16 = vmul.f32 1.442695, %v5385_v13  ;;  %v5391_v20 = vadd.f32 %v573_v18, %v5343_v27  ;;  %v649_v21 = vsel %vm585_vm4, %v544_v57, %v4175_v14  ;;  %1250 = vmatprep.subr.mxu0 %v1024_v15 }
 0x238   :  { %v4597_v24 = vpop.eup %4596  ;;  %v577_v25 = vpop.f32.mrf.mxu1  ;;  %4189 = vmatprep.mubr.msk.f32.mxu0 %vm444_vm0, %v649_v21  ;;  %v4176_v28 = vadd.f32 -1.0, %v4595_v17  ;;  %1251 = vmatpush1.msra.mxu0 %v1023_v19  ;;  %v964_v17 = vld [vmem:[#allocation7 + $0xd8] sm:$0xff]  ;;  %vm594_vm15 = vcmp.gt.f32.partialorder %v5385_v13, 0.0 }
 0x239   :  { %4610 = vpow2.f32 %v622_v16  ;;  %v624_v30 = vmul.f32 1.442695, %v5391_v20  ;;  %v5397_v31 = vadd.f32 %v577_v25, %v5340_v26  ;;  %v4177_v32 = vadd.f32 -1.0, %v4597_v24  ;;  %815 = vmatmul.mubr.f32.gmra.mxu0 %v648_v22  ;;  %1252 = vmatprep.subr.mxu0 %v1018_v23  ;;  %v958_v16 = vld [vmem:[#allocation7 + $0xa8] sm:$0xff] }
 0x23a   :  { %v4599_v34 = vpop.eup %4598  ;;  %v579_v36 = vpop.f32.mrf.mxu1  ;;  %1253 = vmatpush1.msra.mxu0 %v1017_v29  ;;  %v650_v40 = vsel %vm586_vm7, %v5353_v39, %v4176_v28  ;;  %v994_v39 = vld [vmem:[#allocation7 + $0x1c8] sm:$0xff]  ;;  %vm595_vm14 = vcmp.gt.f32.partialorder %v5391_v20, 0.0  ;;  %v957_v28 = vld [vmem:[#allocation7 + $0xa0] sm:$0xff]  ;;  %v952_v29 = vld [vmem:[#allocation7 + $0x78] sm:$0xff] }
 0x23b   :  { %4612 = vpow2.f32 %v624_v30  ;;  %v626_v56 = vmul.f32 1.442695, %v5397_v31  ;;  %v5403_v57 = vadd.f32 %v579_v36, %v5343_v27  ;;  %v651_v26 = vsel %vm587_vm6, %v5357_v42, %v4177_v32  ;;  %1254 = vmatprep.subr.mxu0 %v1012_v33  ;;  %v999_v42 = vld [vmem:[#allocation7 + $0x1f0] sm:$0xff]  ;;  %v950_v22 = vld [vmem:[#allocation7 + $0x68] sm:$0xff]  ;;  %v944_v30 = vld [vmem:[#allocation7 + $0x38] sm:$0xff] }
 0x23c   :  { %v4601_v38 = vpop.eup %4600  ;;  %4190 = vmatprep.mubr.msk.f32.mxu0 %vm444_vm0, %v651_v26  ;;  %v4178_v46 = vadd.f32 -1.0, %v4599_v34  ;;  %1255 = vmatpush1.msra.mxu0 %v1011_v35  ;;  %vm596_vm2 = vcmp.gt.f32.partialorder %v5397_v31, 0.0  ;;  %v951_v32 = vld [vmem:[#allocation7 + $0x70] sm:$0xff]  ;;  %v946_v34 = vld [vmem:[#allocation7 + $0x48] sm:$0xff]  ;;  %v945_v35 = vld [vmem:[#allocation7 + $0x40] sm:$0xff] }
 0x23d   :  { %4614 = vpow2.f32 %v626_v56  ;;  %v628_v43 = vmul.f32 1.442695, %v5403_v57  ;;  %v4179_v44 = vadd.f32 -1.0, %v4601_v38  ;;  %821 = vmatmul.mubr.f32.gmra.mxu0 %v650_v40  ;;  %1256 = vmatprep.subr.mxu0 %v1006_v37  ;;  %vm597_vm1 = vcmp.gt.f32.partialorder %v5403_v57, 0.0  ;;  %v943_v33 = vld [vmem:[#allocation7 + $0x30] sm:$0xff]  ;;  %v938_v36 = vld [vmem:[#allocation7 + $0x8] sm:$0xff] }
 0x23e   :  { %v4603_v27 = vpop.eup %4602  ;;  %1257 = vmatpush1.msra.mxu0 %v1005_v41  ;;  %v652_v53 = vsel %vm588_vm9, %v5361_v45, %v4178_v46  ;;  %v981_v45 = vld [vmem:[#allocation7 + $0x160] sm:$0xff]  ;;  %1161 = vmatprep.subr.mxu1 %v950_v22  ;;  %v940_v56 = vld [vmem:[#allocation7 + $0x18] sm:$0xff]  ;;  %v939_v26 = vld [vmem:[#allocation7 + $0x10] sm:$0xff] }
 0x23f   :  { %4616 = vpow2.f32 %v628_v43  ;;  %v653_v49 = vsel %vm589_vm8, %v5365_v48, %v4179_v44  ;;  %1258 = vmatprep.subr.mxu0 %v1000_v47  ;;  %v4180_v61 = vadd.f32 -1.0, %v4603_v27  ;;  %v987_v48 = vld [vmem:[#allocation7 + $0x190] sm:$0xff]  ;;  %v1081_v37 = vld [vmem:[#allocation7 + $0x480] sm:$0xff]  ;;  %v1084_v38 = vld [vmem:[#allocation7 + $0x498] sm:$0xff] }
 0x240   :  { %v4605_v50 = vpop.eup %4604  ;;  %4191 = vmatprep.mubr.msk.f32.mxu0 %vm444_vm0, %v653_v49  ;;  %1259 = vmatpush1.msra.mxu0 %v999_v42  ;;  %v1076_v40 = vld [vmem:[#allocation7 + $0x458] sm:$0xff]  ;;  %v1083_v41 = vld [vmem:[#allocation7 + $0x490] sm:$0xff]  ;;  %v1078_v44 = vld [vmem:[#allocation7 + $0x468] sm:$0xff] }
 0x241   :  { %v4181_v55 = vadd.f32 -1.0, %v4605_v50  ;;  %827 = vmatmul.mubr.f32.gmra.mxu0 %v652_v53  ;;  %1260 = vmatprep.subr.mxu0 %v994_v39  ;;  %v654_v58 = vsel %vm590_vm11, %v5369_v51, %v4180_v61  ;;  %v969_v51 = vld [vmem:[#allocation7 + $0x100] sm:$0xff]  ;;  %v1075_v43 = vld [vmem:[#allocation7 + $0x450] sm:$0xff]  ;;  %v1070_v46 = vld [vmem:[#allocation7 + $0x428] sm:$0xff] }
 0x242   :  { %v4607_v63 = vpop.eup %4606  ;;  %1261 = vmatpush1.msra.mxu0 %v993_v52  ;;  %v1077_v47 = vld [vmem:[#allocation7 + $0x460] sm:$0xff]  ;;  %v1072_v42 = vld [vmem:[#allocation7 + $0x438] sm:$0xff]  ;;  %v1071_v39 = vld [vmem:[#allocation7 + $0x430] sm:$0xff] }
 0x243   :  { %v655_v1 = vsel %vm591_vm10, %v5373_v60, %v4181_v55  ;;  %1262 = vmatprep.subr.mxu0 %v988_v62  ;;  %v4182_v7 = vadd.f32 -1.0, %v4607_v63  ;;  %v975_v60 = vld [vmem:[#allocation7 + $0x130] sm:$0xff]  ;;  %v1069_v27 = vld [vmem:[#allocation7 + $0x420] sm:$0xff]  ;;  %v1064_v49 = vld [vmem:[#allocation7 + $0x3f8] sm:$0xff] }
 0x244   :  { %v4609_v4 = vpop.eup %4608  ;;  %4192 = vmatprep.mubr.msk.f32.mxu0 %vm444_vm0, %v655_v1  ;;  %1263 = vmatpush1.msra.mxu0 %v987_v48  ;;  %v1063_v50 = vld [vmem:[#allocation7 + $0x3f0] sm:$0xff]  ;;  %v1066_v52 = vld [vmem:[#allocation7 + $0x408] sm:$0xff]  ;;  %v1065_v55 = vld [vmem:[#allocation7 + $0x400] sm:$0xff] }
 0x245   :  { %v4183_v5 = vadd.f32 -1.0, %v4609_v4  ;;  %833 = vmatmul.mubr.f32.gmra.mxu0 %v654_v58  ;;  %1264 = vmatprep.subr.mxu0 %v982_v3  ;;  %v656_v10 = vsel %vm592_vm13, %v5377_v2, %v4182_v7  ;;  %v1058_v53 = vld [vmem:[#allocation7 + $0x3c8] sm:$0xff]  ;;  %v1057_v61 = vld [vmem:[#allocation7 + $0x3c0] sm:$0xff]  ;;  %v1060_v62 = vld [vmem:[#allocation7 + $0x3d8] sm:$0xff] }
 0x246   :  { %v4611_v59 = vpop.eup %4610  ;;  %1265 = vmatpush1.msra.mxu0 %v981_v45  ;;  %v1052_v63 = vld [vmem:[#allocation7 + $0x398] sm:$0xff]  ;;  %v1059_v48 = vld [vmem:[#allocation7 + $0x3d0] sm:$0xff]  ;;  %v1054_v3 = vld [vmem:[#allocation7 + $0x3a8] sm:$0xff] }
 0x247   :  { %v657_v9 = vsel %vm593_vm12, %v5381_v6, %v4183_v5  ;;  %1266 = vmatprep.subr.mxu0 %v976_v8  ;;  %v4184_v15 = vadd.f32 -1.0, %v4611_v59  ;;  %v963_v6 = vld [vmem:[#allocation7 + $0xd0] sm:$0xff]  ;;  %v1046_v4 = vld [vmem:[#allocation7 + $0x368] sm:$0xff]  ;;  %v1053_v45 = vld [vmem:[#allocation7 + $0x3a0] sm:$0xff] }
 0x248   :  { %v4613_v12 = vpop.eup %4612  ;;  %4193 = vmatprep.mubr.msk.f32.mxu0 %vm444_vm0, %v657_v9  ;;  %1267 = vmatpush1.msra.mxu0 %v975_v60  ;;  %v1051_v1 = vld [vmem:[#allocation7 + $0x390] sm:$0xff]  ;;  %v1045_v58 = vld [vmem:[#allocation7 + $0x360] sm:$0xff]  ;;  %v1048_v5 = vld [vmem:[#allocation7 + $0x378] sm:$0xff] }
 0x249   :  { %v4185_v14 = vadd.f32 -1.0, %v4613_v12  ;;  %839 = vmatmul.mubr.f32.gmra.mxu0 %v656_v10  ;;  %1268 = vmatprep.subr.mxu0 %v970_v11  ;;  %v658_v2 = vsel %vm594_vm15, %v5385_v13, %v4184_v15  ;;  %v949_v13 = vld [vmem:[#allocation7 + $0x60] sm:$0xff]  ;;  %v1040_v7 = vld [vmem:[#allocation7 + $0x338] sm:$0xff]  ;;  %v1047_v8 = vld [vmem:[#allocation7 + $0x370] sm:$0xff] }
 0x24a   :  { %v4615_v18 = vpop.eup %4614  ;;  %1269 = vmatpush1.msra.mxu0 %v969_v51  ;;  %1162 = vmatpush1.msra.mxu1 %v949_v13  ;;  %v1039_v59 = vld [vmem:[#allocation7 + $0x330] sm:$0xff]  ;;  %v1042_v60 = vld [vmem:[#allocation7 + $0x348] sm:$0xff]  ;;  %v1041_v11 = vld [vmem:[#allocation7 + $0x340] sm:$0xff] }
 0x24b   :  { %v659_v19 = vsel %vm595_vm14, %v5391_v20, %v4185_v14  ;;  %1270 = vmatprep.subr.mxu0 %v964_v17  ;;  %v4186_v24 = vadd.f32 -1.0, %v4615_v18  ;;  %1163 = vmatprep.subr.mxu1 %v944_v30  ;;  %v1034_v9 = vld [vmem:[#allocation7 + $0x308] sm:$0xff]  ;;  %v1033_v12 = vld [vmem:[#allocation7 + $0x300] sm:$0xff]  ;;  %v1036_v51 = vld [vmem:[#allocation7 + $0x318] sm:$0xff]  ;;  %v714_v17 = vsub.s32 2, %v5237_v54 }
 0x24c   :  { %v4617_v21 = vpop.eup %4616  ;;  %4194 = vmatprep.mubr.msk.f32.mxu0 %vm444_vm0, %v659_v19  ;;  %1271 = vmatpush1.msra.mxu0 %v963_v6  ;;  %v1035_v10 = vld [vmem:[#allocation7 + $0x310] sm:$0xff]  ;;  %v1032_v14 = vld [vmem:[#allocation7 + $0x2f8] sm:$0xff]  ;;  %v1805_v15 = vld [vmem:[#allocation9 + $0x2d8] sm:$0xff] }
 0x24d   :  { %v4187_v23 = vadd.f32 -1.0, %v4617_v21  ;;  %845 = vmatmul.mubr.f32.gmra.mxu0 %v658_v2  ;;  %1272 = vmatprep.subr.mxu0 %v958_v16  ;;  %v660_v20 = vsel %vm596_vm2, %v5397_v31, %v4186_v24  ;;  %v937_v31 = vld [vmem:[#allocation7] sm:$0xff]  ;;  %v4842_v18 = vld [vmem:[#allocation13] sm:$0xff] }
 0x24e   :  { %1273 = vmatpush1.msra.mxu0 %v957_v28  ;;  %1164 = vmatpush1.msra.mxu1 %v943_v33  ;;  %v5435_v6 = vrot.slane %v4842_v18, %v714_v17  ;;  %v4843_v19 = vld [vmem:[#allocation13 + $0x8] sm:$0xff]  ;;  %v1020_v18 = vld [vmem:[#allocation7 + $0x298] sm:$0xff] }
 0x24f   :  { %v661_v25 = vsel %vm597_vm1, %v5403_v57, %v4187_v23  ;;  %1274 = vmatprep.subr.mxu0 %v952_v29  ;;  %1165 = vmatprep.subr.mxu1 %v938_v36  ;;  %v1082_v57 = vld [vmem:[#allocation7 + $0x488] sm:$0xff]  ;;  %v5437_v16 = vrot.slane %v4843_v19, %v714_v17 }
 0x250   :  { %4195 = vmatprep.mubr.msk.f32.mxu0 %vm444_vm0, %v661_v25  ;;  %1275 = vmatpush1.msra.mxu0 %v951_v32 }
 0x251   :  { %851 = vmatmul.mubr.f32.gmra.mxu0 %v660_v20  ;;  %1276 = vmatprep.subr.mxu0 %v946_v34 }
 0x252   :  { %1277 = vmatpush1.msra.mxu0 %v945_v35  ;;  %1166 = vmatpush1.msra.mxu1 %v937_v31 }
 0x253   :  { %1278 = vmatprep.subr.mxu0 %v940_v56  ;;  %1181 = vmatprep.subr.mxu1 %v1082_v57 }
 0x254   :  { %1279 = vmatpush1.msra.mxu0 %v939_v26  ;;  %1182 = vmatpush2.msra.mxu1 %v1081_v37 }
 0x255   :  { %1294 = vmatprep.subr.mxu0 %v1084_v38  ;;  %1183 = vmatprep.subr.mxu1 %v1076_v40 }
 0x256   :  { %1295 = vmatpush2.msra.mxu0 %v1083_v41  ;;  %1184 = vmatpush2.msra.mxu1 %v1075_v43 }
 0x257   :  { %1296 = vmatprep.subr.mxu0 %v1078_v44  ;;  %1185 = vmatprep.subr.mxu1 %v1070_v46 }
 0x258   :  { %1297 = vmatpush2.msra.mxu0 %v1077_v47  ;;  %1186 = vmatpush2.msra.mxu1 %v1069_v27 }
 0x259   :  { %1298 = vmatprep.subr.mxu0 %v1072_v42  ;;  %1187 = vmatprep.subr.mxu1 %v1064_v49 }
 0x25a   :  { %1299 = vmatpush2.msra.mxu0 %v1071_v39  ;;  %1188 = vmatpush2.msra.mxu1 %v1063_v50 }
 0x25b   :  { %1300 = vmatprep.subr.mxu0 %v1066_v52  ;;  %1189 = vmatprep.subr.mxu1 %v1058_v53 }
 0x25c   :  { %1301 = vmatpush2.msra.mxu0 %v1065_v55  ;;  %1190 = vmatpush2.msra.mxu1 %v1057_v61 }
 0x25d   :  { %1302 = vmatprep.subr.mxu0 %v1060_v62  ;;  %1191 = vmatprep.subr.mxu1 %v1052_v63 }
 0x25e   :  { %1303 = vmatpush2.msra.mxu0 %v1059_v48  ;;  %1192 = vmatpush2.msra.mxu1 %v1051_v1 }
 0x25f   :  { %1304 = vmatprep.subr.mxu0 %v1054_v3  ;;  %1193 = vmatprep.subr.mxu1 %v1046_v4  ;;  %v1031_v3 = vld [vmem:[#allocation7 + $0x2f0] sm:$0xff]  ;;  %v1804_v4 = vld [vmem:[#allocation9 + $0x2d0] sm:$0xff] }
 0x260   :  { %1305 = vmatpush2.msra.mxu0 %v1053_v45  ;;  %1194 = vmatpush2.msra.mxu1 %v1045_v58 }
 0x261   :  { %1306 = vmatprep.subr.mxu0 %v1048_v5  ;;  %1195 = vmatprep.subr.mxu1 %v1040_v7  ;;  %v1026_v7 = vld [vmem:[#allocation7 + $0x2c8] sm:$0xff] }
 0x262   :  { %1307 = vmatpush2.msra.mxu0 %v1047_v8  ;;  %1196 = vmatpush2.msra.mxu1 %v1039_v59  ;;  %v1799_v8 = vld [vmem:[#allocation9 + $0x2a8] sm:$0xff] }
 0x263   :  { %1308 = vmatprep.subr.mxu0 %v1042_v60  ;;  %1197 = vmatprep.subr.mxu1 %v1034_v9  ;;  %v1025_v9 = vld [vmem:[#allocation7 + $0x2c0] sm:$0xff] }
 0x264   :  { %1309 = vmatpush2.msra.mxu0 %v1041_v11  ;;  %1198 = vmatpush2.msra.mxu1 %v1033_v12 }
 0x265   :  { %1310 = vmatprep.subr.mxu0 %v1036_v51  ;;  %1361 = vmatprep.subr.mxu1 %v1032_v14  ;;  %v1798_v51 = vld [vmem:[#allocation9 + $0x2a0] sm:$0xff] }
 0x266   :  { %1311 = vmatpush2.msra.mxu0 %v1035_v10 }
 0x267   :  { %2310 = vmatprep.subr.mxu0 %v1805_v15 }
 0x2f5   :  { %v810_v21 = vpop.f32.mrf.mxu0 }
 0x2f6   :  { %v811_v2 = vadd.f32 %v810_v21, %v5435_v6 }
 0x2f7   :  { %v812_v23 = vpop.f32.mrf.mxu0 }
 0x2f8   :  { %v873_v24 = vmul.f32 1.442695, %v811_v2  ;;  %v813_v25 = vadd.f32 %v812_v23, %v5437_v16  ;;  %vm857_vm4 = vcmp.gt.f32.partialorder %v811_v2, 0.0  ;;  %v1019_v23 = vld [vmem:[#allocation7 + $0x290] sm:$0xff] }
 0x2f9   :  { %v816_v20 = vpop.f32.mrf.mxu0 }
 0x2fa   :  { %4618 = vpow2.f32 %v873_v24  ;;  %v875_v22 = vmul.f32 1.442695, %v813_v25  ;;  %v5442_v28 = vadd.f32 %v816_v20, %v5435_v6  ;;  %vm858_vm3 = vcmp.gt.f32.partialorder %v813_v25, 0.0 }
 0x2fb   :  { %v818_v13 = vpop.f32.mrf.mxu0 }
 0x2fc   :  { %4620 = vpow2.f32 %v875_v22  ;;  %v877_v29 = vmul.f32 1.442695, %v5442_v28  ;;  %v5446_v30 = vadd.f32 %v818_v13, %v5437_v16  ;;  %vm859_vm6 = vcmp.gt.f32.partialorder %v5442_v28, 0.0  ;;  %v1014_v22 = vld [vmem:[#allocation7 + $0x268] sm:$0xff] }
 0x2fd   :  { %v822_v32 = vpop.f32.mrf.mxu0 }
 0x2fe   :  { %4622 = vpow2.f32 %v877_v29  ;;  %v879_v33 = vmul.f32 1.442695, %v5446_v30  ;;  %v5450_v34 = vadd.f32 %v822_v32, %v5435_v6  ;;  %vm860_vm5 = vcmp.gt.f32.partialorder %v5446_v30, 0.0  ;;  %v1793_v29 = vld [vmem:[#allocation9 + $0x278] sm:$0xff]  ;;  %v1013_v32 = vld [vmem:[#allocation7 + $0x260] sm:$0xff] }
 0x2ff   :  { %v824_v36 = vpop.f32.mrf.mxu0 }
 0x300   :  { %4624 = vpow2.f32 %v879_v33  ;;  %v881_v35 = vmul.f32 1.442695, %v5450_v34  ;;  %v5454_v31 = vadd.f32 %v824_v36, %v5437_v16  ;;  %vm861_vm8 = vcmp.gt.f32.partialorder %v5450_v34, 0.0 }
 0x301   :  { %v828_v56 = vpop.f32.mrf.mxu0 }
 0x302   :  { %v883_v57 = vmul.f32 1.442695, %v5454_v31  ;;  %v5458_v26 = vadd.f32 %v828_v56, %v5435_v6  ;;  %4626 = vpow2.f32 %v881_v35  ;;  %vm862_vm7 = vcmp.gt.f32.partialorder %v5454_v31, 0.0  ;;  %v1008_v35 = vld [vmem:[#allocation7 + $0x238] sm:$0xff] }
 0x303   :  { %v830_v37 = vpop.f32.mrf.mxu0 }
 0x304   :  { %4628 = vpow2.f32 %v883_v57  ;;  %v885_v38 = vmul.f32 1.442695, %v5458_v26  ;;  %v5462_v40 = vadd.f32 %v830_v37, %v5437_v16  ;;  %vm863_vm10 = vcmp.gt.f32.partialorder %v5458_v26, 0.0 }
 0x305   :  { %v834_v41 = vpop.f32.mrf.mxu0 }
 0x306   :  { %v887_v43 = vmul.f32 1.442695, %v5462_v40  ;;  %v5466_v44 = vadd.f32 %v834_v41, %v5435_v6  ;;  %4630 = vpow2.f32 %v885_v38  ;;  %v1007_v38 = vld [vmem:[#allocation7 + $0x230] sm:$0xff]  ;;  %vm864_vm9 = vcmp.gt.f32.partialorder %v5462_v40, 0.0 }
 0x307   :  { %v4619_v46 = vpop.eup %4618  ;;  %v836_v47 = vpop.f32.mrf.mxu0 }
 0x308   :  { %4632 = vpow2.f32 %v887_v43  ;;  %v889_v27 = vmul.f32 1.442695, %v5466_v44  ;;  %v4196_v49 = vadd.f32 -1.0, %v4619_v46  ;;  %v5470_v39 = vadd.f32 %v836_v47, %v5437_v16  ;;  %v1001_v47 = vld [vmem:[#allocation7 + $0x200] sm:$0xff] }
 0x309   :  { %v4621_v42 = vpop.eup %4620  ;;  %v840_v50 = vpop.f32.mrf.mxu0  ;;  %vm865_vm12 = vcmp.gt.f32.partialorder %v5466_v44, 0.0 }
 0x30a   :  { %v5473_v52 = vadd.f32 %v840_v50, %v5435_v6  ;;  %v4197_v53 = vadd.f32 -1.0, %v4621_v42  ;;  %4634 = vpow2.f32 %v889_v27  ;;  %v891_v61 = vmul.f32 1.442695, %v5470_v39  ;;  %v1792_v42 = vld [vmem:[#allocation9 + $0x270] sm:$0xff]  ;;  %v995_v50 = vld [vmem:[#allocation7 + $0x1d0] sm:$0xff] }
 0x30b   :  { %v4623_v55 = vpop.eup %4622  ;;  %v842_v62 = vpop.f32.mrf.mxu0  ;;  %v5482_v58 = vsel %vm857_vm4, %v811_v2, %v4196_v49  ;;  %vm866_vm11 = vcmp.gt.f32.partialorder %v5470_v39, 0.0 }
 0x30c   :  { %v893_v63 = vmul.f32 1.442695, %v5473_v52  ;;  %v5478_v48 = vadd.f32 %v842_v62, %v5437_v16  ;;  %v5480_v1 = vsel %vm858_vm3, %v813_v25, %v4197_v53  ;;  %7102 = vst [vmem:[#allocation22_spill] sm:$0xff] %v5482_v58  ;;  %4636 = vpow2.f32 %v891_v61 }
 0x30d   :  { %7101 = vst [vmem:[#allocation21_spill] sm:$0xff] %v5480_v1  ;;  %v4625_v45 = vpop.eup %4624  ;;  %v846_v5 = vpop.f32.mrf.mxu0  ;;  %4212 = vmatprep.mubr.msk.f32.mxu1 %vm444_vm0, %v5480_v1  ;;  %4220 = vmatprep.mubr.msk.f32.mxu0 %vm444_vm0, %v5480_v1  ;;  %v4198_v12 = vadd.f32 -1.0, %v4623_v55  ;;  %vm867_vm14 = vcmp.gt.f32.partialorder %v5473_v52, 0.0 }
 0x30e   :  { %v895_v59 = vmul.f32 1.442695, %v5478_v48  ;;  %v5490_v60 = vadd.f32 %v846_v5, %v5435_v6  ;;  %1200 = vmatmul.mubr.f32.vlgmr.msra.gmra.mxu1 %v5482_v58  ;;  %1313 = vmatmul.mubr.f32.vlgmr.msra.gmra.mxu0 %v5482_v58  ;;  %v4199_v11 = vadd.f32 -1.0, %v4625_v45  ;;  %4638 = vpow2.f32 %v893_v63  ;;  %v989_v63 = vld [vmem:[#allocation7 + $0x1a0] sm:$0xff]  ;;  %v983_v45 = vld [vmem:[#allocation7 + $0x170] sm:$0xff] }
 0x30f   :  { %1362 = vmatpush1.msra.mxu1 %v1031_v3  ;;  %v848_v10 = vpop.f32.mrf.mxu0  ;;  %2311 = vmatpush1.msra.mxu0 %v1804_v4  ;;  %v4627_v14 = vpop.eup %4626  ;;  %v5512_v20 = vsel %vm859_vm6, %v5442_v28, %v4198_v12  ;;  %vm868_vm13 = vcmp.gt.f32.partialorder %v5478_v48, 0.0 }
 0x310   :  { %4640 = vpow2.f32 %v895_v59  ;;  %v897_v15 = vmul.f32 1.442695, %v5490_v60  ;;  %v5496_v17 = vadd.f32 %v848_v10, %v5437_v16  ;;  %1363 = vmatprep.subr.mxu1 %v1026_v7  ;;  %2312 = vmatprep.subr.mxu0 %v1799_v8  ;;  %v5501_v2 = vsel %vm860_vm5, %v5446_v30, %v4199_v11  ;;  %7104 = vst [vmem:[#allocation24_spill] sm:$0xff] %v5512_v20  ;;  %v978_v8 = vld [vmem:[#allocation7 + $0x148] sm:$0xff] }
 0x311   :  { %v4629_v19 = vpop.eup %4628  ;;  %1364 = vmatpush1.msra.mxu1 %v1025_v9  ;;  %v852_v21 = vpop.f32.mrf.mxu0  ;;  %7103 = vst [vmem:[#allocation23_spill] sm:$0xff] %v5501_v2  ;;  %2313 = vmatpush1.msra.mxu0 %v1798_v51  ;;  %v977_v9 = vld [vmem:[#allocation7 + $0x140] sm:$0xff]  ;;  %v972_v51 = vld [vmem:[#allocation7 + $0x118] sm:$0xff]  ;;  %vm869_vm1 = vcmp.gt.f32.partialorder %v5490_v60, 0.0 }
 0x312   :  { %v899_v24 = vmul.f32 1.442695, %v5496_v17  ;;  %v5505_v25 = vadd.f32 %v852_v21, %v5435_v6  ;;  %4213 = vmatprep.mubr.msk.f32.mxu1 %vm444_vm0, %v5501_v2  ;;  %4221 = vmatprep.mubr.msk.f32.mxu0 %vm444_vm0, %v5501_v2  ;;  %v4201_v13 = vadd.f32 -1.0, %v4629_v19  ;;  %4642 = vpow2.f32 %v897_v15  ;;  %v965_v19 = vld [vmem:[#allocation7 + $0xe0] sm:$0xff] }
 0x313   :  { %1365 = vmatprep.subr.mxu1 %v1020_v18  ;;  %1206 = vmatmul.mubr.f32.gmra.mxu1 %v5512_v20  ;;  %v854_v30 = vpop.f32.mrf.mxu0  ;;  %v4200_v6 = vadd.f32 -1.0, %v4627_v14  ;;  %v4631_v33 = vpop.eup %4630  ;;  %v966_v14 = vld [vmem:[#allocation7 + $0xe8] sm:$0xff]  ;;  %vm870_vm15 = vcmp.gt.f32.partialorder %v5496_v17, 0.0 }
 0x314   :  { %4644 = vpow2.f32 %v899_v24  ;;  %v901_v36 = vmul.f32 1.442695, %v5505_v25  ;;  %1319 = vmatmul.mubr.f32.gmra.mxu0 %v5512_v20  ;;  %1366 = vmatpush1.msra.mxu1 %v1019_v23  ;;  %v5518_v28 = vadd.f32 %v854_v30, %v5437_v16  ;;  %v5522_v57 = vsel %vm862_vm7, %v5454_v31, %v4201_v13  ;;  %v1002_v31 = vld [vmem:[#allocation7 + $0x208] sm:$0xff]  ;;  %v960_v24 = vld [vmem:[#allocation7 + $0xb8] sm:$0xff]  ;;  %v953_v30 = vld [vmem:[#allocation7 + $0x80] sm:$0xff] }
 0x315   :  { %v4633_v56 = vpop.eup %4632  ;;  %1367 = vmatprep.subr.mxu1 %v1014_v22  ;;  %7105 = vst [vmem:[#allocation25_spill] sm:$0xff] %v5522_v57  ;;  %2314 = vmatprep.subr.mxu0 %v1793_v29  ;;  %v5531_v41 = vsel %vm861_vm8, %v5450_v34, %v4200_v6  ;;  %v4202_v43 = vadd.f32 -1.0, %v4631_v33  ;;  %v996_v34 = vld [vmem:[#allocation7 + $0x1d8] sm:$0xff]  ;;  %v954_v13 = vld [vmem:[#allocation7 + $0x88] sm:$0xff]  ;;  %vm871_vm3 = vcmp.gt.f32.partialorder %v5505_v25, 0.0 }
 0x316   :  { %v903_v37 = vmul.f32 1.442695, %v5518_v28  ;;  %1368 = vmatpush1.msra.mxu1 %v1013_v32  ;;  %4214 = vmatprep.mubr.msk.f32.mxu1 %vm444_vm0, %v5522_v57  ;;  %v4203_v16 = vadd.f32 -1.0, %v4633_v56  ;;  %4646 = vpow2.f32 %v901_v36  ;;  %7106 = vst [vmem:[#allocation26_spill] sm:$0xff] %v5531_v41  ;;  %vm872_vm2 = vcmp.gt.f32.partialorder %v5518_v28, 0.0  ;;  %v948_v6 = vld [vmem:[#allocation7 + $0x58] sm:$0xff] }
 0x317   :  { %4222 = vmatprep.mubr.msk.f32.mxu0 %vm444_vm0, %v5522_v57  ;;  %1369 = vmatprep.subr.mxu1 %v1008_v35  ;;  %v4635_v46 = vpop.eup %4634  ;;  %v5545_v53 = vsel %vm863_vm10, %v5458_v26, %v4202_v43  ;;  %v984_v26 = vld [vmem:[#allocation7 + $0x178] sm:$0xff]  ;;  %v942_v36 = vld [vmem:[#allocation7 + $0x28] sm:$0xff]  ;;  %v1079_v43 = vld [vmem:[#allocation7 + $0x470] sm:$0xff] }
 0x318   :  { %4648 = vpow2.f32 %v903_v37  ;;  %1212 = vmatmul.mubr.f32.gmra.mxu1 %v5531_v41  ;;  %1325 = vmatmul.mubr.f32.gmra.mxu0 %v5531_v41  ;;  %v5537_v27 = vsel %vm864_vm9, %v5462_v40, %v4203_v16  ;;  %7108 = vst [vmem:[#allocation28_spill] sm:$0xff] %v5545_v53  ;;  %v990_v40 = vld [vmem:[#allocation7 + $0x1a8] sm:$0xff]  ;;  %v4204_v61 = vadd.f32 -1.0, %v4635_v46  ;;  %v1787_v35 = vld [vmem:[#allocation9 + $0x248] sm:$0xff]  ;;  %v1786_v37 = vld [vmem:[#allocation9 + $0x240] sm:$0xff] }
 0x319   :  { %7107 = vst [vmem:[#allocation27_spill] sm:$0xff] %v5537_v27  ;;  %1370 = vmatpush1.msra.mxu1 %v1007_v38  ;;  %4215 = vmatprep.mubr.msk.f32.mxu1 %vm444_vm0, %v5537_v27  ;;  %v4637_v49 = vpop.eup %4636  ;;  %v1086_v56 = vld [vmem:[#allocation7 + $0x4a8] sm:$0xff]  ;;  %v1085_v38 = vld [vmem:[#allocation7 + $0x4a0] sm:$0xff]  ;;  %v1775_v46 = vld [vmem:[#allocation9 + $0x1e8] sm:$0xff] }
 0x31a   :  { %1371 = vmatprep.subr.mxu1 %v1002_v31  ;;  %4223 = vmatprep.mubr.msk.f32.mxu0 %vm444_vm0, %v5537_v27  ;;  %v4205_v55 = vadd.f32 -1.0, %v4637_v49  ;;  %v5559_v7 = vsel %vm865_vm12, %v5466_v44, %v4204_v61  ;;  %v971_v44 = vld [vmem:[#allocation7 + $0x110] sm:$0xff]  ;;  %v1781_v16 = vld [vmem:[#allocation9 + $0x218] sm:$0xff]  ;;  %v1780_v31 = vld [vmem:[#allocation9 + $0x210] sm:$0xff] }
 0x31b   :  { %1372 = vmatpush1.msra.mxu1 %v1001_v47  ;;  %2315 = vmatpush1.msra.mxu0 %v1792_v42  ;;  %v4639_v62 = vpop.eup %4638  ;;  %7110 = vst [vmem:[#allocation30_spill] sm:$0xff] %v5559_v7  ;;  %v1074_v47 = vld [vmem:[#allocation7 + $0x448] sm:$0xff]  ;;  %v1774_v42 = vld [vmem:[#allocation9 + $0x1e0] sm:$0xff]  ;;  %v1763_v61 = vld [vmem:[#allocation9 + $0x188] sm:$0xff] }
 0x31c   :  { %1373 = vmatprep.subr.mxu1 %v996_v34  ;;  %1218 = vmatmul.mubr.f32.gmra.mxu1 %v5545_v53  ;;  %v5551_v4 = vsel %vm866_vm11, %v5470_v39, %v4205_v55  ;;  %v4206_v39 = vadd.f32 -1.0, %v4639_v62  ;;  %v1073_v34 = vld [vmem:[#allocation7 + $0x440] sm:$0xff]  ;;  %v1769_v49 = vld [vmem:[#allocation9 + $0x1b8] sm:$0xff]  ;;  %v1067_v55 = vld [vmem:[#allocation7 + $0x410] sm:$0xff] }
 0x31d   :  { %v4641_v3 = vpop.eup %4640  ;;  %1331 = vmatmul.mubr.f32.gmra.mxu0 %v5545_v53  ;;  %1374 = vmatpush1.msra.mxu1 %v995_v50  ;;  %7109 = vst [vmem:[#allocation29_spill] sm:$0xff] %v5551_v4  ;;  %v1068_v50 = vld [vmem:[#allocation7 + $0x418] sm:$0xff]  ;;  %v1062_v62 = vld [vmem:[#allocation7 + $0x3e8] sm:$0xff] }
 0x31e   :  { %1375 = vmatprep.subr.mxu1 %v990_v40  ;;  %4216 = vmatprep.mubr.msk.f32.mxu1 %vm444_vm0, %v5551_v4  ;;  %v4207_v5 = vadd.f32 -1.0, %v4641_v3  ;;  %v1768_v40 = vld [vmem:[#allocation9 + $0x1b0] sm:$0xff] }
 0x31f   :  { %1376 = vmatpush1.msra.mxu1 %v989_v63  ;;  %4224 = vmatprep.mubr.msk.f32.mxu0 %vm444_vm0, %v5551_v4  ;;  %v4643_v59 = vpop.eup %4642  ;;  %v1762_v63 = vld [vmem:[#allocation9 + $0x180] sm:$0xff]  ;;  %v1061_v3 = vld [vmem:[#allocation7 + $0x3e0] sm:$0xff] }
 0x320   :  { %1377 = vmatprep.subr.mxu1 %v984_v26  ;;  %1224 = vmatmul.mubr.f32.gmra.mxu1 %v5559_v7  ;;  %v5564_v11 = vsel %vm868_vm13, %v5478_v48, %v4207_v5  ;;  %v5573_v48 = vsel %vm867_vm14, %v5473_v52, %v4206_v39  ;;  %v4208_v15 = vadd.f32 -1.0, %v4643_v59  ;;  %v959_v52 = vld [vmem:[#allocation7 + $0xb0] sm:$0xff]  ;;  %v1757_v26 = vld [vmem:[#allocation9 + $0x158] sm:$0xff]  ;;  %v1756_v5 = vld [vmem:[#allocation9 + $0x150] sm:$0xff] }
 0x321   :  { %7111 = vst [vmem:[#allocation31_spill] sm:$0xff] %v5564_v11  ;;  %v4645_v12 = vpop.eup %4644  ;;  %1337 = vmatmul.mubr.f32.gmra.mxu0 %v5559_v7  ;;  %1378 = vmatpush1.msra.mxu1 %v983_v45  ;;  %7112 = vst [vmem:[#allocation32_spill] sm:$0xff] %v5573_v48  ;;  %v1056_v45 = vld [vmem:[#allocation7 + $0x3b8] sm:$0xff]  ;;  %v1050_v59 = vld [vmem:[#allocation7 + $0x388] sm:$0xff] }
 0x322   :  { %1379 = vmatprep.subr.mxu1 %v978_v8  ;;  %4217 = vmatprep.mubr.msk.f32.mxu1 %vm444_vm0, %v5564_v11  ;;  %v4209_v10 = vadd.f32 -1.0, %v4645_v12  ;;  %v1055_v8 = vld [vmem:[#allocation7 + $0x3b0] sm:$0xff]  ;;  %v1751_v39 = vld [vmem:[#allocation9 + $0x128] sm:$0xff]  ;;  %v1049_v12 = vld [vmem:[#allocation7 + $0x380] sm:$0xff] }
 0x323   :  { %1380 = vmatpush1.msra.mxu1 %v977_v9  ;;  %4225 = vmatprep.mubr.msk.f32.mxu0 %vm444_vm0, %v5564_v11  ;;  %v4647_v18 = vpop.eup %4646  ;;  %v1750_v9 = vld [vmem:[#allocation9 + $0x120] sm:$0xff] }
 0x324   :  { %1381 = vmatprep.subr.mxu1 %v972_v51  ;;  %1230 = vmatmul.mubr.f32.gmra.mxu1 %v5573_v48  ;;  %v5578_v21 = vsel %vm870_vm15, %v5496_v17, %v4209_v10  ;;  %v5587_v17 = vsel %vm869_vm1, %v5490_v60, %v4208_v15  ;;  %v4210_v29 = vadd.f32 -1.0, %v4647_v18  ;;  %v947_v60 = vld [vmem:[#allocation7 + $0x50] sm:$0xff]  ;;  %v1745_v51 = vld [vmem:[#allocation9 + $0xf8] sm:$0xff]  ;;  %v1744_v10 = vld [vmem:[#allocation9 + $0xf0] sm:$0xff] }
 0x325   :  { %7113 = vst [vmem:[#allocation33_spill] sm:$0xff] %v5578_v21  ;;  %v4649_v23 = vpop.eup %4648  ;;  %1343 = vmatmul.mubr.f32.gmra.mxu0 %v5573_v48  ;;  %1382 = vmatpush1.msra.mxu1 %v971_v44  ;;  %7114 = vst [vmem:[#allocation34_spill] sm:$0xff] %v5587_v17  ;;  %v1044_v44 = vld [vmem:[#allocation7 + $0x358] sm:$0xff]  ;;  %v1038_v18 = vld [vmem:[#allocation7 + $0x328] sm:$0xff] }
 0x326   :  { %1383 = vmatprep.subr.mxu1 %v966_v14  ;;  %4218 = vmatprep.mubr.msk.f32.mxu1 %vm444_vm0, %v5578_v21  ;;  %v4211_v22 = vadd.f32 -1.0, %v4649_v23  ;;  %v5601_v33 = vsel %vm871_vm3, %v5505_v25, %v4210_v29  ;;  %v1080_v25 = vld [vmem:[#allocation7 + $0x478] sm:$0xff]  ;;  %v1043_v14 = vld [vmem:[#allocation7 + $0x350] sm:$0xff]  ;;  %v1037_v23 = vld [vmem:[#allocation7 + $0x320] sm:$0xff] }
 0x327   :  { %1384 = vmatpush1.msra.mxu1 %v965_v19  ;;  %4226 = vmatprep.mubr.msk.f32.mxu0 %vm444_vm0, %v5578_v21  ;;  %7116 = vst [vmem:[#allocation36_spill] sm:$0xff] %v5601_v33  ;;  %v1739_v15 = vld [vmem:[#allocation9 + $0xc8] sm:$0xff]  ;;  %v1738_v19 = vld [vmem:[#allocation9 + $0xc0] sm:$0xff]  ;;  %v1732_v29 = vld [vmem:[#allocation9 + $0x90] sm:$0xff] }
 0x328   :  { %1385 = vmatprep.subr.mxu1 %v960_v24  ;;  %1236 = vmatmul.mubr.f32.gmra.mxu1 %v5587_v17  ;;  %v5592_v32 = vsel %vm872_vm2, %v5518_v28, %v4211_v22  ;;  %v941_v28 = vld [vmem:[#allocation7 + $0x20] sm:$0xff]  ;;  %v1733_v24 = vld [vmem:[#allocation9 + $0x98] sm:$0xff] }
 0x329   :  { %7115 = vst [vmem:[#allocation35_spill] sm:$0xff] %v5592_v32  ;;  %1349 = vmatmul.mubr.f32.gmra.mxu0 %v5587_v17  ;;  %1386 = vmatpush1.msra.mxu1 %v959_v52  ;;  %v1997_v52 = vld [vmem:[#allocation9 + $0x8d8] sm:$0xff]  ;;  %v1996_v22 = vld [vmem:[#allocation9 + $0x8d0] sm:$0xff] }
 0x32a   :  { %1387 = vmatprep.subr.mxu1 %v954_v13  ;;  %4219 = vmatprep.mubr.msk.f32.mxu1 %vm444_vm0, %v5592_v32  ;;  %v1991_v13 = vld [vmem:[#allocation9 + $0x8a8] sm:$0xff] }
 0x32b   :  { %1388 = vmatpush1.msra.mxu1 %v953_v30  ;;  %4227 = vmatprep.mubr.msk.f32.mxu0 %vm444_vm0, %v5592_v32  ;;  %v1990_v30 = vld [vmem:[#allocation9 + $0x8a0] sm:$0xff] }
 0x32c   :  { %1389 = vmatprep.subr.mxu1 %v948_v6  ;;  %1242 = vmatmul.mubr.f32.gmra.mxu1 %v5601_v33  ;;  %v1727_v6 = vld [vmem:[#allocation9 + $0x68] sm:$0xff] }
 0x32d   :  { %1355 = vmatmul.mubr.f32.gmra.mxu0 %v5601_v33  ;;  %1390 = vmatpush1.msra.mxu1 %v947_v60  ;;  %v1985_v60 = vld [vmem:[#allocation9 + $0x878] sm:$0xff] }
 0x32e   :  { %1391 = vmatprep.subr.mxu1 %v942_v36  ;;  %4228 = vmatprep.mubr.msk.f32.mxu1 %vm444_vm0, %v5480_v1  ;;  %v1984_v36 = vld [vmem:[#allocation9 + $0x870] sm:$0xff] }
 0x32f   :  { %1392 = vmatpush1.msra.mxu1 %v941_v28  ;;  %2316 = vmatprep.subr.mxu0 %v1787_v35  ;;  %v1979_v28 = vld [vmem:[#allocation9 + $0x848] sm:$0xff]  ;;  %v1726_v35 = vld [vmem:[#allocation9 + $0x60] sm:$0xff] }
 0x330   :  { %1407 = vmatprep.subr.mxu1 %v1086_v56  ;;  %2317 = vmatpush1.msra.mxu0 %v1786_v37  ;;  %v1978_v56 = vld [vmem:[#allocation9 + $0x840] sm:$0xff]  ;;  %v1721_v37 = vld [vmem:[#allocation9 + $0x38] sm:$0xff] }
 0x331   :  { %1408 = vmatpush2.msra.mxu1 %v1085_v38  ;;  %2318 = vmatprep.subr.mxu0 %v1781_v16  ;;  %v1973_v38 = vld [vmem:[#allocation9 + $0x818] sm:$0xff]  ;;  %v1972_v16 = vld [vmem:[#allocation9 + $0x810] sm:$0xff] }
 0x332   :  { %1409 = vmatprep.subr.mxu1 %v1080_v25  ;;  %2319 = vmatpush1.msra.mxu0 %v1780_v31  ;;  %v1967_v25 = vld [vmem:[#allocation9 + $0x7e8] sm:$0xff]  ;;  %v1720_v31 = vld [vmem:[#allocation9 + $0x30] sm:$0xff] }
 0x333   :  { %1410 = vmatpush2.msra.mxu1 %v1079_v43  ;;  %2320 = vmatprep.subr.mxu0 %v1775_v46  ;;  %v1966_v43 = vld [vmem:[#allocation9 + $0x7e0] sm:$0xff]  ;;  %v1715_v46 = vld [vmem:[#allocation9 + $0x8] sm:$0xff] }
 0x334   :  { %1411 = vmatprep.subr.mxu1 %v1074_v47  ;;  %2321 = vmatpush1.msra.mxu0 %v1774_v42  ;;  %v1961_v47 = vld [vmem:[#allocation9 + $0x7b8] sm:$0xff]  ;;  %v1960_v42 = vld [vmem:[#allocation9 + $0x7b0] sm:$0xff] }
 0x335   :  { %1412 = vmatpush2.msra.mxu1 %v1073_v34  ;;  %2322 = vmatprep.subr.mxu0 %v1769_v49  ;;  %v1955_v34 = vld [vmem:[#allocation9 + $0x788] sm:$0xff]  ;;  %v1714_v49 = vld [vmem:[#allocation9] sm:$0xff] }
 0x336   :  { %1413 = vmatprep.subr.mxu1 %v1068_v50  ;;  %2323 = vmatpush1.msra.mxu0 %v1768_v40  ;;  %v1954_v50 = vld [vmem:[#allocation9 + $0x780] sm:$0xff]  ;;  %v1901_v40 = vld [vmem:[#allocation9 + $0x5d8] sm:$0xff] }
 0x337   :  { %1414 = vmatpush2.msra.mxu1 %v1067_v55  ;;  %2324 = vmatprep.subr.mxu0 %v1763_v61  ;;  %v1949_v55 = vld [vmem:[#allocation9 + $0x758] sm:$0xff]  ;;  %v1948_v61 = vld [vmem:[#allocation9 + $0x750] sm:$0xff] }
 0x338   :  { %1415 = vmatprep.subr.mxu1 %v1062_v62  ;;  %2325 = vmatpush1.msra.mxu0 %v1762_v63  ;;  %v1943_v62 = vld [vmem:[#allocation9 + $0x728] sm:$0xff]  ;;  %v1900_v63 = vld [vmem:[#allocation9 + $0x5d0] sm:$0xff] }
 0x339   :  { %1416 = vmatpush2.msra.mxu1 %v1061_v3  ;;  %2326 = vmatprep.subr.mxu0 %v1757_v26  ;;  %v1942_v3 = vld [vmem:[#allocation9 + $0x720] sm:$0xff]  ;;  %v1895_v26 = vld [vmem:[#allocation9 + $0x5a8] sm:$0xff] }
 0x33a   :  { %1417 = vmatprep.subr.mxu1 %v1056_v45  ;;  %2327 = vmatpush1.msra.mxu0 %v1756_v5  ;;  %v1937_v45 = vld [vmem:[#allocation9 + $0x6f8] sm:$0xff]  ;;  %v1936_v5 = vld [vmem:[#allocation9 + $0x6f0] sm:$0xff] }
 0x33b   :  { %1418 = vmatpush2.msra.mxu1 %v1055_v8  ;;  %2328 = vmatprep.subr.mxu0 %v1751_v39  ;;  %v1931_v8 = vld [vmem:[#allocation9 + $0x6c8] sm:$0xff]  ;;  %v1894_v39 = vld [vmem:[#allocation9 + $0x5a0] sm:$0xff] }
 0x33c   :  { %1419 = vmatprep.subr.mxu1 %v1050_v59  ;;  %2329 = vmatpush1.msra.mxu0 %v1750_v9  ;;  %v1930_v59 = vld [vmem:[#allocation9 + $0x6c0] sm:$0xff]  ;;  %v1889_v9 = vld [vmem:[#allocation9 + $0x578] sm:$0xff] }
 0x33d   :  { %1420 = vmatpush2.msra.mxu1 %v1049_v12  ;;  %2330 = vmatprep.subr.mxu0 %v1745_v51  ;;  %v1925_v12 = vld [vmem:[#allocation9 + $0x698] sm:$0xff]  ;;  %v1924_v51 = vld [vmem:[#allocation9 + $0x690] sm:$0xff] }
 0x33e   :  { %1421 = vmatprep.subr.mxu1 %v1044_v44  ;;  %2331 = vmatpush1.msra.mxu0 %v1744_v10  ;;  %v1919_v44 = vld [vmem:[#allocation9 + $0x668] sm:$0xff]  ;;  %v1888_v10 = vld [vmem:[#allocation9 + $0x570] sm:$0xff] }
 0x33f   :  { %1422 = vmatpush2.msra.mxu1 %v1043_v14  ;;  %2332 = vmatprep.subr.mxu0 %v1739_v15  ;;  %v1918_v14 = vld [vmem:[#allocation9 + $0x660] sm:$0xff]  ;;  %v1883_v15 = vld [vmem:[#allocation9 + $0x548] sm:$0xff] }
 0x340   :  { %1423 = vmatprep.subr.mxu1 %v1038_v18  ;;  %2333 = vmatpush1.msra.mxu0 %v1738_v19  ;;  %v1913_v18 = vld [vmem:[#allocation9 + $0x638] sm:$0xff]  ;;  %v1912_v19 = vld [vmem:[#allocation9 + $0x630] sm:$0xff] }
 0x341   :  { %1424 = vmatpush2.msra.mxu1 %v1037_v23  ;;  %2334 = vmatprep.subr.mxu0 %v1733_v24  ;;  %v1882_v23 = vld [vmem:[#allocation9 + $0x540] sm:$0xff]  ;;  %v1907_v24 = vld [vmem:[#allocation9 + $0x608] sm:$0xff] }
 0x342   :  { %1426 = vmatmul.mubr.f32.vlgmr.msra.gmra.mxu1 %v5482_v58  ;;  %2423 = vmatprep.subr.mxu1 %v1997_v52  ;;  %v1877_v52 = vld [vmem:[#allocation9 + $0x518] sm:$0xff] }
 0x343   :  { %4229 = vmatprep.mubr.msk.f32.mxu1 %vm444_vm0, %v5501_v2  ;;  %2424 = vmatpush1.msra.mxu1 %v1996_v22  ;;  %v1906_v22 = vld [vmem:[#allocation9 + $0x600] sm:$0xff] }
 0x344   :  { %2425 = vmatprep.subr.mxu1 %v1991_v13  ;;  %2335 = vmatpush1.msra.mxu0 %v1732_v29  ;;  %v1876_v13 = vld [vmem:[#allocation9 + $0x510] sm:$0xff]  ;;  %v2093_v29 = vld [vmem:[#allocation9 + $0xbd8] sm:$0xff] }
 0x345   :  { %2426 = vmatpush1.msra.mxu1 %v1990_v30  ;;  %2336 = vmatprep.subr.mxu0 %v1727_v6  ;;  %v1871_v30 = vld [vmem:[#allocation9 + $0x4e8] sm:$0xff]  ;;  %v2092_v6 = vld [vmem:[#allocation9 + $0xbd0] sm:$0xff] }
 0x346   :  { %1432 = vmatmul.mubr.f32.gmra.mxu1 %v5512_v20  ;;  %2427 = vmatprep.subr.mxu1 %v1985_v60  ;;  %v1870_v60 = vld [vmem:[#allocation9 + $0x4e0] sm:$0xff] }
 0x347   :  { %4230 = vmatprep.mubr.msk.f32.mxu1 %vm444_vm0, %v5522_v57  ;;  %2428 = vmatpush1.msra.mxu1 %v1984_v36  ;;  %v2087_v36 = vld [vmem:[#allocation9 + $0xba8] sm:$0xff] }
 0x348   :  { %2429 = vmatprep.subr.mxu1 %v1979_v28  ;;  %2337 = vmatpush1.msra.mxu0 %v1726_v35  ;;  %v1865_v28 = vld [vmem:[#allocation9 + $0x4b8] sm:$0xff]  ;;  %v2086_v35 = vld [vmem:[#allocation9 + $0xba0] sm:$0xff] }
 0x349   :  { %2430 = vmatpush1.msra.mxu1 %v1978_v56  ;;  %2338 = vmatprep.subr.mxu0 %v1721_v37  ;;  %v1864_v56 = vld [vmem:[#allocation9 + $0x4b0] sm:$0xff]  ;;  %v2081_v37 = vld [vmem:[#allocation9 + $0xb78] sm:$0xff] }
 0x34a   :  { %1438 = vmatmul.mubr.f32.gmra.mxu1 %v5531_v41  ;;  %2431 = vmatprep.subr.mxu1 %v1973_v38  ;;  %v1859_v38 = vld [vmem:[#allocation9 + $0x488] sm:$0xff] }
 0x34b   :  { %4231 = vmatprep.mubr.msk.f32.mxu1 %vm444_vm0, %v5537_v27  ;;  %2432 = vmatpush1.msra.mxu1 %v1972_v16  ;;  %v2080_v16 = vld [vmem:[#allocation9 + $0xb70] sm:$0xff] }
 0x34c   :  { %2433 = vmatprep.subr.mxu1 %v1967_v25  ;;  %2339 = vmatpush1.msra.mxu0 %v1720_v31  ;;  %v1858_v25 = vld [vmem:[#allocation9 + $0x480] sm:$0xff]  ;;  %v2075_v31 = vld [vmem:[#allocation9 + $0xb48] sm:$0xff] }
 0x34d   :  { %2434 = vmatpush1.msra.mxu1 %v1966_v43  ;;  %2340 = vmatprep.subr.mxu0 %v1715_v46  ;;  %v1853_v43 = vld [vmem:[#allocation9 + $0x458] sm:$0xff]  ;;  %v2074_v46 = vld [vmem:[#allocation9 + $0xb40] sm:$0xff] }
 0x34e   :  { %1444 = vmatmul.mubr.f32.gmra.mxu1 %v5545_v53  ;;  %2435 = vmatprep.subr.mxu1 %v1961_v47  ;;  %v1852_v47 = vld [vmem:[#allocation9 + $0x450] sm:$0xff] }
 0x34f   :  { %4232 = vmatprep.mubr.msk.f32.mxu1 %vm444_vm0, %v5551_v4  ;;  %2436 = vmatpush1.msra.mxu1 %v1960_v42  ;;  %v2069_v42 = vld [vmem:[#allocation9 + $0xb18] sm:$0xff] }
 0x350   :  { %2437 = vmatprep.subr.mxu1 %v1955_v34  ;;  %2341 = vmatpush1.msra.mxu0 %v1714_v49  ;;  %v1847_v34 = vld [vmem:[#allocation9 + $0x428] sm:$0xff]  ;;  %v2068_v49 = vld [vmem:[#allocation9 + $0xb10] sm:$0xff] }
 0x351   :  { %2438 = vmatpush1.msra.mxu1 %v1954_v50  ;;  %2342 = vmatprep.subr.mxu0 %v1901_v40  ;;  %v1846_v50 = vld [vmem:[#allocation9 + $0x420] sm:$0xff]  ;;  %v2063_v40 = vld [vmem:[#allocation9 + $0xae8] sm:$0xff] }
 0x352   :  { %1450 = vmatmul.mubr.f32.gmra.mxu1 %v5559_v7  ;;  %2439 = vmatprep.subr.mxu1 %v1949_v55  ;;  %v1841_v55 = vld [vmem:[#allocation9 + $0x3f8] sm:$0xff] }
 0x353   :  { %4233 = vmatprep.mubr.msk.f32.mxu1 %vm444_vm0, %v5564_v11  ;;  %2440 = vmatpush1.msra.mxu1 %v1948_v61  ;;  %v2062_v61 = vld [vmem:[#allocation9 + $0xae0] sm:$0xff] }
 0x354   :  { %2441 = vmatprep.subr.mxu1 %v1943_v62  ;;  %2343 = vmatpush2.msra.mxu0 %v1900_v63  ;;  %v1840_v62 = vld [vmem:[#allocation9 + $0x3f0] sm:$0xff]  ;;  %v2057_v63 = vld [vmem:[#allocation9 + $0xab8] sm:$0xff] }
 0x355   :  { %2442 = vmatpush1.msra.mxu1 %v1942_v3  ;;  %2344 = vmatprep.subr.mxu0 %v1895_v26  ;;  %v1835_v3 = vld [vmem:[#allocation9 + $0x3c8] sm:$0xff]  ;;  %v2056_v26 = vld [vmem:[#allocation9 + $0xab0] sm:$0xff] }
 0x356   :  { %1456 = vmatmul.mubr.f32.gmra.mxu1 %v5573_v48  ;;  %2443 = vmatprep.subr.mxu1 %v1937_v45  ;;  %v1834_v45 = vld [vmem:[#allocation9 + $0x3c0] sm:$0xff] }
 0x357   :  { %4234 = vmatprep.mubr.msk.f32.mxu1 %vm444_vm0, %v5578_v21  ;;  %2444 = vmatpush1.msra.mxu1 %v1936_v5  ;;  %v2051_v5 = vld [vmem:[#allocation9 + $0xa88] sm:$0xff] }
 0x358   :  { %2445 = vmatprep.subr.mxu1 %v1931_v8  ;;  %2345 = vmatpush2.msra.mxu0 %v1894_v39  ;;  %v1829_v8 = vld [vmem:[#allocation9 + $0x398] sm:$0xff]  ;;  %v2050_v39 = vld [vmem:[#allocation9 + $0xa80] sm:$0xff]  ;;  %v1795_v21 = vld [vmem:[#allocation9 + $0x288] sm:$0xff] }
 0x359   :  { %2446 = vmatpush1.msra.mxu1 %v1930_v59  ;;  %2346 = vmatprep.subr.mxu0 %v1889_v9  ;;  %v1828_v59 = vld [vmem:[#allocation9 + $0x390] sm:$0xff]  ;;  %v2045_v9 = vld [vmem:[#allocation9 + $0xa58] sm:$0xff] }
 0x35a   :  { %1462 = vmatmul.mubr.f32.gmra.mxu1 %v5587_v17  ;;  %2447 = vmatprep.subr.mxu1 %v1925_v12  ;;  %v1823_v12 = vld [vmem:[#allocation9 + $0x368] sm:$0xff] }
 0x35b   :  { %4235 = vmatprep.mubr.msk.f32.mxu1 %vm444_vm0, %v5592_v32  ;;  %2448 = vmatpush1.msra.mxu1 %v1924_v51  ;;  %v2044_v51 = vld [vmem:[#allocation9 + $0xa50] sm:$0xff] }
 0x35c   :  { %2449 = vmatprep.subr.mxu1 %v1919_v44  ;;  %2347 = vmatpush2.msra.mxu0 %v1888_v10  ;;  %v1822_v44 = vld [vmem:[#allocation9 + $0x360] sm:$0xff]  ;;  %v2039_v10 = vld [vmem:[#allocation9 + $0xa28] sm:$0xff] }
 0x35d   :  { %2450 = vmatpush1.msra.mxu1 %v1918_v14  ;;  %2348 = vmatprep.subr.mxu0 %v1883_v15  ;;  %v1817_v14 = vld [vmem:[#allocation9 + $0x338] sm:$0xff]  ;;  %v2038_v15 = vld [vmem:[#allocation9 + $0xa20] sm:$0xff] }
 0x35e   :  { %1468 = vmatmul.mubr.f32.gmra.mxu1 %v5601_v33  ;;  %2451 = vmatprep.subr.mxu1 %v1913_v18  ;;  %v1816_v18 = vld [vmem:[#allocation9 + $0x330] sm:$0xff] }
 0x35f   :  { %2452 = vmatpush1.msra.mxu1 %v1912_v19  ;;  %2349 = vmatpush2.msra.mxu0 %v1882_v23  ;;  %v2033_v19 = vld [vmem:[#allocation9 + $0x9f8] sm:$0xff]  ;;  %v1811_v23 = vld [vmem:[#allocation9 + $0x308] sm:$0xff] }
 0x360   :  { %2453 = vmatprep.subr.mxu1 %v1907_v24  ;;  %2350 = vmatprep.subr.mxu0 %v1877_v52  ;;  %v2032_v24 = vld [vmem:[#allocation9 + $0x9f0] sm:$0xff]  ;;  %v1810_v52 = vld [vmem:[#allocation9 + $0x300] sm:$0xff] }
 0x361   :  { %2454 = vmatpush1.msra.mxu1 %v1906_v22  ;;  %2351 = vmatpush2.msra.mxu0 %v1876_v13  ;;  %v2027_v22 = vld [vmem:[#allocation9 + $0x9c8] sm:$0xff]  ;;  %v2189_v13 = vld [vmem:[#allocation9 + $0xed8] sm:$0xff] }
 0x362   :  { %2455 = vmatprep.subr.mxu1 %v2093_v29  ;;  %2352 = vmatprep.subr.mxu0 %v1871_v30  ;;  %v2026_v29 = vld [vmem:[#allocation9 + $0x9c0] sm:$0xff]  ;;  %v2021_v30 = vld [vmem:[#allocation9 + $0x998] sm:$0xff] }
 0x363   :  { %2456 = vmatpush2.msra.mxu1 %v2092_v6  ;;  %2353 = vmatpush2.msra.mxu0 %v1870_v60  ;;  %v2020_v6 = vld [vmem:[#allocation9 + $0x990] sm:$0xff]  ;;  %v2015_v60 = vld [vmem:[#allocation9 + $0x968] sm:$0xff] }
 0x364   :  { %2457 = vmatprep.subr.mxu1 %v2087_v36  ;;  %2354 = vmatprep.subr.mxu0 %v1865_v28  ;;  %v2014_v36 = vld [vmem:[#allocation9 + $0x960] sm:$0xff]  ;;  %v2009_v28 = vld [vmem:[#allocation9 + $0x938] sm:$0xff] }
 0x365   :  { %2458 = vmatpush2.msra.mxu1 %v2086_v35  ;;  %2355 = vmatpush2.msra.mxu0 %v1864_v56  ;;  %v2008_v35 = vld [vmem:[#allocation9 + $0x930] sm:$0xff]  ;;  %v2003_v56 = vld [vmem:[#allocation9 + $0x908] sm:$0xff] }
 0x366   :  { %2459 = vmatprep.subr.mxu1 %v2081_v37  ;;  %2356 = vmatprep.subr.mxu0 %v1859_v38  ;;  %v2002_v37 = vld [vmem:[#allocation9 + $0x900] sm:$0xff]  ;;  %v1807_v38 = vld [vmem:[#allocation9 + $0x2e8] sm:$0xff] }
 0x367   :  { %2460 = vmatpush2.msra.mxu1 %v2080_v16  ;;  %2357 = vmatpush2.msra.mxu0 %v1858_v25  ;;  %v5630_v16 = vsub.s32 3, %v5237_v54  ;;  %v149_v25 = vld [vmem:[#allocation13 + $0x10] sm:$0xff] }
 0x368   :  { %2461 = vmatprep.subr.mxu1 %v2075_v31  ;;  %2358 = vmatprep.subr.mxu0 %v1853_v43  ;;  %v4844_v31 = vld [vmem:[#allocation13] sm:$0xff] }
 0x369   :  { %2462 = vmatpush2.msra.mxu1 %v2074_v46  ;;  %2359 = vmatpush2.msra.mxu0 %v1852_v47  ;;  %v5633_v43 = vrot.slane %v4844_v31, %v5630_v16  ;;  %v5636_v46 = vrot.slane %v149_v25, %v5630_v16  ;;  %v150_v47 = vld [vmem:[#allocation13 + $0x18] sm:$0xff] }
 0x36a   :  { %2463 = vmatprep.subr.mxu1 %v2069_v42  ;;  %2360 = vmatprep.subr.mxu0 %v1847_v34 }
 0x36b   :  { %2464 = vmatpush2.msra.mxu1 %v2068_v49  ;;  %2361 = vmatpush2.msra.mxu0 %v1846_v50  ;;  %v4845_v49 = vld [vmem:[#allocation13 + $0x8] sm:$0xff] }
 0x36c   :  { %2465 = vmatprep.subr.mxu1 %v2063_v40  ;;  %2362 = vmatprep.subr.mxu0 %v1841_v55  ;;  %v5639_v50 = vrot.slane %v4845_v49, %v5630_v16  ;;  %v5642_v40 = vrot.slane %v150_v47, %v5630_v16 }
 0x36d   :  { %2466 = vmatpush2.msra.mxu1 %v2062_v61  ;;  %2363 = vmatpush2.msra.mxu0 %v1840_v62 }
 0x36e   :  { %2467 = vmatprep.subr.mxu1 %v2057_v63  ;;  %2364 = vmatprep.subr.mxu0 %v1835_v3 }
 0x36f   :  { %2468 = vmatpush2.msra.mxu1 %v2056_v26  ;;  %2365 = vmatpush2.msra.mxu0 %v1834_v45 }
 0x370   :  { %2469 = vmatprep.subr.mxu1 %v2051_v5  ;;  %2366 = vmatprep.subr.mxu0 %v1829_v8 }
 0x371   :  { %2470 = vmatpush2.msra.mxu1 %v2050_v39  ;;  %2367 = vmatpush2.msra.mxu0 %v1828_v59 }
 0x372   :  { %2471 = vmatprep.subr.mxu1 %v2045_v9  ;;  %2368 = vmatprep.subr.mxu0 %v1823_v12 }
 0x373   :  { %2472 = vmatpush2.msra.mxu1 %v2044_v51  ;;  %2369 = vmatpush2.msra.mxu0 %v1822_v44 }
 0x374   :  { %2473 = vmatprep.subr.mxu1 %v2039_v10  ;;  %2370 = vmatprep.subr.mxu0 %v1817_v14 }
 0x375   :  { %2474 = vmatpush2.msra.mxu1 %v2038_v15  ;;  %2371 = vmatpush2.msra.mxu0 %v1816_v18 }
 0x376   :  { %2475 = vmatprep.subr.mxu1 %v2033_v19  ;;  %2372 = vmatprep.subr.mxu0 %v1811_v23 }
 0x377   :  { %2476 = vmatpush2.msra.mxu1 %v2032_v24  ;;  %2373 = vmatpush2.msra.mxu0 %v1810_v52 }
 0x378   :  { %2477 = vmatprep.subr.mxu1 %v2027_v22  ;;  %2536 = vmatprep.subr.mxu0 %v2189_v13 }
 0x379   :  { %2478 = vmatpush2.msra.mxu1 %v2026_v29 }
 0x37a   :  { %2479 = vmatprep.subr.mxu1 %v2021_v30 }
 0x37b   :  { %2480 = vmatpush2.msra.mxu1 %v2020_v6 }
 0x37c   :  { %2481 = vmatprep.subr.mxu1 %v2015_v60 }
 0x37d   :  { %2482 = vmatpush2.msra.mxu1 %v2014_v36 }
 0x37e   :  { %2483 = vmatprep.subr.mxu1 %v2009_v28 }
 0x37f   :  { %2484 = vmatpush2.msra.mxu1 %v2008_v35 }
 0x380   :  { %2485 = vmatprep.subr.mxu1 %v2003_v56 }
 0x381   :  { %2486 = vmatpush2.msra.mxu1 %v2002_v37 }
 0x382   :  { %2649 = vmatprep.subr.mxu1 %v1807_v38 }
 0x3ce   :  { %v1201_v42 = vpop.f32.mrf.mxu1  ;;  %v1314_v34 = vpop.f32.mrf.mxu0 }
 0x3cf   :  { %v5645_v55 = vadd.f32 %v1201_v42, %v5633_v43  ;;  %v5648_v61 = vadd.f32 %v1314_v34, %v5636_v46 }
 0x3d0   :  { %v1203_v62 = vpop.f32.mrf.mxu1  ;;  %v1316_v63 = vpop.f32.mrf.mxu0 }
 0x3d1   :  { %v1522_v3 = vmul.f32 1.442695, %v5645_v55  ;;  %v1526_v26 = vmul.f32 1.442695, %v5648_v61  ;;  %v5653_v45 = vadd.f32 %v1203_v62, %v5639_v50  ;;  %v5656_v5 = vadd.f32 %v1316_v63, %v5642_v40 }
 0x3d2   :  { %vm1474_vm4 = vcmp.gt.f32.partialorder %v5645_v55, 0.0  ;;  %vm1476_vm5 = vcmp.gt.f32.partialorder %v5648_v61, 0.0 }
 0x3d3   :  { %4650 = vpow2.f32 %v1522_v3  ;;  %v1207_v8 = vpop.f32.mrf.mxu1  ;;  %v1524_v39 = vmul.f32 1.442695, %v5653_v45  ;;  %v1528_v59 = vmul.f32 1.442695, %v5656_v5  ;;  %vm1475_vm6 = vcmp.gt.f32.partialorder %v5653_v45, 0.0 }
 0x3d4   :  { %4652 = vpow2.f32 %v1526_v26  ;;  %v5661_v9 = vadd.f32 %v1207_v8, %v5633_v43  ;;  %v1320_v12 = vpop.f32.mrf.mxu0  ;;  %vm1477_vm7 = vcmp.gt.f32.partialorder %v5656_v5, 0.0 }
 0x3d5   :  { %v5664_v51 = vadd.f32 %v1320_v12, %v5636_v46  ;;  %v1209_v44 = vpop.f32.mrf.mxu1  ;;  %4654 = vpow2.f32 %v1524_v39 }
 0x3d6   :  { %v5667_v10 = vadd.f32 %v1209_v44, %v5639_v50  ;;  %v1322_v14 = vpop.f32.mrf.mxu0  ;;  %4656 = vpow2.f32 %v1528_v59  ;;  %v1534_v18 = vmul.f32 1.442695, %v5661_v9  ;;  %vm1480_vm8 = vcmp.gt.f32.partialorder %v5661_v9, 0.0 }
 0x3d7   :  { %v5670_v15 = vadd.f32 %v1322_v14, %v5642_v40  ;;  %v1538_v52 = vmul.f32 1.442695, %v5664_v51  ;;  %vm1482_vm9 = vcmp.gt.f32.partialorder %v5664_v51, 0.0 }
 0x3d8   :  { %v1536_v19 = vmul.f32 1.442695, %v5667_v10  ;;  %v1213_v23 = vpop.f32.mrf.mxu1  ;;  %v1326_v24 = vpop.f32.mrf.mxu0  ;;  %vm1481_vm10 = vcmp.gt.f32.partialorder %v5667_v10, 0.0 }
 0x3d9   :  { %v1540_v22 = vmul.f32 1.442695, %v5670_v15  ;;  %v5677_v13 = vadd.f32 %v1213_v23, %v5633_v43  ;;  %v5680_v29 = vadd.f32 %v1326_v24, %v5636_v46  ;;  %vm1483_vm11 = vcmp.gt.f32.partialorder %v5670_v15, 0.0 }
 0x3da   :  { %4658 = vpow2.f32 %v1536_v19  ;;  %v1215_v30 = vpop.f32.mrf.mxu1  ;;  %v1328_v6 = vpop.f32.mrf.mxu0 }
 0x3db   :  { %4660 = vpow2.f32 %v1540_v22  ;;  %v1546_v60 = vmul.f32 1.442695, %v5677_v13  ;;  %v1550_v36 = vmul.f32 1.442695, %v5680_v29  ;;  %v5685_v28 = vadd.f32 %v1215_v30, %v5639_v50 }
 0x3dc   :  { %4662 = vpow2.f32 %v1534_v18  ;;  %v5688_v35 = vadd.f32 %v1328_v6, %v5642_v40  ;;  %v1219_v56 = vpop.f32.mrf.mxu1  ;;  %vm1486_vm12 = vcmp.gt.f32.partialorder %v5677_v13, 0.0  ;;  %vm1488_vm13 = vcmp.gt.f32.partialorder %v5680_v29, 0.0 }
 0x3dd   :  { %4664 = vpow2.f32 %v1538_v52  ;;  %v1548_v37 = vmul.f32 1.442695, %v5685_v28  ;;  %v5692_v38 = vadd.f32 %v1219_v56, %v5633_v43  ;;  %v1332_v25 = vpop.f32.mrf.mxu0  ;;  %vm1487_vm14 = vcmp.gt.f32.partialorder %v5685_v28, 0.0 }
 0x3de   :  { %4666 = vpow2.f32 %v1546_v60  ;;  %v1552_v31 = vmul.f32 1.442695, %v5688_v35  ;;  %v5696_v47 = vadd.f32 %v1332_v25, %v5636_v46  ;;  %v1221_v42 = vpop.f32.mrf.mxu1  ;;  %vm1489_vm15 = vcmp.gt.f32.partialorder %v5688_v35, 0.0 }
 0x3df   :  { %4668 = vpow2.f32 %v1550_v36  ;;  %v1558_v34 = vmul.f32 1.442695, %v5692_v38  ;;  %v5700_v49 = vadd.f32 %v1221_v42, %v5639_v50  ;;  %v1334_v62 = vpop.f32.mrf.mxu0  ;;  %vm1492_vm3 = vcmp.gt.f32.partialorder %v5692_v38, 0.0 }
 0x3e0   :  { %v4651_v63 = vpop.eup %4650  ;;  %4670 = vpow2.f32 %v1548_v37  ;;  %v1562_v3 = vmul.f32 1.442695, %v5696_v47  ;;  %v5704_v26 = vadd.f32 %v1334_v62, %v5642_v40  ;;  %v1225_v8 = vpop.f32.mrf.mxu1 }
 0x3e1   :  { %v4653_v39 = vpop.eup %4652  ;;  %4672 = vpow2.f32 %v1552_v31  ;;  %v1560_v59 = vmul.f32 1.442695, %v5700_v49  ;;  %v5709_v12 = vadd.f32 %v1225_v8, %v5633_v43  ;;  %v1338_v44 = vpop.f32.mrf.mxu0  ;;  %v4236_v14 = vadd.f32 -1.0, %v4651_v63 }
 0x3e2   :  { %4674 = vpow2.f32 %v1558_v34  ;;  %v1564_v18 = vmul.f32 1.442695, %v5704_v26  ;;  %v5713_v19 = vadd.f32 %v1338_v44, %v5636_v46  ;;  %v1227_v23 = vpop.f32.mrf.mxu1  ;;  %v4655_v24 = vpop.eup %4654  ;;  %v4238_v6 = vadd.f32 -1.0, %v4653_v39 }
 0x3e3   :  { %4676 = vpow2.f32 %v1562_v3  ;;  %v5717_v52 = vadd.f32 %v1227_v23, %v5639_v50  ;;  %v1340_v22 = vpop.f32.mrf.mxu0  ;;  %v4657_v30 = vpop.eup %4656  ;;  %v1570_v56 = vmul.f32 1.442695, %v5709_v12  ;;  %v4237_v31 = vadd.f32 -1.0, %v4655_v24 }
 0x3e4   :  { %4678 = vpow2.f32 %v1560_v59  ;;  %v5721_v60 = vadd.f32 %v1340_v22, %v5642_v40  ;;  %v1231_v36 = vpop.f32.mrf.mxu1  ;;  %v5729_v42 = vsel %vm1474_vm4, %v5645_v55, %v4236_v14  ;;  %v1574_v34 = vmul.f32 1.442695, %v5713_v19  ;;  %v2188_v14 = vld [vmem:[#allocation9 + $0xed0] sm:$0xff] }
 0x3e5   :  { %4680 = vpow2.f32 %v1564_v18  ;;  %v1572_v37 = vmul.f32 1.442695, %v5717_v52  ;;  %v1344_v25 = vpop.f32.mrf.mxu0  ;;  %v4239_v3 = vadd.f32 -1.0, %v4657_v30  ;;  %v5735_v39 = vadd.f32 %v1231_v36, %v5633_v43  ;;  %v2183_v36 = vld [vmem:[#allocation9 + $0xea8] sm:$0xff] }
 0x3e6   :  { %v1576_v62 = vmul.f32 1.442695, %v5721_v60  ;;  %v1233_v63 = vpop.f32.mrf.mxu1  ;;  %v5743_v55 = vsel %vm1475_vm6, %v5653_v45, %v4237_v31  ;;  %v5747_v23 = vadd.f32 %v1344_v25, %v5636_v46  ;;  %v1806_v45 = vld [vmem:[#allocation9 + $0x2e0] sm:$0xff]  ;;  %v5761_v31 = vsel %vm1476_vm5, %v5648_v61, %v4238_v6  ;;  %v1800_v61 = vld [vmem:[#allocation9 + $0x2b0] sm:$0xff] }
 0x3e7   :  { %v4659_v8 = vpop.eup %4658  ;;  %4682 = vpow2.f32 %v1572_v37  ;;  %v5738_v59 = vadd.f32 %v1233_v63, %v5639_v50  ;;  %v1346_v44 = vpop.f32.mrf.mxu0  ;;  %7117 = vst [vmem:[#allocation37_spill] sm:$0xff] %v5743_v55  ;;  %2374 = vmatprep.mubr.f32.mxu0 %v5743_v55  ;;  %v5756_v30 = vsel %vm1477_vm7, %v5656_v5, %v4239_v3  ;;  %v1801_v63 = vld [vmem:[#allocation9 + $0x2b8] sm:$0xff]  ;;  %v1582_v32 = vmul.f32 1.442695, %v5735_v39 }
 0x3e8   :  { %v4661_v18 = vpop.eup %4660  ;;  %4684 = vpow2.f32 %v1576_v62  ;;  %v5750_v24 = vadd.f32 %v1346_v44, %v5642_v40  ;;  %v1237_v22 = vpop.f32.mrf.mxu1  ;;  %2487 = vmatprep.mubr.f32.mxu1 %v5756_v30  ;;  %2375 = vmatmul.mubr.f32.vlgmr.msra.gmra.mxu0 %v5729_v42  ;;  %v4243_v5 = vadd.f32 -1.0, %v4659_v8  ;;  %vm1493_vm1 = vcmp.gt.f32.partialorder %v5700_v49, 0.0 }
 0x3e9   :  { %v4663_v37 = vpop.eup %4662  ;;  %v1584_v25 = vmul.f32 1.442695, %v5738_v59  ;;  %v1350_v62 = vpop.f32.mrf.mxu0  ;;  %4686 = vpow2.f32 %v1570_v56  ;;  %2488 = vmatmul.mubr.f32.vlgmr.msra.gmra.mxu1 %v5761_v31  ;;  %2537 = vmatpush1.msra.mxu0 %v2188_v14  ;;  %v4245_v6 = vadd.f32 -1.0, %v4661_v18  ;;  %v2182_v14 = vld [vmem:[#allocation9 + $0xea0] sm:$0xff]  ;;  %v1586_v18 = vmul.f32 1.442695, %v5747_v23 }
 0x3ea   :  { %v4665_v3 = vpop.eup %4664  ;;  %v1588_v44 = vmul.f32 1.442695, %v5750_v24  ;;  %v1239_v0 = vpop.f32.mrf.mxu1  ;;  %4688 = vpow2.f32 %v1574_v34  ;;  %2650 = vmatpush1.msra.mxu1 %v1806_v45  ;;  %2538 = vmatprep.subr.mxu0 %v2183_v36  ;;  %v5779_v17 = vsel %vm1481_vm10, %v5667_v10, %v4243_v5  ;;  %v5783_v34 = vadd.f32 %v1237_v22, %v5633_v43  ;;  %v2177_v36 = vld [vmem:[#allocation9 + $0xe78] sm:$0xff]  ;;  %v1794_v5 = vld [vmem:[#allocation9 + $0x280] sm:$0xff] }
 0x3eb   :  { %v5770_v33 = vpop.eup %4666  ;;  %v5774_v8 = vadd.f32 %v1239_v0, %v5639_v50  ;;  %v1352_v56 = vpop.f32.mrf.mxu0  ;;  %2651 = vmatprep.subr.mxu1 %v1801_v63  ;;  %2380 = vmatprep.mubr.f32.mxu0 %v5779_v17  ;;  %v5792_v10 = vsel %vm1483_vm11, %v5670_v15, %v4245_v6  ;;  %4690 = vpow2.f32 %v1584_v25  ;;  %v4242_v22 = vadd.f32 -1.0, %v4663_v37  ;;  %v2176_v25 = vld [vmem:[#allocation9 + $0xe70] sm:$0xff] }
 0x3ec   :  { %v4669_v48 = vpop.eup %4668  ;;  %v5786_v45 = vadd.f32 %v1352_v56, %v5642_v40  ;;  %v1243_v0 = vpop.f32.mrf.mxu1  ;;  %2652 = vmatpush1.msra.mxu1 %v1800_v61  ;;  %2493 = vmatprep.mubr.f32.mxu1 %v5792_v10  ;;  %v1789_v56 = vld [vmem:[#allocation9 + $0x258] sm:$0xff]  ;;  %4692 = vpow2.f32 %v1588_v44  ;;  %v5798_v4 = vadd.f32 %v1350_v62, %v5636_v46  ;;  %v4244_v15 = vadd.f32 -1.0, %v4665_v3  ;;  %v2171_v44 = vld [vmem:[#allocation9 + $0xe48] sm:$0xff] }
 0x3ed   :  { %v4671_v11 = vpop.eup %4670  ;;  %v1356_v7 = vpop.f32.mrf.mxu0  ;;  %2539 = vmatpush1.msra.mxu0 %v2182_v14  ;;  %2653 = vmatprep.subr.mxu1 %v1795_v21  ;;  %4694 = vpow2.f32 %v1582_v32  ;;  %v1596_v37 = vmul.f32 1.442695, %v5774_v8  ;;  %v5807_v53 = vsel %vm1480_vm8, %v5661_v9, %v4242_v22  ;;  %v1788_v21 = vld [vmem:[#allocation9 + $0x250] sm:$0xff]  ;;  %v1594_v14 = vmul.f32 1.442695, %v5783_v34 }
 0x3ee   :  { %v4673_v63 = vpop.eup %4672  ;;  %v1245_v6 = vpop.f32.mrf.mxu1  ;;  %2540 = vmatprep.subr.mxu0 %v2177_v36  ;;  %2654 = vmatpush1.msra.mxu1 %v1794_v5  ;;  %4696 = vpow2.f32 %v1586_v18  ;;  %v1600_v32 = vmul.f32 1.442695, %v5786_v45  ;;  %v5816_v9 = vsel %vm1482_vm9, %v5664_v51, %v4244_v15  ;;  %v2170_v36 = vld [vmem:[#allocation9 + $0xe40] sm:$0xff]  ;;  %v1783_v5 = vld [vmem:[#allocation9 + $0x228] sm:$0xff]  ;;  %v4249_v41 = vadd.f32 -1.0, %v4671_v11 }
 0x3ef   :  { %v5801_v61 = vpop.eup %4674  ;;  %v1358_v62 = vpop.f32.mrf.mxu0  ;;  %2381 = vmatmul.mubr.f32.gmra.mxu0 %v5807_v53  ;;  %2655 = vmatprep.subr.mxu1 %v1789_v56  ;;  %v5820_v27 = vadd.f32 %v1245_v6, %v5639_v50  ;;  %v4251_v57 = vadd.f32 -1.0, %v4673_v63  ;;  %v1598_v2 = vmul.f32 1.442695, %v5798_v4  ;;  %v5827_v51 = vadd.f32 %v1243_v0, %v5633_v43  ;;  %v2165_v43 = vld [vmem:[#allocation9 + $0xe18] sm:$0xff]  ;;  %v1782_v0 = vld [vmem:[#allocation9 + $0x220] sm:$0xff] }
 0x3f0   :  { %v4677_v3 = vpop.eup %4676  ;;  %2494 = vmatmul.mubr.f32.gmra.mxu1 %v5816_v9  ;;  %v5823_v18 = vadd.f32 %v1358_v62, %v5642_v40  ;;  %2541 = vmatpush1.msra.mxu0 %v2176_v25  ;;  %v4248_v56 = vadd.f32 -1.0, %v5770_v33  ;;  %v4250_v15 = vadd.f32 -1.0, %v4669_v48  ;;  %4698 = vpow2.f32 %v1596_v37  ;;  %v2164_v33 = vld [vmem:[#allocation9 + $0xe10] sm:$0xff] }
 0x3f1   :  { %v4679_v22 = vpop.eup %4678  ;;  %2542 = vmatprep.subr.mxu0 %v2171_v44  ;;  %2656 = vmatpush1.msra.mxu1 %v1788_v21  ;;  %v5831_v50 = vadd.f32 %v1356_v7, %v5636_v46  ;;  %v5836_v11 = vsel %vm1487_vm14, %v5685_v28, %v4249_v41  ;;  %v5841_v40 = vsel %vm1489_vm15, %v5688_v35, %v4251_v57  ;;  %4700 = vpow2.f32 %v1600_v32  ;;  %v1777_v7 = vld [vmem:[#allocation9 + $0x1f8] sm:$0xff]  ;;  %v2159_v46 = vld [vmem:[#allocation9 + $0xde8] sm:$0xff]  ;;  %v1776_v28 = vld [vmem:[#allocation9 + $0x1f0] sm:$0xff] }
 0x3f2   :  { %v4681_v20 = vpop.eup %4680  ;;  %2543 = vmatpush1.msra.mxu0 %v2170_v36  ;;  %2657 = vmatprep.subr.mxu1 %v1783_v5  ;;  %v5848_v41 = vsel %vm1486_vm12, %v5677_v13, %v4248_v56  ;;  %v5853_v57 = vsel %vm1488_vm13, %v5680_v29, %v4250_v15  ;;  %v4255_v35 = vadd.f32 -1.0, %v4679_v22  ;;  %v1608_v6 = vmul.f32 1.442695, %v5820_v27  ;;  %v2158_v32 = vld [vmem:[#allocation9 + $0xde0] sm:$0xff]  ;;  %v1771_v36 = vld [vmem:[#allocation9 + $0x1c8] sm:$0xff]  ;;  %v2152_v15 = vld [vmem:[#allocation9 + $0xdb0] sm:$0xff] }
 0x3f3   :  { %2386 = vmatprep.mubr.f32.mxu0 %v5836_v11  ;;  %2499 = vmatprep.mubr.f32.mxu1 %v5841_v40  ;;  %v1612_v25 = vmul.f32 1.442695, %v5823_v18  ;;  %v4257_v13 = vadd.f32 -1.0, %v4681_v20  ;;  %vm1495_vm2 = vcmp.gt.f32.partialorder %v5704_v26, 0.0  ;;  %v4254_v37 = vadd.f32 -1.0, %v5801_v61  ;;  %v1770_v61 = vld [vmem:[#allocation9 + $0x1c0] sm:$0xff] }
 0x3f4   :  { %v4683_v48 = vpop.eup %4682  ;;  %2387 = vmatmul.mubr.f32.gmra.mxu0 %v5848_v41  ;;  %2500 = vmatmul.mubr.f32.gmra.mxu1 %v5853_v57  ;;  %v5861_v29 = vsel %vm1493_vm1, %v5700_v49, %v4255_v35  ;;  %v4256_v62 = vadd.f32 -1.0, %v4677_v3  ;;  %4702 = vpow2.f32 %v1594_v14  ;;  %v1606_v22 = vmul.f32 1.442695, %v5827_v51 }
 0x3f5   :  { %v4685_v63 = vpop.eup %4684  ;;  %2544 = vmatprep.subr.mxu0 %v2165_v43  ;;  %2658 = vmatpush1.msra.mxu1 %v1782_v0  ;;  %v5866_v21 = vsel %vm1495_vm2, %v5704_v26, %v4257_v13  ;;  %4704 = vpow2.f32 %v1598_v2  ;;  %v4261_v49 = vadd.f32 -1.0, %v4683_v48  ;;  %vm1494_vm4 = vcmp.gt.f32.partialorder %v5696_v47, 0.0  ;;  %v2153_v26 = vld [vmem:[#allocation9 + $0xdb8] sm:$0xff]  ;;  %v1764_v48 = vld [vmem:[#allocation9 + $0x190] sm:$0xff] }
 0x3f6   :  { %v4687_v44 = vpop.eup %4686  ;;  %2545 = vmatpush1.msra.mxu0 %v2164_v33  ;;  %2659 = vmatprep.subr.mxu1 %v1777_v7  ;;  %v4263_v5 = vadd.f32 -1.0, %v4685_v63  ;;  %4706 = vpow2.f32 %v1608_v6  ;;  %v1610_v2 = vmul.f32 1.442695, %v5831_v50  ;;  %v5875_v14 = vsel %vm1492_vm3, %v5692_v38, %v4254_v37  ;;  %v1765_v43 = vld [vmem:[#allocation9 + $0x198] sm:$0xff]  ;;  %v2147_v33 = vld [vmem:[#allocation9 + $0xd88] sm:$0xff]  ;;  %v2146_v63 = vld [vmem:[#allocation9 + $0xd80] sm:$0xff] }
 0x3f7   :  { %v4689_v20 = vpop.eup %4688  ;;  %2546 = vmatprep.subr.mxu0 %v2159_v46  ;;  %2660 = vmatpush1.msra.mxu1 %v1776_v28  ;;  %4708 = vpow2.f32 %v1612_v25  ;;  %v5878_v56 = vsel %vm1494_vm4, %v5696_v47, %v4256_v62  ;;  %vm1499_vm5 = vcmp.gt.f32.partialorder %v5717_v52, 0.0  ;;  %vm1501_vm6 = vcmp.gt.f32.partialorder %v5721_v60, 0.0  ;;  %v1759_v6 = vld [vmem:[#allocation9 + $0x168] sm:$0xff] }
 0x3f8   :  { %2392 = vmatprep.mubr.f32.mxu0 %v5861_v29  ;;  %2505 = vmatprep.mubr.f32.mxu1 %v5866_v21  ;;  %v4691_v3 = vpop.eup %4690  ;;  %v5885_v38 = vsel %vm1499_vm5, %v5717_v52, %v4261_v49  ;;  %v5888_v47 = vsel %vm1501_vm6, %v5721_v60, %v4263_v5  ;;  %v4260_v46 = vadd.f32 -1.0, %v4687_v44  ;;  %v4262_v28 = vadd.f32 -1.0, %v4689_v20  ;;  %v2141_v52 = vld [vmem:[#allocation9 + $0xd58] sm:$0xff]  ;;  %v1758_v60 = vld [vmem:[#allocation9 + $0x160] sm:$0xff]  ;;  %v2135_v49 = vld [vmem:[#allocation9 + $0xd28] sm:$0xff] }
 0x3f9   :  { %2547 = vmatpush1.msra.mxu0 %v2158_v32  ;;  %2661 = vmatprep.subr.mxu1 %v1771_v36  ;;  %v4693_v0 = vpop.eup %4692  ;;  %4710 = vpow2.f32 %v1606_v22  ;;  %v4267_v25 = vadd.f32 -1.0, %v4691_v3  ;;  %vm1498_vm7 = vcmp.gt.f32.partialorder %v5709_v12, 0.0  ;;  %vm1500_vm8 = vcmp.gt.f32.partialorder %v5713_v19, 0.0  ;;  %v2140_v32 = vld [vmem:[#allocation9 + $0xd50] sm:$0xff]  ;;  %v1753_v36 = vld [vmem:[#allocation9 + $0x138] sm:$0xff] }
 0x3fa   :  { %2393 = vmatmul.mubr.f32.gmra.mxu0 %v5875_v14  ;;  %2506 = vmatmul.mubr.f32.gmra.mxu1 %v5878_v56  ;;  %v4695_v7 = vpop.eup %4694  ;;  %4712 = vpow2.f32 %v1610_v2  ;;  %v4269_v13 = vadd.f32 -1.0, %v4693_v0  ;;  %v5895_v62 = vsel %vm1498_vm7, %v5709_v12, %v4260_v46  ;;  %v5898_v44 = vsel %vm1500_vm8, %v5713_v19, %v4262_v28  ;;  %v1752_v5 = vld [vmem:[#allocation9 + $0x130] sm:$0xff]  ;;  %v2134_v2 = vld [vmem:[#allocation9 + $0xd20] sm:$0xff] }
 0x3fb   :  { %2548 = vmatprep.subr.mxu0 %v2153_v26  ;;  %2662 = vmatpush1.msra.mxu1 %v1770_v61  ;;  %v4697_v35 = vpop.eup %4696  ;;  %vm1505_vm9 = vcmp.gt.f32.partialorder %v5738_v59, 0.0  ;;  %vm1507_vm10 = vcmp.gt.f32.partialorder %v5750_v24, 0.0  ;;  %v4266_v22 = vadd.f32 -1.0, %v4695_v7  ;;  %v152_v3 = vld [vmem:[#allocation13 + $0x28] sm:$0xff]  ;;  %vm1504_vm11 = vcmp.gt.f32.partialorder %v5735_v39, 0.0  ;;  %v1746_v7 = vld [vmem:[#allocation9 + $0x100] sm:$0xff] }
 0x3fc   :  { %2549 = vmatpush1.msra.mxu0 %v2152_v15  ;;  %2663 = vmatprep.subr.mxu1 %v1765_v43  ;;  %v5905_v12 = vsel %vm1505_vm9, %v5738_v59, %v4267_v25  ;;  %v5908_v19 = vsel %vm1507_vm10, %v5750_v24, %v4269_v13  ;;  %v4268_v26 = vadd.f32 -1.0, %v4697_v35  ;;  %v1747_v15 = vld [vmem:[#allocation9 + $0x108] sm:$0xff]  ;;  %vm1506_vm12 = vcmp.gt.f32.partialorder %v5747_v23, 0.0  ;;  %v2129_v24 = vld [vmem:[#allocation9 + $0xcf8] sm:$0xff] }
 0x3fd   :  { %2550 = vmatprep.subr.mxu0 %v2147_v33  ;;  %2664 = vmatpush1.msra.mxu1 %v1764_v48  ;;  %v4699_v37 = vpop.eup %4698  ;;  %v5917_v46 = vrot.slane %v152_v3, %v5630_v16  ;;  %v5920_v35 = vsel %vm1504_vm11, %v5735_v39, %v4266_v22  ;;  %v1741_v25 = vld [vmem:[#allocation9 + $0xd8] sm:$0xff]  ;;  %v151_v13 = vld [vmem:[#allocation13 + $0x20] sm:$0xff]  ;;  %vm1511_vm13 = vcmp.gt.f32.partialorder %v5774_v8, 0.0  ;;  %vm1513_vm14 = vcmp.gt.f32.partialorder %v5786_v45, 0.0 }
 0x3fe   :  { %2398 = vmatprep.mubr.f32.mxu0 %v5885_v38  ;;  %2511 = vmatprep.mubr.f32.mxu1 %v5888_v47  ;;  %v4701_v20 = vpop.eup %4700  ;;  %v4273_v0 = vadd.f32 -1.0, %v4699_v37  ;;  %v2123_v37 = vld [vmem:[#allocation9 + $0xcc8] sm:$0xff]  ;;  %vm1510_vm15 = vcmp.gt.f32.partialorder %v5783_v34, 0.0  ;;  %vm1512_vm1 = vcmp.gt.f32.partialorder %v5798_v4, 0.0  ;;  %vm1517_vm2 = vcmp.gt.f32.partialorder %v5820_v27, 0.0 }
 0x3ff   :  { %2551 = vmatpush1.msra.mxu0 %v2146_v63  ;;  %2665 = vmatprep.subr.mxu1 %v1759_v6  ;;  %v4275_v33 = vadd.f32 -1.0, %v4701_v20  ;;  %v5923_v63 = vsel %vm1506_vm12, %v5747_v23, %v4268_v26  ;;  %v2128_v6 = vld [vmem:[#allocation9 + $0xcf0] sm:$0xff]  ;;  %v1735_v22 = vld [vmem:[#allocation9 + $0xa8] sm:$0xff]  ;;  %v5938_v26 = vrot.slane %v151_v13, %v5630_v16  ;;  %v2117_v16 = vld [vmem:[#allocation9 + $0xc98] sm:$0xff]  ;;  %vm1519_vm3 = vcmp.gt.f32.partialorder %v5823_v18, 0.0 }
 0x400   :  { %2399 = vmatmul.mubr.f32.gmra.mxu0 %v5895_v62  ;;  %2512 = vmatmul.mubr.f32.gmra.mxu1 %v5898_v44  ;;  %v5932_v39 = vsel %vm1511_vm13, %v5774_v8, %v4273_v0  ;;  %v1734_v0 = vld [vmem:[#allocation9 + $0xa0] sm:$0xff]  ;;  %vm1516_vm4 = vcmp.gt.f32.partialorder %v5827_v51, 0.0  ;;  %vm1518_vm5 = vcmp.gt.f32.partialorder %v5831_v50, 0.0  ;;  %vm2291_vm6 = vcmask 1043456  }
 0x401   :  { %2552 = vmatprep.subr.mxu0 %v2141_v52  ;;  %2666 = vmatpush1.msra.mxu1 %v1758_v60  ;;  %v4703_v43 = vpop.eup %4702  ;;  %v5935_v23 = vsel %vm1513_vm14, %v5786_v45, %v4275_v33  ;;  %vm2266_vm8 = vcmask 490496  }
 0x402   :  { %v5910_v61 = vpop.f32.mrf.mxu1  ;;  %2553 = vmatpush1.msra.mxu0 %v2140_v32  ;;  %2667 = vmatprep.subr.mxu1 %v1753_v36  ;;  %v4705_v59 = vpop.eup %4704  ;;  %v1740_v32 = vld [vmem:[#allocation9 + $0xd0] sm:$0xff]  ;;  %7118 = vst [vmem:[#allocation38_spill] sm:$0xff] %v5935_v23  ;;  %v4272_v36 = vadd.f32 -1.0, %v4703_v43 }
 0x403   :  { %2554 = vmatprep.subr.mxu0 %v2135_v49  ;;  %2668 = vmatpush1.msra.mxu1 %v1752_v5  ;;  %v4707_v28 = vpop.eup %4706  ;;  %v4274_v20 = vadd.f32 -1.0, %v4705_v59  ;;  %v2122_v5 = vld [vmem:[#allocation9 + $0xcc0] sm:$0xff]  ;;  %v2116_v59 = vld [vmem:[#allocation9 + $0xc90] sm:$0xff] }
 0x404   :  { %v1429_v48 = vpop.f32.mrf.mxu1  ;;  %2404 = vmatprep.mubr.f32.mxu0 %v5905_v12  ;;  %2517 = vmatprep.mubr.f32.mxu1 %v5908_v19  ;;  %v4709_v60 = vpop.eup %4708  ;;  %v4279_v8 = vadd.f32 -1.0, %v4707_v28  ;;  %v5950_v33 = vsel %vm1510_vm15, %v5783_v34, %v4272_v36  ;;  %v5958_v28 = vadd.f32 %v5910_v61, %v5938_v26  ;;  %v2111_v34 = vld [vmem:[#allocation9 + $0xc68] sm:$0xff]  ;;  %v2110_v36 = vld [vmem:[#allocation9 + $0xc60] sm:$0xff] }
 0x405   :  { %2555 = vmatpush1.msra.mxu0 %v2134_v2  ;;  %2669 = vmatprep.subr.mxu1 %v1747_v15  ;;  %v5941_v3 = vadd.f32 %v1429_v48, %v5917_v46  ;;  %v4281_v15 = vadd.f32 -1.0, %v4709_v60  ;;  %v5953_v48 = vsel %vm1512_vm1, %v5798_v4, %v4274_v20  ;;  %v1723_v20 = vld [vmem:[#allocation9 + $0x48] sm:$0xff] }
 0x406   :  { %v5925_v52 = vpop.f32.mrf.mxu1  ;;  %2405 = vmatmul.mubr.f32.gmra.mxu0 %v5920_v35  ;;  %2518 = vmatmul.mubr.f32.gmra.mxu1 %v5923_v63  ;;  %v4711_v2 = vpop.eup %4710  ;;  %7119 = vst [vmem:[#allocation39_spill] sm:$0xff] %v5953_v48  ;;  %v5965_v13 = vsel %vm1517_vm2, %v5820_v27, %v4279_v8  ;;  %v2105_v27 = vld [vmem:[#allocation9 + $0xc38] sm:$0xff]  ;;  %vm1478_vm9 = vcmp.gt.f32.partialorder %v5958_v28, 0.0 }
 0x407   :  { %2556 = vmatprep.subr.mxu0 %v2129_v24  ;;  %2670 = vmatpush1.msra.mxu1 %v1746_v7  ;;  %v4713_v43 = vpop.eup %4712  ;;  %v1729_v24 = vld [vmem:[#allocation9 + $0x78] sm:$0xff]  ;;  %v4278_v4 = vadd.f32 -1.0, %v4711_v2  ;;  %v5968_v60 = vsel %vm1519_vm3, %v5823_v18, %v4281_v15  ;;  %v1722_v18 = vld [vmem:[#allocation9 + $0x40] sm:$0xff]  ;;  %v2104_v15 = vld [vmem:[#allocation9 + $0xc30] sm:$0xff]  ;;  %vm1479_vm7 = vcmp.gt.f32.partialorder %v5941_v3, 0.0 }
 0x408   :  { %v1435_v49 = vpop.f32.mrf.mxu1  ;;  %2557 = vmatpush1.msra.mxu0 %v2128_v6  ;;  %2671 = vmatprep.subr.mxu1 %v1741_v25  ;;  %v1532_v6 = vmul.f32 1.442695, %v5941_v3  ;;  %v1728_v25 = vld [vmem:[#allocation9 + $0x70] sm:$0xff]  ;;  %7120 = vst [vmem:[#allocation40_spill] sm:$0xff] %v5968_v60  ;;  %v4280_v61 = vadd.f32 -1.0, %v4713_v43  ;;  %v1717_v43 = vld [vmem:[#allocation9 + $0x18] sm:$0xff] }
 0x409   :  { %2558 = vmatprep.subr.mxu0 %v2123_v37  ;;  %2672 = vmatpush1.msra.mxu1 %v1740_v32  ;;  %v5971_v37 = vadd.f32 %v1435_v49, %v5917_v46  ;;  %v5982_v49 = vadd.f32 %v5925_v52, %v5938_v26  ;;  %v5985_v2 = vsel %vm1516_vm4, %v5827_v51, %v4278_v4  ;;  %v1716_v51 = vld [vmem:[#allocation9 + $0x10] sm:$0xff]  ;;  %v1902_v4 = vld [vmem:[#allocation9 + $0x5e0] sm:$0xff] }
 0x40a   :  { %v5943_v45 = vpop.f32.mrf.mxu1  ;;  %2410 = vmatprep.mubr.f32.mxu0 %v5932_v39  ;;  %2523 = vmatprep.mubr.f32.mxu1 %v5935_v23  ;;  %4714 = vpow2.f32 %v1532_v6  ;;  %v5988_v8 = vsel %vm1518_vm5, %v5831_v50, %v4280_v61  ;;  %v1903_v50 = vld [vmem:[#allocation9 + $0x5e8] sm:$0xff]  ;;  %v2237_v6 = vld [vmem:[#allocation9 + $0x1058] sm:$0xf] }
 0x40b   :  { %2559 = vmatpush1.msra.mxu0 %v2122_v5  ;;  %2673 = vmatprep.subr.mxu1 %v1735_v22  ;;  %v1530_v22 = vmul.f32 1.442695, %v5958_v28  ;;  %7121 = vst [vmem:[#allocation41_spill] sm:$0xff] %v5988_v8  ;;  %v6002_v61 = vadd.f32 %v5943_v45, %v5938_v26  ;;  %v1890_v45 = vld [vmem:[#allocation9 + $0x580] sm:$0xff]  ;;  %vm1485_vm10 = vcmp.gt.f32.partialorder %v5971_v37, 0.0  ;;  %vm1484_vm11 = vcmp.gt.f32.partialorder %v5982_v49, 0.0 }
 0x40c   :  { %v1441_v7 = vpop.f32.mrf.mxu1  ;;  %2411 = vmatmul.mubr.f32.gmra.mxu0 %v5950_v33  ;;  %2524 = vmatmul.mubr.f32.gmra.mxu1 %v5953_v48  ;;  %v1825_v23 = vld [vmem:[#allocation9 + $0x378] sm:$0xff] }
 0x40d   :  { %2560 = vmatprep.subr.mxu0 %v2117_v16  ;;  %2674 = vmatpush1.msra.mxu1 %v1734_v0  ;;  %v1544_v16 = vmul.f32 1.442695, %v5971_v37  ;;  %v5996_v52 = vadd.f32 %v1441_v7, %v5917_v46  ;;  %4716 = vpow2.f32 %v1530_v22  ;;  %v2236_v7 = vld [vmem:[#allocation9 + $0x1050] sm:$0xf]  ;;  %v2231_v22 = vld [vmem:[#allocation9 + $0x1028] sm:$0xff]  ;;  %vm1490_vm13 = vcmp.gt.f32.partialorder %v6002_v61, 0.0 }
 0x40e   :  { %v5973_v32 = vpop.f32.mrf.mxu1  ;;  %2561 = vmatpush1.msra.mxu0 %v2116_v59  ;;  %2675 = vmatprep.subr.mxu1 %v1729_v24  ;;  %v2099_v59 = vld [vmem:[#allocation9 + $0xc08] sm:$0xff]  ;;  %v2098_v24 = vld [vmem:[#allocation9 + $0xc00] sm:$0xff] }
 0x40f   :  { %2562 = vmatprep.subr.mxu0 %v2111_v34  ;;  %2676 = vmatpush1.msra.mxu1 %v1728_v25  ;;  %v1542_v25 = vmul.f32 1.442695, %v5982_v49  ;;  %4718 = vpow2.f32 %v1544_v16  ;;  %v2225_v16 = vld [vmem:[#allocation9 + $0xff8] sm:$0xff]  ;;  %vm1491_vm12 = vcmp.gt.f32.partialorder %v5996_v52, 0.0 }
 0x410   :  { %v1447_v5 = vpop.f32.mrf.mxu1  ;;  %2416 = vmatprep.mubr.f32.mxu0 %v5965_v13  ;;  %2529 = vmatprep.mubr.f32.mxu1 %v5968_v60 }
 0x411   :  { %2563 = vmatpush1.msra.mxu0 %v2110_v36  ;;  %2677 = vmatprep.subr.mxu1 %v1723_v20  ;;  %v1897_v36 = vld [vmem:[#allocation9 + $0x5b8] sm:$0xff]  ;;  %v1556_v20 = vmul.f32 1.442695, %v5996_v52  ;;  %4720 = vpow2.f32 %v1542_v25  ;;  %v1884_v25 = vld [vmem:[#allocation9 + $0x550] sm:$0xff] }
 0x412   :  { %v5991_v0 = vpop.f32.mrf.mxu1  ;;  %2417 = vmatmul.mubr.f32.gmra.mxu0 %v5985_v2  ;;  %2530 = vmatmul.mubr.f32.gmra.mxu1 %v5988_v8 }
 0x413   :  { %2564 = vmatprep.subr.mxu0 %v2105_v27  ;;  %2678 = vmatpush1.msra.mxu1 %v1722_v18  ;;  %v1896_v27 = vld [vmem:[#allocation9 + $0x5b0] sm:$0xff]  ;;  %v2230_v18 = vld [vmem:[#allocation9 + $0x1020] sm:$0xff]  ;;  %4722 = vpow2.f32 %v1556_v20 }
 0x414   :  { %2565 = vmatpush1.msra.mxu0 %v2104_v15  ;;  %2679 = vmatprep.subr.mxu1 %v1717_v43  ;;  %v1453_v34 = vpop.f32.mrf.mxu1  ;;  %v6007_v15 = vadd.f32 %v1447_v5, %v5917_v46  ;;  %v1891_v43 = vld [vmem:[#allocation9 + $0x588] sm:$0xff] }
 0x415   :  { %2713 = vmatprep.mubr.f32.mxu1 %v5743_v55  ;;  %2566 = vmatprep.subr.mxu0 %v2099_v59  ;;  %v2219_v5 = vld [vmem:[#allocation9 + $0xfc8] sm:$0xff] }
 0x416   :  { %2680 = vmatpush1.msra.mxu1 %v1716_v51  ;;  %2567 = vmatpush1.msra.mxu0 %v2098_v24  ;;  %v6010_v59 = vpop.f32.mrf.mxu1  ;;  %v2224_v51 = vld [vmem:[#allocation9 + $0xff0] sm:$0xff]  ;;  %v1554_v24 = vmul.f32 1.442695, %v6002_v61  ;;  %vm1497_vm14 = vcmp.gt.f32.partialorder %v6007_v15, 0.0 }
 0x417   :  { %2681 = vmatprep.subr.mxu1 %v1903_v50  ;;  %4284 = vmatprep.subr.msk.mxu0 %vm2291_vm6, %v2237_v6  ;;  %v1885_v50 = vld [vmem:[#allocation9 + $0x558] sm:$0xff]  ;;  %v6015_v6 = vadd.f32 %v5973_v32, %v5938_v26  ;;  %v4715_v20 = vpop.eup %4714 }
 0x418   :  { %2682 = vmatpush2.msra.mxu1 %v1902_v4  ;;  %4285 = vmatpush2.msk.msra.mxu0 %vm2291_vm6, %v2236_v7  ;;  %v1568_v4 = vmul.f32 1.442695, %v6007_v15  ;;  %v2218_v7 = vld [vmem:[#allocation9 + $0xfc0] sm:$0xff]  ;;  %v1459_v58 = vpop.f32.mrf.mxu1  ;;  %4724 = vpow2.f32 %v1554_v24  ;;  %v1873_v32 = vld [vmem:[#allocation9 + $0x4f8] sm:$0xff]  ;;  %v6026_v24 = vadd.f32 %v5991_v0, %v5938_v26 }
 0x419   :  { %2683 = vmatprep.subr.mxu1 %v1897_v36  ;;  %2586 = vmatprep.subr.mxu0 %v2231_v22  ;;  %v1879_v36 = vld [vmem:[#allocation9 + $0x528] sm:$0xff]  ;;  %v2213_v22 = vld [vmem:[#allocation9 + $0xf98] sm:$0xff]  ;;  %v1566_v54 = vmul.f32 1.442695, %v6015_v6  ;;  %v2194_v0 = vld [vmem:[#allocation9 + $0xf00] sm:$0xff]  ;;  %vm1496_vm15 = vcmp.gt.f32.partialorder %v6015_v6, 0.0 }
 0x41a   :  { %2684 = vmatpush2.msra.mxu1 %v1896_v27  ;;  %2587 = vmatpush2.msra.mxu0 %v2230_v18  ;;  %v1878_v27 = vld [vmem:[#allocation9 + $0x520] sm:$0xff]  ;;  %v2212_v18 = vld [vmem:[#allocation9 + $0xf90] sm:$0xff]  ;;  %4726 = vpow2.f32 %v1568_v4  ;;  %v6022_v1 = vpop.f32.mrf.mxu1  ;;  %v4717_v55 = vpop.eup %4716  ;;  %vm1502_vm2 = vcmp.gt.f32.partialorder %v6026_v24, 0.0 }
 0x41b   :  { %2685 = vmatprep.subr.mxu1 %v1891_v43  ;;  %2588 = vmatprep.subr.mxu0 %v2225_v16  ;;  %v6019_v43 = vadd.f32 %v1453_v34, %v5917_v46  ;;  %v2207_v16 = vld [vmem:[#allocation9 + $0xf68] sm:$0xff]  ;;  %v4241_v34 = vadd.f32 -1.0, %v4715_v20  ;;  %v1866_v4 = vld [vmem:[#allocation9 + $0x4c0] sm:$0xff]  ;;  %4728 = vpow2.f32 %v1566_v54  ;;  %v6030_v20 = vadd.f32 %v1459_v58, %v5917_v46 }
 0x41c   :  { %2686 = vmatpush2.msra.mxu1 %v1890_v45  ;;  %2589 = vmatpush2.msra.mxu0 %v2224_v51  ;;  %v1872_v45 = vld [vmem:[#allocation9 + $0x4f0] sm:$0xff]  ;;  %v2206_v51 = vld [vmem:[#allocation9 + $0xf60] sm:$0xff]  ;;  %v1578_v54 = vmul.f32 1.442695, %v6026_v24 }
 0x41d   :  { %2687 = vmatprep.subr.mxu1 %v1885_v50  ;;  %2590 = vmatprep.subr.mxu0 %v2219_v5  ;;  %v1867_v50 = vld [vmem:[#allocation9 + $0x4c8] sm:$0xff]  ;;  %v2201_v5 = vld [vmem:[#allocation9 + $0xf38] sm:$0xff]  ;;  %v6034_v8 = vsel %vm1479_vm7, %v5941_v3, %v4241_v34  ;;  %v1854_v58 = vld [vmem:[#allocation9 + $0x460] sm:$0xff]  ;;  %v6040_v3 = vadd.f32 %v6010_v59, %v5938_v26  ;;  %v1592_v34 = vmul.f32 1.442695, %v6030_v20  ;;  %vm1503_vm1 = vcmp.gt.f32.partialorder %v6019_v43, 0.0 }
 0x41e   :  { %2688 = vmatpush2.msra.mxu1 %v1884_v25  ;;  %2591 = vmatpush2.msra.mxu0 %v2218_v7  ;;  %v1580_v25 = vmul.f32 1.442695, %v6019_v43  ;;  %v2200_v7 = vld [vmem:[#allocation9 + $0xf30] sm:$0xff]  ;;  %vm1509_vm3 = vcmp.gt.f32.partialorder %v6030_v20, 0.0 }
 0x41f   :  { %2689 = vmatprep.subr.mxu1 %v1879_v36  ;;  %2592 = vmatprep.subr.mxu0 %v2213_v22  ;;  %v4719_v36 = vpop.eup %4718  ;;  %v1861_v22 = vld [vmem:[#allocation9 + $0x498] sm:$0xff]  ;;  %v1590_v48 = vmul.f32 1.442695, %v6040_v3  ;;  %vm1508_vm4 = vcmp.gt.f32.partialorder %v6040_v3, 0.0 }
 0x420   :  { %2690 = vmatpush2.msra.mxu1 %v1878_v27  ;;  %2593 = vmatpush2.msra.mxu0 %v2212_v18  ;;  %v2195_v27 = vld [vmem:[#allocation9 + $0xf08] sm:$0xff]  ;;  %v1860_v18 = vld [vmem:[#allocation9 + $0x490] sm:$0xff]  ;;  %4730 = vpow2.f32 %v1580_v25  ;;  %v1998_v25 = vld [vmem:[#allocation9 + $0x8e0] sm:$0xff] }
 0x421   :  { %2691 = vmatprep.subr.mxu1 %v1873_v32  ;;  %2594 = vmatprep.subr.mxu0 %v2207_v16  ;;  %v4240_v32 = vadd.f32 -1.0, %v4717_v55  ;;  %v1855_v16 = vld [vmem:[#allocation9 + $0x468] sm:$0xff]  ;;  %v1849_v55 = vld [vmem:[#allocation9 + $0x438] sm:$0xff]  ;;  %4732 = vpow2.f32 %v1578_v54 }
 0x422   :  { %2692 = vmatpush2.msra.mxu1 %v1872_v45  ;;  %2595 = vmatpush2.msra.mxu0 %v2206_v51  ;;  %v1465_v45 = vpop.f32.mrf.mxu1  ;;  %v1999_v51 = vld [vmem:[#allocation9 + $0x8e8] sm:$0xff]  ;;  %4734 = vpow2.f32 %v1592_v34  ;;  %v1837_v54 = vld [vmem:[#allocation9 + $0x3d8] sm:$0xff] }
 0x423   :  { %2693 = vmatprep.subr.mxu1 %v1867_v50  ;;  %2596 = vmatprep.subr.mxu0 %v2201_v5  ;;  %v4247_v50 = vadd.f32 -1.0, %v4719_v36  ;;  %v4721_v5 = vpop.eup %4720  ;;  %v6046_v36 = vsel %vm1478_vm9, %v5958_v28, %v4240_v32  ;;  %v6053_v59 = vadd.f32 %v1465_v45, %v5917_v46  ;;  %v1842_v32 = vld [vmem:[#allocation9 + $0x400] sm:$0xff]  ;;  %4736 = vpow2.f32 %v1590_v48 }
 0x424   :  { %2694 = vmatpush2.msra.mxu1 %v1866_v4  ;;  %2597 = vmatpush2.msra.mxu0 %v2200_v7  ;;  %v4723_v4 = vpop.eup %4722  ;;  %v1848_v7 = vld [vmem:[#allocation9 + $0x430] sm:$0xff]  ;;  %v4246_v28 = vadd.f32 -1.0, %v4721_v5  ;;  %v6065_v5 = vadd.f32 %v6022_v1, %v5938_v26  ;;  %v1974_v48 = vld [vmem:[#allocation9 + $0x820] sm:$0xff] }
 0x425   :  { %2695 = vmatprep.subr.mxu1 %v1861_v22  ;;  %2598 = vmatprep.subr.mxu0 %v2195_v27  ;;  %v1993_v22 = vld [vmem:[#allocation9 + $0x8b8] sm:$0xff]  ;;  %v1843_v27 = vld [vmem:[#allocation9 + $0x408] sm:$0xff]  ;;  %v4725_v60 = vpop.eup %4724  ;;  %vm1515_vm5 = vcmp.gt.f32.partialorder %v6053_v59, 0.0 }
 0x426   :  { %2696 = vmatpush2.msra.mxu1 %v1860_v18  ;;  %2599 = vmatpush2.msra.mxu0 %v2194_v0  ;;  %v6049_v18 = vpop.f32.mrf.mxu1  ;;  %v1992_v0 = vld [vmem:[#allocation9 + $0x8b0] sm:$0xff]  ;;  %v6069_v34 = vsel %vm1484_vm11, %v5982_v49, %v4246_v28  ;;  %vm1514_vm7 = vcmp.gt.f32.partialorder %v6065_v5, 0.0 }
 0x427   :  { %2697 = vmatprep.subr.mxu1 %v1855_v16  ;;  %4286 = vmatprep.mubr.msk.f32.mxu0 %vm2266_vm8, %v6034_v8  ;;  %v6056_v16 = vsel %vm1485_vm10, %v5971_v37, %v4247_v50  ;;  %v1986_v37 = vld [vmem:[#allocation9 + $0x880] sm:$0xff]  ;;  %v1836_v50 = vld [vmem:[#allocation9 + $0x3d0] sm:$0xff] }
 0x428   :  { %2698 = vmatpush2.msra.mxu1 %v1854_v58  ;;  %2762 = vmatprep.subr.mxu0 %v1999_v51  ;;  %v1987_v58 = vld [vmem:[#allocation9 + $0x888] sm:$0xff]  ;;  %v4253_v51 = vadd.f32 -1.0, %v4723_v4  ;;  %v1471_v45 = vpop.f32.mrf.mxu1  ;;  %v1604_v4 = vmul.f32 1.442695, %v6053_v59 }
 0x429   :  { %2601 = vmatmul.mubr.f32.vlgmr.msra.gmra.mxu0 %v6046_v36  ;;  %2699 = vmatprep.subr.mxu1 %v1849_v55  ;;  %v4727_v55 = vpop.eup %4726  ;;  %v6076_v1 = vadd.f32 %v1471_v45, %v5917_v46  ;;  %v1824_v46 = vld [vmem:[#allocation9 + $0x370] sm:$0xff] }
 0x42a   :  { %2763 = vmatpush1.msra.mxu0 %v1998_v25  ;;  %2700 = vmatpush2.msra.mxu1 %v1848_v7  ;;  %v1981_v25 = vld [vmem:[#allocation9 + $0x858] sm:$0xff]  ;;  %v1831_v7 = vld [vmem:[#allocation9 + $0x3a8] sm:$0xff]  ;;  %v4259_v49 = vadd.f32 -1.0, %v4727_v55  ;;  %v4729_v28 = vpop.eup %4728  ;;  %4738 = vpow2.f32 %v1604_v4 }
 0x42b   :  { %2764 = vmatprep.subr.mxu0 %v1993_v22  ;;  %2701 = vmatprep.subr.mxu1 %v1843_v27  ;;  %v1980_v22 = vld [vmem:[#allocation9 + $0x850] sm:$0xff]  ;;  %v6073_v27 = vsel %vm1491_vm12, %v5996_v52, %v4253_v51  ;;  %v1969_v51 = vld [vmem:[#allocation9 + $0x7f8] sm:$0xff]  ;;  %v1819_v55 = vld [vmem:[#allocation9 + $0x348] sm:$0xff]  ;;  %v1616_v45 = vmul.f32 1.442695, %v6076_v1  ;;  %vm1521_vm9 = vcmp.gt.f32.partialorder %v6076_v1, 0.0 }
 0x42c   :  { %2765 = vmatpush1.msra.mxu0 %v1992_v0  ;;  %4287 = vmatprep.mubr.msk.f32.mxu0 %vm2266_vm8, %v6056_v16  ;;  %v4252_v0 = vadd.f32 -1.0, %v4725_v60  ;;  %v6093_v4 = vsel %vm1497_vm14, %v6007_v15, %v4259_v49  ;;  %v1812_v15 = vld [vmem:[#allocation9 + $0x310] sm:$0xff] }
 0x42d   :  { %2702 = vmatpush2.msra.mxu1 %v1842_v32  ;;  %2766 = vmatprep.subr.mxu0 %v1987_v58  ;;  %v1830_v32 = vld [vmem:[#allocation9 + $0x3a0] sm:$0xff]  ;;  %v1975_v58 = vld [vmem:[#allocation9 + $0x828] sm:$0xff]  ;;  %v4731_v60 = vpop.eup %4730 }
 0x42e   :  { %2607 = vmatmul.mubr.f32.gmra.mxu0 %v6069_v34  ;;  %2703 = vmatprep.subr.mxu1 %v1837_v54  ;;  %v1602_v54 = vmul.f32 1.442695, %v6065_v5  ;;  %v6084_v52 = vsel %vm1490_vm13, %v6002_v61, %v4252_v0  ;;  %v1818_v61 = vld [vmem:[#allocation9 + $0x340] sm:$0xff] }
 0x42f   :  { %2767 = vmatpush1.msra.mxu0 %v1986_v37  ;;  %2704 = vmatpush2.msra.mxu1 %v1836_v50  ;;  %v6088_v37 = vadd.f32 %v6049_v18, %v5938_v26  ;;  %v1968_v50 = vld [vmem:[#allocation9 + $0x7f0] sm:$0xff]  ;;  %v4265_v26 = vadd.f32 -1.0, %v4731_v60  ;;  %v4733_v18 = vpop.eup %4732  ;;  %v2190_v60 = vld [vmem:[#allocation9 + $0xee0] sm:$0xff] }
 0x430   :  { %2768 = vmatprep.subr.mxu0 %v1981_v25  ;;  %2705 = vmatprep.subr.mxu1 %v1831_v7  ;;  %v4258_v25 = vadd.f32 -1.0, %v4729_v28  ;;  %v1963_v7 = vld [vmem:[#allocation9 + $0x7c8] sm:$0xff]  ;;  %4740 = vpow2.f32 %v1602_v54  ;;  %v4735_v49 = vpop.eup %4734  ;;  %v1956_v28 = vld [vmem:[#allocation9 + $0x790] sm:$0xff] }
 0x431   :  { %2769 = vmatpush1.msra.mxu0 %v1980_v22  ;;  %4288 = vmatprep.mubr.msk.f32.mxu0 %vm2266_vm8, %v6073_v27  ;;  %v1813_v22 = vld [vmem:[#allocation9 + $0x318] sm:$0xff]  ;;  %v1614_v0 = vmul.f32 1.442695, %v6088_v37  ;;  %4742 = vpow2.f32 %v1616_v45  ;;  %v2191_v54 = vld [vmem:[#allocation9 + $0xee8] sm:$0xff]  ;;  %v4737_v45 = vpop.eup %4736  ;;  %vm1520_vm10 = vcmp.gt.f32.partialorder %v6088_v37, 0.0 }
 0x432   :  { %2706 = vmatpush2.msra.mxu1 %v1830_v32  ;;  %2770 = vmatprep.subr.mxu0 %v1975_v58  ;;  %v6100_v32 = vsel %vm1496_vm15, %v6015_v6, %v4258_v25  ;;  %v1957_v58 = vld [vmem:[#allocation9 + $0x798] sm:$0xff]  ;;  %v1951_v6 = vld [vmem:[#allocation9 + $0x768] sm:$0xff] }
 0x433   :  { %2613 = vmatmul.mubr.f32.gmra.mxu0 %v6084_v52  ;;  %2707 = vmatprep.subr.mxu1 %v1825_v23  ;;  %v1962_v23 = vld [vmem:[#allocation9 + $0x7c0] sm:$0xff]  ;;  %4744 = vpow2.f32 %v1614_v0  ;;  %v2173_v0 = vld [vmem:[#allocation9 + $0xe58] sm:$0xff] }
 0x434   :  { %2771 = vmatpush1.msra.mxu0 %v1974_v48  ;;  %2708 = vmatpush2.msra.mxu1 %v1824_v46  ;;  %v6105_v48 = vsel %vm1503_vm1, %v6019_v43, %v4265_v26  ;;  %v4264_v46 = vadd.f32 -1.0, %v4733_v18  ;;  %v1950_v43 = vld [vmem:[#allocation9 + $0x760] sm:$0xff]  ;;  %v2179_v26 = vld [vmem:[#allocation9 + $0xe88] sm:$0xff] }
 0x435   :  { %2772 = vmatprep.subr.mxu0 %v1969_v51  ;;  %2709 = vmatprep.subr.mxu1 %v1819_v55  ;;  %v2185_v51 = vld [vmem:[#allocation9 + $0xeb8] sm:$0xff]  ;;  %v4271_v55 = vadd.f32 -1.0, %v4735_v49 }
 0x436   :  { %2773 = vmatpush1.msra.mxu0 %v1968_v50  ;;  %4289 = vmatprep.mubr.msk.f32.mxu0 %vm2266_vm8, %v6093_v4  ;;  %v2184_v50 = vld [vmem:[#allocation9 + $0xeb0] sm:$0xff]  ;;  %v6113_v25 = vsel %vm1502_vm2, %v6026_v24, %v4264_v46  ;;  %v1939_v24 = vld [vmem:[#allocation9 + $0x708] sm:$0xff]  ;;  %v1933_v46 = vld [vmem:[#allocation9 + $0x6d8] sm:$0xff] }
 0x437   :  { %2710 = vmatpush2.msra.mxu1 %v1818_v61  ;;  %2774 = vmatprep.subr.mxu0 %v1963_v7  ;;  %v1945_v61 = vld [vmem:[#allocation9 + $0x738] sm:$0xff]  ;;  %v4739_v7 = vpop.eup %4738  ;;  %v6118_v18 = vsel %vm1509_vm3, %v6030_v20, %v4271_v55  ;;  %v1938_v20 = vld [vmem:[#allocation9 + $0x700] sm:$0xff] }
 0x438   :  { %2619 = vmatmul.mubr.f32.gmra.mxu0 %v6100_v32  ;;  %2711 = vmatprep.subr.mxu1 %v1813_v22  ;;  %v1944_v22 = vld [vmem:[#allocation9 + $0x730] sm:$0xff] }
 0x439   :  { %2775 = vmatpush1.msra.mxu0 %v1962_v23  ;;  %2712 = vmatpush2.msra.mxu1 %v1812_v15  ;;  %v4270_v23 = vadd.f32 -1.0, %v4737_v45  ;;  %v2178_v15 = vld [vmem:[#allocation9 + $0xe80] sm:$0xff] }
 0x43a   :  { %2776 = vmatprep.subr.mxu0 %v1957_v58  ;;  %2714 = vmatmul.mubr.f32.vlgmr.msra.gmra.mxu1 %v5729_v42  ;;  %v4277_v58 = vadd.f32 -1.0, %v4739_v7 }
 0x43b   :  { %2777 = vmatpush1.msra.mxu0 %v1956_v28  ;;  %2875 = vmatprep.subr.mxu1 %v2191_v54  ;;  %v2172_v28 = vld [vmem:[#allocation9 + $0xe50] sm:$0xff]  ;;  %v6126_v54 = vsel %vm1508_vm4, %v6040_v3, %v4270_v23  ;;  %v1927_v3 = vld [vmem:[#allocation9 + $0x6a8] sm:$0xff]  ;;  %v1921_v23 = vld [vmem:[#allocation9 + $0x678] sm:$0xff] }
 0x43c   :  { %4290 = vmatprep.mubr.msk.f32.mxu0 %vm2266_vm8, %v6105_v48  ;;  %2719 = vmatprep.mubr.f32.mxu1 %v5779_v17  ;;  %v6131_v55 = vsel %vm1515_vm5, %v6053_v59, %v4277_v58  ;;  %v1926_v59 = vld [vmem:[#allocation9 + $0x6a0] sm:$0xff] }
 0x43d   :  { %2778 = vmatprep.subr.mxu0 %v1951_v6  ;;  %2876 = vmatpush1.msra.mxu1 %v2190_v60  ;;  %v4741_v49 = vpop.eup %4740  ;;  %v1932_v60 = vld [vmem:[#allocation9 + $0x6d0] sm:$0xff] }
 0x43e   :  { %2625 = vmatmul.mubr.f32.gmra.mxu0 %v6113_v25  ;;  %2877 = vmatprep.subr.mxu1 %v2185_v51  ;;  %v4743_v6 = vpop.eup %4742  ;;  %v2167_v51 = vld [vmem:[#allocation9 + $0xe28] sm:$0xff]  ;;  %v4276_v45 = vadd.f32 -1.0, %v4741_v49 }
 0x43f   :  { %2779 = vmatpush1.msra.mxu0 %v1950_v43  ;;  %2878 = vmatpush1.msra.mxu1 %v2184_v50  ;;  %v2166_v43 = vld [vmem:[#allocation9 + $0xe20] sm:$0xff]  ;;  %v2161_v50 = vld [vmem:[#allocation9 + $0xdf8] sm:$0xff]  ;;  %v1915_v49 = vld [vmem:[#allocation9 + $0x648] sm:$0xff] }
 0x440   :  { %2780 = vmatprep.subr.mxu0 %v1945_v61  ;;  %2720 = vmatmul.mubr.f32.gmra.mxu1 %v5807_v53  ;;  %v4283_v61 = vadd.f32 -1.0, %v4743_v6  ;;  %v4745_v7 = vpop.eup %4744  ;;  %v2148_v6 = vld [vmem:[#allocation9 + $0xd90] sm:$0xff] }
 0x441   :  { %2781 = vmatpush1.msra.mxu0 %v1944_v22  ;;  %2879 = vmatprep.subr.mxu1 %v2179_v26  ;;  %v2160_v22 = vld [vmem:[#allocation9 + $0xdf0] sm:$0xff]  ;;  %v6139_v26 = vsel %vm1514_vm7, %v6065_v5, %v4276_v45  ;;  %v4282_v58 = vadd.f32 -1.0, %v4745_v7  ;;  %v2154_v5 = vld [vmem:[#allocation9 + $0xdc0] sm:$0xff]  ;;  %v2095_v45 = vld [vmem:[#allocation9 + $0xbe8] sm:$0xff] }
 0x442   :  { %4291 = vmatprep.mubr.msk.f32.mxu0 %vm2266_vm8, %v6118_v18  ;;  %2725 = vmatprep.mubr.f32.mxu1 %v5836_v11  ;;  %7122 = vst [vmem:[#allocation42_spill] sm:$0xff] %v6139_v26  ;;  %v2088_v7 = vld [vmem:[#allocation9 + $0xbb0] sm:$0xff] }
 0x443   :  { %2782 = vmatprep.subr.mxu0 %v1939_v24  ;;  %2880 = vmatpush1.msra.mxu1 %v2178_v15  ;;  %v1920_v24 = vld [vmem:[#allocation9 + $0x670] sm:$0xff]  ;;  %v2155_v15 = vld [vmem:[#allocation9 + $0xdc8] sm:$0xff] }
 0x444   :  { %2631 = vmatmul.mubr.f32.gmra.mxu0 %v6126_v54  ;;  %2881 = vmatprep.subr.mxu1 %v2173_v0  ;;  %v6144_v0 = vsel %vm1521_vm9, %v6076_v1, %v4283_v61  ;;  %v6152_v1 = vsel %vm1520_vm10, %v6088_v37, %v4282_v58  ;;  %v2137_v37 = vld [vmem:[#allocation9 + $0xd38] sm:$0xff]  ;;  %v2136_v61 = vld [vmem:[#allocation9 + $0xd30] sm:$0xff] }
 0x445   :  { %2783 = vmatpush1.msra.mxu0 %v1938_v20  ;;  %2882 = vmatpush1.msra.mxu1 %v2172_v28  ;;  %7123 = vst [vmem:[#allocation43_spill] sm:$0xff] %v6144_v0  ;;  %v2149_v20 = vld [vmem:[#allocation9 + $0xd98] sm:$0xff]  ;;  %v1914_v28 = vld [vmem:[#allocation9 + $0x640] sm:$0xff]  ;;  %7124 = vst [vmem:[#allocation44_spill] sm:$0xff] %v6152_v1 }
 0x446   :  { %2784 = vmatprep.subr.mxu0 %v1933_v46  ;;  %2726 = vmatmul.mubr.f32.gmra.mxu1 %v5848_v41  ;;  %v1909_v46 = vld [vmem:[#allocation9 + $0x618] sm:$0xff] }
 0x447   :  { %2785 = vmatpush1.msra.mxu0 %v1932_v60  ;;  %2883 = vmatprep.subr.mxu1 %v2167_v51  ;;  %v1908_v60 = vld [vmem:[#allocation9 + $0x610] sm:$0xff]  ;;  %v2143_v51 = vld [vmem:[#allocation9 + $0xd68] sm:$0xff]  ;;  %v2077_v58 = vld [vmem:[#allocation9 + $0xb58] sm:$0xff] }
 0x448   :  { %4292 = vmatprep.mubr.msk.f32.mxu0 %vm2266_vm8, %v6131_v55  ;;  %2731 = vmatprep.mubr.f32.mxu1 %v5861_v29 }
 0x449   :  { %2786 = vmatprep.subr.mxu0 %v1927_v3  ;;  %2884 = vmatpush1.msra.mxu1 %v2166_v43  ;;  %v2142_v3 = vld [vmem:[#allocation9 + $0xd60] sm:$0xff] }
 0x44a   :  { %2637 = vmatmul.mubr.f32.gmra.mxu0 %v6139_v26  ;;  %2885 = vmatprep.subr.mxu1 %v2161_v50  ;;  %v2094_v43 = vld [vmem:[#allocation9 + $0xbe0] sm:$0xff]  ;;  %v2089_v50 = vld [vmem:[#allocation9 + $0xbb8] sm:$0xff] }
 0x44b   :  { %2787 = vmatpush1.msra.mxu0 %v1926_v59  ;;  %2886 = vmatpush1.msra.mxu1 %v2160_v22  ;;  %v2131_v59 = vld [vmem:[#allocation9 + $0xd08] sm:$0xff] }
 0x44c   :  { %2788 = vmatprep.subr.mxu0 %v1921_v23  ;;  %2732 = vmatmul.mubr.f32.gmra.mxu1 %v5875_v14  ;;  %v2083_v22 = vld [vmem:[#allocation9 + $0xb88] sm:$0xff]  ;;  %v2130_v23 = vld [vmem:[#allocation9 + $0xd00] sm:$0xff] }
 0x44d   :  { %2789 = vmatpush1.msra.mxu0 %v1920_v24  ;;  %2887 = vmatprep.subr.mxu1 %v2155_v15  ;;  %v2082_v24 = vld [vmem:[#allocation9 + $0xb80] sm:$0xff]  ;;  %v2125_v15 = vld [vmem:[#allocation9 + $0xcd8] sm:$0xff] }
 0x44e   :  { %4293 = vmatprep.mubr.msk.f32.mxu0 %vm2266_vm8, %v6144_v0  ;;  %2737 = vmatprep.mubr.f32.mxu1 %v5885_v38 }
 0x44f   :  { %2790 = vmatprep.subr.mxu0 %v1915_v49  ;;  %2888 = vmatpush1.msra.mxu1 %v2154_v5  ;;  %v2124_v49 = vld [vmem:[#allocation9 + $0xcd0] sm:$0xff] }
 0x450   :  { %2643 = vmatmul.mubr.f32.gmra.mxu0 %v6152_v1  ;;  %2889 = vmatprep.subr.mxu1 %v2149_v20  ;;  %v2076_v5 = vld [vmem:[#allocation9 + $0xb50] sm:$0xff]  ;;  %v2119_v20 = vld [vmem:[#allocation9 + $0xca8] sm:$0xff] }
 0x451   :  { %2791 = vmatpush1.msra.mxu0 %v1914_v28  ;;  %2826 = vmatprep.mubr.f32.mxu0 %v5756_v30  ;;  %v2071_v28 = vld [vmem:[#allocation9 + $0xb28] sm:$0xff] }
 0x452   :  { %2792 = vmatprep.subr.mxu0 %v1909_v46  ;;  %2890 = vmatpush1.msra.mxu1 %v2148_v6  ;;  %v2118_v46 = vld [vmem:[#allocation9 + $0xca0] sm:$0xff] }
 0x453   :  { %2738 = vmatmul.mubr.f32.gmra.mxu1 %v5895_v62  ;;  %2793 = vmatpush1.msra.mxu0 %v1908_v60  ;;  %v2070_v6 = vld [vmem:[#allocation9 + $0xb20] sm:$0xff]  ;;  %v2113_v60 = vld [vmem:[#allocation9 + $0xc78] sm:$0xff] }
 0x454   :  { %2891 = vmatprep.subr.mxu1 %v2143_v51  ;;  %2743 = vmatprep.mubr.f32.mxu1 %v5905_v12  ;;  %v2065_v51 = vld [vmem:[#allocation9 + $0xaf8] sm:$0xff] }
 0x455   :  { %2794 = vmatprep.subr.mxu0 %v2095_v45  ;;  %2892 = vmatpush1.msra.mxu1 %v2142_v3  ;;  %v2112_v45 = vld [vmem:[#allocation9 + $0xc70] sm:$0xff] }
 0x456   :  { %2795 = vmatpush2.msra.mxu0 %v2094_v43  ;;  %2893 = vmatprep.subr.mxu1 %v2137_v37  ;;  %v2064_v3 = vld [vmem:[#allocation9 + $0xaf0] sm:$0xff]  ;;  %v2107_v43 = vld [vmem:[#allocation9 + $0xc48] sm:$0xff] }
 0x457   :  { %2796 = vmatprep.subr.mxu0 %v2089_v50  ;;  %2894 = vmatpush1.msra.mxu1 %v2136_v61  ;;  %v2059_v37 = vld [vmem:[#allocation9 + $0xac8] sm:$0xff]  ;;  %v2106_v50 = vld [vmem:[#allocation9 + $0xc40] sm:$0xff] }
 0x458   :  { %2744 = vmatmul.mubr.f32.gmra.mxu1 %v5920_v35  ;;  %2797 = vmatpush2.msra.mxu0 %v2088_v7  ;;  %v2058_v61 = vld [vmem:[#allocation9 + $0xac0] sm:$0xff]  ;;  %v2101_v7 = vld [vmem:[#allocation9 + $0xc18] sm:$0xff] }
 0x459   :  { %2895 = vmatprep.subr.mxu1 %v2131_v59  ;;  %2749 = vmatprep.mubr.f32.mxu1 %v5932_v39  ;;  %v2053_v59 = vld [vmem:[#allocation9 + $0xa98] sm:$0xff] }
 0x45a   :  { %2798 = vmatprep.subr.mxu0 %v2083_v22  ;;  %2896 = vmatpush1.msra.mxu1 %v2130_v23  ;;  %v2100_v22 = vld [vmem:[#allocation9 + $0xc10] sm:$0xff] }
 0x45b   :  { %2799 = vmatpush2.msra.mxu0 %v2082_v24  ;;  %2897 = vmatprep.subr.mxu1 %v2125_v15  ;;  %v2052_v23 = vld [vmem:[#allocation9 + $0xa90] sm:$0xff]  ;;  %v2239_v24 = vld [vmem:[#allocation9 + $0x1068] sm:$0xf] }
 0x45c   :  { %2800 = vmatprep.subr.mxu0 %v2077_v58  ;;  %2898 = vmatpush1.msra.mxu1 %v2124_v49  ;;  %v2047_v15 = vld [vmem:[#allocation9 + $0xa68] sm:$0xff]  ;;  %v2238_v58 = vld [vmem:[#allocation9 + $0x1060] sm:$0xf] }
 0x45d   :  { %2750 = vmatmul.mubr.f32.gmra.mxu1 %v5950_v33  ;;  %2801 = vmatpush2.msra.mxu0 %v2076_v5  ;;  %v2046_v49 = vld [vmem:[#allocation9 + $0xa60] sm:$0xff]  ;;  %v2233_v5 = vld [vmem:[#allocation9 + $0x1038] sm:$0xff] }
 0x45e   :  { %2899 = vmatprep.subr.mxu1 %v2119_v20  ;;  %2755 = vmatprep.mubr.f32.mxu1 %v5965_v13  ;;  %v2041_v20 = vld [vmem:[#allocation9 + $0xa38] sm:$0xff] }
 0x45f   :  { %2802 = vmatprep.subr.mxu0 %v2071_v28  ;;  %2900 = vmatpush1.msra.mxu1 %v2118_v46  ;;  %v2232_v28 = vld [vmem:[#allocation9 + $0x1030] sm:$0xff] }
 0x460   :  { %2803 = vmatpush2.msra.mxu0 %v2070_v6  ;;  %2901 = vmatprep.subr.mxu1 %v2113_v60  ;;  %v2040_v46 = vld [vmem:[#allocation9 + $0xa30] sm:$0xff]  ;;  %v2227_v6 = vld [vmem:[#allocation9 + $0x1008] sm:$0xff] }
 0x461   :  { %2804 = vmatprep.subr.mxu0 %v2065_v51  ;;  %2902 = vmatpush1.msra.mxu1 %v2112_v45  ;;  %v2035_v60 = vld [vmem:[#allocation9 + $0xa08] sm:$0xff]  ;;  %v2226_v51 = vld [vmem:[#allocation9 + $0x1000] sm:$0xff] }
 0x462   :  { %2756 = vmatmul.mubr.f32.gmra.mxu1 %v5985_v2  ;;  %2805 = vmatpush2.msra.mxu0 %v2064_v3  ;;  %v2034_v45 = vld [vmem:[#allocation9 + $0xa00] sm:$0xff]  ;;  %v2221_v3 = vld [vmem:[#allocation9 + $0xfd8] sm:$0xff] }
 0x463   :  { %2903 = vmatprep.subr.mxu1 %v2107_v43  ;;  %2806 = vmatprep.subr.mxu0 %v2059_v37  ;;  %v2029_v43 = vld [vmem:[#allocation9 + $0x9d8] sm:$0xff]  ;;  %v2220_v37 = vld [vmem:[#allocation9 + $0xfd0] sm:$0xff] }
 0x464   :  { %2904 = vmatpush1.msra.mxu1 %v2106_v50  ;;  %4296 = vmatprep.mubr.msk.f32.mxu1 %vm2266_vm8, %v6034_v8  ;;  %v2028_v50 = vld [vmem:[#allocation9 + $0x9d0] sm:$0xff] }
 0x465   :  { %2807 = vmatpush2.msra.mxu0 %v2058_v61  ;;  %2905 = vmatprep.subr.mxu1 %v2101_v7  ;;  %v2215_v61 = vld [vmem:[#allocation9 + $0xfa8] sm:$0xff] }
 0x466   :  { %2808 = vmatprep.subr.mxu0 %v2053_v59  ;;  %2906 = vmatpush1.msra.mxu1 %v2100_v22  ;;  %v2023_v7 = vld [vmem:[#allocation9 + $0x9a8] sm:$0xff]  ;;  %v2214_v59 = vld [vmem:[#allocation9 + $0xfa0] sm:$0xff] }
 0x467   :  { %2809 = vmatpush2.msra.mxu0 %v2052_v23  ;;  %4294 = vmatprep.subr.msk.mxu1 %vm2291_vm6, %v2239_v24  ;;  %v2022_v22 = vld [vmem:[#allocation9 + $0x9a0] sm:$0xff]  ;;  %v2209_v23 = vld [vmem:[#allocation9 + $0xf78] sm:$0xff] }
 0x468   :  { %2810 = vmatprep.subr.mxu0 %v2047_v15  ;;  %4295 = vmatpush2.msk.msra.mxu1 %vm2291_vm6, %v2238_v58  ;;  %v2017_v24 = vld [vmem:[#allocation9 + $0x978] sm:$0xff]  ;;  %v2208_v15 = vld [vmem:[#allocation9 + $0xf70] sm:$0xff] }
 0x469   :  { %2811 = vmatpush2.msra.mxu0 %v2046_v49  ;;  %2925 = vmatprep.subr.mxu1 %v2233_v5  ;;  %v2016_v58 = vld [vmem:[#allocation9 + $0x970] sm:$0xff]  ;;  %v2203_v49 = vld [vmem:[#allocation9 + $0xf48] sm:$0xff] }
 0x46a   :  { %2812 = vmatprep.subr.mxu0 %v2041_v20  ;;  %2926 = vmatpush2.msra.mxu1 %v2232_v28  ;;  %v2011_v5 = vld [vmem:[#allocation9 + $0x948] sm:$0xff]  ;;  %v2202_v20 = vld [vmem:[#allocation9 + $0xf40] sm:$0xff] }
 0x46b   :  { %2813 = vmatpush2.msra.mxu0 %v2040_v46  ;;  %2927 = vmatprep.subr.mxu1 %v2227_v6  ;;  %v2010_v28 = vld [vmem:[#allocation9 + $0x940] sm:$0xff]  ;;  %v2197_v46 = vld [vmem:[#allocation9 + $0xf18] sm:$0xff] }
 0x46c   :  { %2814 = vmatprep.subr.mxu0 %v2035_v60  ;;  %2928 = vmatpush2.msra.mxu1 %v2226_v51  ;;  %v2005_v6 = vld [vmem:[#allocation9 + $0x918] sm:$0xff]  ;;  %v2196_v60 = vld [vmem:[#allocation9 + $0xf10] sm:$0xff] }
 0x46d   :  { %2815 = vmatpush2.msra.mxu0 %v2034_v45  ;;  %2929 = vmatprep.subr.mxu1 %v2221_v3  ;;  %v2004_v51 = vld [vmem:[#allocation9 + $0x910] sm:$0xff]  ;;  %v2001_v45 = vld [vmem:[#allocation9 + $0x8f8] sm:$0xff] }
 0x46e   :  { %2816 = vmatprep.subr.mxu0 %v2029_v43  ;;  %2930 = vmatpush2.msra.mxu1 %v2220_v37  ;;  %v1809_v3 = vld [vmem:[#allocation9 + $0x2f8] sm:$0xff]  ;;  %v2000_v43 = vld [vmem:[#allocation9 + $0x8f0] sm:$0xff] }
 0x46f   :  { %2817 = vmatpush2.msra.mxu0 %v2028_v50  ;;  %2931 = vmatprep.subr.mxu1 %v2215_v61  ;;  %v1808_v37 = vld [vmem:[#allocation9 + $0x2f0] sm:$0xff]  ;;  %v1995_v50 = vld [vmem:[#allocation9 + $0x8c8] sm:$0xff] }
 0x470   :  { %2818 = vmatprep.subr.mxu0 %v2023_v7  ;;  %2932 = vmatpush2.msra.mxu1 %v2214_v59  ;;  %v1803_v61 = vld [vmem:[#allocation9 + $0x2c8] sm:$0xff]  ;;  %v1994_v7 = vld [vmem:[#allocation9 + $0x8c0] sm:$0xff] }
 0x471   :  { %2819 = vmatpush2.msra.mxu0 %v2022_v22  ;;  %2933 = vmatprep.subr.mxu1 %v2209_v23  ;;  %v1802_v59 = vld [vmem:[#allocation9 + $0x2c0] sm:$0xff]  ;;  %v1989_v22 = vld [vmem:[#allocation9 + $0x898] sm:$0xff] }
 0x472   :  { %2820 = vmatprep.subr.mxu0 %v2017_v24  ;;  %2934 = vmatpush2.msra.mxu1 %v2208_v15  ;;  %v1797_v23 = vld [vmem:[#allocation9 + $0x298] sm:$0xff]  ;;  %v1988_v24 = vld [vmem:[#allocation9 + $0x890] sm:$0xff] }
 0x473   :  { %2821 = vmatpush2.msra.mxu0 %v2016_v58  ;;  %2935 = vmatprep.subr.mxu1 %v2203_v49  ;;  %v1796_v15 = vld [vmem:[#allocation9 + $0x290] sm:$0xff]  ;;  %v1983_v58 = vld [vmem:[#allocation9 + $0x868] sm:$0xff] }
 0x474   :  { %2822 = vmatprep.subr.mxu0 %v2011_v5  ;;  %2936 = vmatpush2.msra.mxu1 %v2202_v20  ;;  %v1791_v49 = vld [vmem:[#allocation9 + $0x268] sm:$0xff]  ;;  %v1982_v5 = vld [vmem:[#allocation9 + $0x860] sm:$0xff] }
 0x475   :  { %2823 = vmatpush2.msra.mxu0 %v2010_v28  ;;  %2937 = vmatprep.subr.mxu1 %v2197_v46  ;;  %v1790_v20 = vld [vmem:[#allocation9 + $0x260] sm:$0xff]  ;;  %v1977_v28 = vld [vmem:[#allocation9 + $0x838] sm:$0xff] }
 0x476   :  { %2824 = vmatprep.subr.mxu0 %v2005_v6  ;;  %2938 = vmatpush2.msra.mxu1 %v2196_v60  ;;  %v1785_v46 = vld [vmem:[#allocation9 + $0x238] sm:$0xff]  ;;  %v1976_v6 = vld [vmem:[#allocation9 + $0x830] sm:$0xff] }
 0x477   :  { %2825 = vmatpush2.msra.mxu0 %v2004_v51  ;;  %2940 = vmatmul.mubr.f32.vlgmr.msra.gmra.mxu1 %v6046_v36  ;;  %v1784_v60 = vld [vmem:[#allocation9 + $0x230] sm:$0xff]  ;;  %v1971_v51 = vld [vmem:[#allocation9 + $0x808] sm:$0xff] }
 0x478   :  { %3101 = vmatprep.subr.mxu1 %v2001_v45  ;;  %2827 = vmatmul.mubr.f32.vlgmr.msra.gmra.mxu0 %v5761_v31  ;;  %v1779_v45 = vld [vmem:[#allocation9 + $0x208] sm:$0xff] }
 0x479   :  { %4297 = vmatprep.mubr.msk.f32.mxu1 %vm2266_vm8, %v6056_v16  ;;  %2988 = vmatprep.subr.mxu0 %v1809_v3  ;;  %v1970_v3 = vld [vmem:[#allocation9 + $0x800] sm:$0xff] }
 0x47a   :  { %3102 = vmatpush1.msra.mxu1 %v2000_v43  ;;  %2832 = vmatprep.mubr.f32.mxu0 %v5792_v10  ;;  %v1778_v43 = vld [vmem:[#allocation9 + $0x200] sm:$0xff] }
 0x47b   :  { %2989 = vmatpush1.msra.mxu0 %v1808_v37  ;;  %3103 = vmatprep.subr.mxu1 %v1995_v50  ;;  %v1965_v37 = vld [vmem:[#allocation9 + $0x7d8] sm:$0xff] }
 0x47c   :  { %2990 = vmatprep.subr.mxu0 %v1803_v61  ;;  %3104 = vmatpush1.msra.mxu1 %v1994_v7  ;;  %v1773_v50 = vld [vmem:[#allocation9 + $0x1d8] sm:$0xff]  ;;  %v1964_v61 = vld [vmem:[#allocation9 + $0x7d0] sm:$0xff] }
 0x47d   :  { %2946 = vmatmul.mubr.f32.gmra.mxu1 %v6069_v34  ;;  %2991 = vmatpush1.msra.mxu0 %v1802_v59  ;;  %v1772_v7 = vld [vmem:[#allocation9 + $0x1d0] sm:$0xff]  ;;  %v1959_v59 = vld [vmem:[#allocation9 + $0x7a8] sm:$0xff] }
 0x47e   :  { %3105 = vmatprep.subr.mxu1 %v1989_v22  ;;  %2833 = vmatmul.mubr.f32.gmra.mxu0 %v5816_v9  ;;  %v1767_v22 = vld [vmem:[#allocation9 + $0x1a8] sm:$0xff] }
 0x47f   :  { %4298 = vmatprep.mubr.msk.f32.mxu1 %vm2266_vm8, %v6073_v27  ;;  %2992 = vmatprep.subr.mxu0 %v1797_v23  ;;  %v1958_v23 = vld [vmem:[#allocation9 + $0x7a0] sm:$0xff] }
 0x480   :  { %3106 = vmatpush1.msra.mxu1 %v1988_v24  ;;  %2838 = vmatprep.mubr.f32.mxu0 %v5841_v40  ;;  %v1766_v24 = vld [vmem:[#allocation9 + $0x1a0] sm:$0xff] }
 0x481   :  { %2993 = vmatpush1.msra.mxu0 %v1796_v15  ;;  %3107 = vmatprep.subr.mxu1 %v1983_v58  ;;  %v1953_v15 = vld [vmem:[#allocation9 + $0x778] sm:$0xff] }
 0x482   :  { %2994 = vmatprep.subr.mxu0 %v1791_v49  ;;  %3108 = vmatpush1.msra.mxu1 %v1982_v5  ;;  %v1761_v58 = vld [vmem:[#allocation9 + $0x178] sm:$0xff]  ;;  %v1952_v49 = vld [vmem:[#allocation9 + $0x770] sm:$0xff] }
 0x483   :  { %2952 = vmatmul.mubr.f32.gmra.mxu1 %v6084_v52  ;;  %2995 = vmatpush1.msra.mxu0 %v1790_v20  ;;  %v1760_v5 = vld [vmem:[#allocation9 + $0x170] sm:$0xff]  ;;  %v1947_v20 = vld [vmem:[#allocation9 + $0x748] sm:$0xff] }
 0x484   :  { %3109 = vmatprep.subr.mxu1 %v1977_v28  ;;  %2839 = vmatmul.mubr.f32.gmra.mxu0 %v5853_v57  ;;  %v1755_v28 = vld [vmem:[#allocation9 + $0x148] sm:$0xff] }
 0x485   :  { %4299 = vmatprep.mubr.msk.f32.mxu1 %vm2266_vm8, %v6093_v4  ;;  %2996 = vmatprep.subr.mxu0 %v1785_v46  ;;  %v1946_v46 = vld [vmem:[#allocation9 + $0x740] sm:$0xff] }
 0x486   :  { %3110 = vmatpush1.msra.mxu1 %v1976_v6  ;;  %2844 = vmatprep.mubr.f32.mxu0 %v5866_v21  ;;  %v1754_v6 = vld [vmem:[#allocation9 + $0x140] sm:$0xff] }
 0x487   :  { %2997 = vmatpush1.msra.mxu0 %v1784_v60  ;;  %3111 = vmatprep.subr.mxu1 %v1971_v51  ;;  %v1941_v60 = vld [vmem:[#allocation9 + $0x718] sm:$0xff] }
 0x488   :  { %2998 = vmatprep.subr.mxu0 %v1779_v45  ;;  %3112 = vmatpush1.msra.mxu1 %v1970_v3  ;;  %v1749_v51 = vld [vmem:[#allocation9 + $0x118] sm:$0xff]  ;;  %v1940_v45 = vld [vmem:[#allocation9 + $0x710] sm:$0xff] }
 0x489   :  { %2958 = vmatmul.mubr.f32.gmra.mxu1 %v6100_v32  ;;  %2999 = vmatpush1.msra.mxu0 %v1778_v43  ;;  %v1748_v3 = vld [vmem:[#allocation9 + $0x110] sm:$0xff]  ;;  %v1935_v43 = vld [vmem:[#allocation9 + $0x6e8] sm:$0xff] }
 0x48a   :  { %3113 = vmatprep.subr.mxu1 %v1965_v37  ;;  %2845 = vmatmul.mubr.f32.gmra.mxu0 %v5878_v56  ;;  %v1743_v37 = vld [vmem:[#allocation9 + $0xe8] sm:$0xff] }
 0x48b   :  { %4300 = vmatprep.mubr.msk.f32.mxu1 %vm2266_vm8, %v6105_v48  ;;  %3000 = vmatprep.subr.mxu0 %v1773_v50  ;;  %v1934_v50 = vld [vmem:[#allocation9 + $0x6e0] sm:$0xff] }
 0x48c   :  { %3114 = vmatpush1.msra.mxu1 %v1964_v61  ;;  %2850 = vmatprep.mubr.f32.mxu0 %v5888_v47  ;;  %v7125_v61 = vld [vmem:[#allocation38_spill] sm:$0xff] }
 0x48d   :  { %3001 = vmatpush1.msra.mxu0 %v1772_v7  ;;  %3115 = vmatprep.subr.mxu1 %v1959_v59  ;;  %v1742_v7 = vld [vmem:[#allocation9 + $0xe0] sm:$0xff]  ;;  %v1929_v59 = vld [vmem:[#allocation9 + $0x6b8] sm:$0xff] }
 0x48e   :  { %3002 = vmatprep.subr.mxu0 %v1767_v22  ;;  %3116 = vmatpush1.msra.mxu1 %v1958_v23  ;;  %v1737_v22 = vld [vmem:[#allocation9 + $0xb8] sm:$0xff]  ;;  %v1928_v23 = vld [vmem:[#allocation9 + $0x6b0] sm:$0xff] }
 0x48f   :  { %2964 = vmatmul.mubr.f32.gmra.mxu1 %v6113_v25  ;;  %3003 = vmatpush1.msra.mxu0 %v1766_v24  ;;  %v7126_v24 = vld [vmem:[#allocation39_spill] sm:$0xff] }
 0x490   :  { %3117 = vmatprep.subr.mxu1 %v1953_v15  ;;  %2851 = vmatmul.mubr.f32.gmra.mxu0 %v5898_v44  ;;  %v1736_v15 = vld [vmem:[#allocation9 + $0xb0] sm:$0xff] }
 0x491   :  { %4301 = vmatprep.mubr.msk.f32.mxu1 %vm2266_vm8, %v6118_v18  ;;  %3004 = vmatprep.subr.mxu0 %v1761_v58  ;;  %v1923_v58 = vld [vmem:[#allocation9 + $0x688] sm:$0xff] }
 0x492   :  { %3118 = vmatpush1.msra.mxu1 %v1952_v49  ;;  %2856 = vmatprep.mubr.f32.mxu0 %v5908_v19  ;;  %v1731_v49 = vld [vmem:[#allocation9 + $0x88] sm:$0xff] }
 0x493   :  { %3005 = vmatpush1.msra.mxu0 %v1760_v5  ;;  %3119 = vmatprep.subr.mxu1 %v1947_v20  ;;  %v1922_v5 = vld [vmem:[#allocation9 + $0x680] sm:$0xff]  ;;  %v7127_v20 = vld [vmem:[#allocation40_spill] sm:$0xff] }
 0x494   :  { %3006 = vmatprep.subr.mxu0 %v1755_v28  ;;  %3120 = vmatpush1.msra.mxu1 %v1946_v46  ;;  %v1730_v28 = vld [vmem:[#allocation9 + $0x80] sm:$0xff]  ;;  %v1917_v46 = vld [vmem:[#allocation9 + $0x658] sm:$0xff] }
 0x495   :  { %2970 = vmatmul.mubr.f32.gmra.mxu1 %v6126_v54  ;;  %3007 = vmatpush1.msra.mxu0 %v1754_v6  ;;  %v1725_v6 = vld [vmem:[#allocation9 + $0x58] sm:$0xff] }
 0x496   :  { %3121 = vmatprep.subr.mxu1 %v1941_v60  ;;  %2857 = vmatmul.mubr.f32.gmra.mxu0 %v5923_v63  ;;  %v1916_v60 = vld [vmem:[#allocation9 + $0x650] sm:$0xff] }
 0x497   :  { %4302 = vmatprep.mubr.msk.f32.mxu1 %vm2266_vm8, %v6131_v55  ;;  %3008 = vmatprep.subr.mxu0 %v1749_v51  ;;  %v1724_v51 = vld [vmem:[#allocation9 + $0x50] sm:$0xff] }
 0x498   :  { %3122 = vmatpush1.msra.mxu1 %v1940_v45  ;;  %2862 = vmatprep.mubr.f32.mxu0 %v7125_v61  ;;  %v7128_v45 = vld [vmem:[#allocation41_spill] sm:$0xff] }
 0x499   :  { %3009 = vmatpush1.msra.mxu0 %v1748_v3  ;;  %3123 = vmatprep.subr.mxu1 %v1935_v43  ;;  %v1911_v3 = vld [vmem:[#allocation9 + $0x628] sm:$0xff] }
 0x49a   :  { %3010 = vmatprep.subr.mxu0 %v1743_v37  ;;  %3124 = vmatpush1.msra.mxu1 %v1934_v50  ;;  %v1719_v43 = vld [vmem:[#allocation9 + $0x28] sm:$0xff]  ;;  %v1910_v37 = vld [vmem:[#allocation9 + $0x620] sm:$0xff] }
 0x49b   :  { %2976 = vmatmul.mubr.f32.gmra.mxu1 %v6139_v26  ;;  %3011 = vmatpush1.msra.mxu0 %v1742_v7  ;;  %v1718_v50 = vld [vmem:[#allocation9 + $0x20] sm:$0xff]  ;;  %v2097_v7 = vld [vmem:[#allocation9 + $0xbf8] sm:$0xff] }
 0x49c   :  { %3125 = vmatprep.subr.mxu1 %v1929_v59  ;;  %2863 = vmatmul.mubr.f32.gmra.mxu0 %v7126_v24  ;;  %v7129_v59 = vld [vmem:[#allocation37_spill] sm:$0xff] }
 0x49d   :  { %4303 = vmatprep.mubr.msk.f32.mxu1 %vm2266_vm8, %v6144_v0  ;;  %3012 = vmatprep.subr.mxu0 %v1737_v22  ;;  %v1905_v22 = vld [vmem:[#allocation9 + $0x5f8] sm:$0xff] }
 0x49e   :  { %3126 = vmatpush1.msra.mxu1 %v1928_v23  ;;  %2868 = vmatprep.mubr.f32.mxu0 %v7127_v20  ;;  %v2096_v23 = vld [vmem:[#allocation9 + $0xbf0] sm:$0xff] }
 0x49f   :  { %3013 = vmatpush1.msra.mxu0 %v1736_v15  ;;  %3127 = vmatprep.subr.mxu1 %v1923_v58  ;;  %v1904_v15 = vld [vmem:[#allocation9 + $0x5f0] sm:$0xff]  ;;  %v2091_v58 = vld [vmem:[#allocation9 + $0xbc8] sm:$0xff] }
 0x4a0   :  { %3014 = vmatprep.subr.mxu0 %v1731_v49  ;;  %3128 = vmatpush1.msra.mxu1 %v1922_v5  ;;  %v1899_v49 = vld [vmem:[#allocation9 + $0x5c8] sm:$0xff]  ;;  %v2090_v5 = vld [vmem:[#allocation9 + $0xbc0] sm:$0xff] }
 0x4a1   :  { %2982 = vmatmul.mubr.f32.gmra.mxu1 %v6152_v1  ;;  %3015 = vmatpush1.msra.mxu0 %v1730_v28  ;;  %v1898_v28 = vld [vmem:[#allocation9 + $0x5c0] sm:$0xff] }
 0x4a2   :  { %3129 = vmatprep.subr.mxu1 %v1917_v46  ;;  %2869 = vmatmul.mubr.f32.gmra.mxu0 %v7128_v45  ;;  %v1893_v46 = vld [vmem:[#allocation9 + $0x598] sm:$0xff] }
 0x4a3   :  { %3016 = vmatprep.subr.mxu0 %v1725_v6  ;;  %3130 = vmatpush1.msra.mxu1 %v1916_v60  ;;  %v2084_v6 = vld [vmem:[#allocation9 + $0xb90] sm:$0xff] }
 0x4a4   :  { %3165 = vmatprep.mubr.f32.mxu1 %v5756_v30  ;;  %3017 = vmatpush1.msra.mxu0 %v1724_v51  ;;  %v2085_v30 = vld [vmem:[#allocation9 + $0xb98] sm:$0xff]  ;;  %v1892_v60 = vld [vmem:[#allocation9 + $0x590] sm:$0xff]  ;;  %v2079_v51 = vld [vmem:[#allocation9 + $0xb68] sm:$0xff] }
 0x4a5   :  { %3052 = vmatprep.mubr.f32.mxu0 %v7129_v59  ;;  %3131 = vmatprep.subr.mxu1 %v1911_v3  ;;  %v1887_v3 = vld [vmem:[#allocation9 + $0x568] sm:$0xff]  ;;  %v2072_v59 = vld [vmem:[#allocation9 + $0xb30] sm:$0xff] }
 0x4a6   :  { %3018 = vmatprep.subr.mxu0 %v1719_v43  ;;  %3132 = vmatpush1.msra.mxu1 %v1910_v37  ;;  %v2078_v43 = vld [vmem:[#allocation9 + $0xb60] sm:$0xff] }
 0x4a7   :  { %3019 = vmatpush1.msra.mxu0 %v1718_v50  ;;  %3133 = vmatprep.subr.mxu1 %v2097_v7  ;;  %v1886_v37 = vld [vmem:[#allocation9 + $0x560] sm:$0xff]  ;;  %v2073_v50 = vld [vmem:[#allocation9 + $0xb38] sm:$0xff] }
 0x4a8   :  { %3020 = vmatprep.subr.mxu0 %v1905_v22  ;;  %3134 = vmatpush2.msra.mxu1 %v2096_v23  ;;  %v1881_v7 = vld [vmem:[#allocation9 + $0x538] sm:$0xff]  ;;  %v1880_v22 = vld [vmem:[#allocation9 + $0x530] sm:$0xff]  ;;  %v2067_v23 = vld [vmem:[#allocation9 + $0xb08] sm:$0xff] }
 0x4a9   :  { %3021 = vmatpush2.msra.mxu0 %v1904_v15  ;;  %3135 = vmatprep.subr.mxu1 %v2091_v58  ;;  %v1875_v15 = vld [vmem:[#allocation9 + $0x508] sm:$0xff]  ;;  %v2066_v58 = vld [vmem:[#allocation9 + $0xb00] sm:$0xff] }
 0x4aa   :  { %3022 = vmatprep.subr.mxu0 %v1899_v49  ;;  %3136 = vmatpush2.msra.mxu1 %v2090_v5  ;;  %v1874_v49 = vld [vmem:[#allocation9 + $0x500] sm:$0xff]  ;;  %v2061_v5 = vld [vmem:[#allocation9 + $0xad8] sm:$0xff] }
 0x4ab   :  { %3023 = vmatpush2.msra.mxu0 %v1898_v28  ;;  %3137 = vmatprep.subr.mxu1 %v2085_v30  ;;  %v1869_v28 = vld [vmem:[#allocation9 + $0x4d8] sm:$0xff]  ;;  %v2060_v30 = vld [vmem:[#allocation9 + $0xad0] sm:$0xff] }
 0x4ac   :  { %3024 = vmatprep.subr.mxu0 %v1893_v46  ;;  %3138 = vmatpush2.msra.mxu1 %v2084_v6  ;;  %v6206_v46 = vpop.f32.mrf.mxu0  ;;  %v1868_v6 = vld [vmem:[#allocation9 + $0x4d0] sm:$0xff] }
 0x4ad   :  { %3025 = vmatpush2.msra.mxu0 %v1892_v60  ;;  %3139 = vmatprep.subr.mxu1 %v2079_v51  ;;  %v2055_v60 = vld [vmem:[#allocation9 + $0xaa8] sm:$0xff] }
 0x4ae   :  { %3026 = vmatprep.subr.mxu0 %v1887_v3  ;;  %3140 = vmatpush2.msra.mxu1 %v2078_v43  ;;  %v1863_v51 = vld [vmem:[#allocation9 + $0x4a8] sm:$0xff]  ;;  %v2054_v3 = vld [vmem:[#allocation9 + $0xaa0] sm:$0xff] }
 0x4af   :  { %3027 = vmatpush2.msra.mxu0 %v1886_v37  ;;  %3141 = vmatprep.subr.mxu1 %v2073_v50  ;;  %v1862_v43 = vld [vmem:[#allocation9 + $0x4a0] sm:$0xff]  ;;  %v2049_v37 = vld [vmem:[#allocation9 + $0xa78] sm:$0xff] }
 0x4b0   :  { %3028 = vmatprep.subr.mxu0 %v1881_v7  ;;  %3142 = vmatpush2.msra.mxu1 %v2072_v59  ;;  %v1857_v50 = vld [vmem:[#allocation9 + $0x478] sm:$0xff]  ;;  %v2048_v7 = vld [vmem:[#allocation9 + $0xa70] sm:$0xff]  ;;  %v6208_v59 = vpop.f32.mrf.mxu0 }
 0x4b1   :  { %3029 = vmatpush2.msra.mxu0 %v1880_v22  ;;  %3143 = vmatprep.subr.mxu1 %v2067_v23  ;;  %v1856_v22 = vld [vmem:[#allocation9 + $0x470] sm:$0xff]  ;;  %v2043_v23 = vld [vmem:[#allocation9 + $0xa48] sm:$0xff] }
 0x4b2   :  { %3030 = vmatprep.subr.mxu0 %v1875_v15  ;;  %3144 = vmatpush2.msra.mxu1 %v2066_v58  ;;  %v1851_v15 = vld [vmem:[#allocation9 + $0x448] sm:$0xff]  ;;  %v2042_v58 = vld [vmem:[#allocation9 + $0xa40] sm:$0xff] }
 0x4b3   :  { %3031 = vmatpush2.msra.mxu0 %v1874_v49  ;;  %3145 = vmatprep.subr.mxu1 %v2061_v5  ;;  %v1850_v49 = vld [vmem:[#allocation9 + $0x440] sm:$0xff]  ;;  %v2037_v5 = vld [vmem:[#allocation9 + $0xa18] sm:$0xff] }
 0x4b4   :  { %3032 = vmatprep.subr.mxu0 %v1869_v28  ;;  %3146 = vmatpush2.msra.mxu1 %v2060_v30  ;;  %v1845_v28 = vld [vmem:[#allocation9 + $0x418] sm:$0xff]  ;;  %v2036_v30 = vld [vmem:[#allocation9 + $0xa10] sm:$0xff] }
 0x4b5   :  { %3033 = vmatpush2.msra.mxu0 %v1868_v6  ;;  %3147 = vmatprep.subr.mxu1 %v2055_v60  ;;  %v6210_v6 = vpop.f32.mrf.mxu0  ;;  %v1844_v60 = vld [vmem:[#allocation9 + $0x410] sm:$0xff] }
 0x4b6   :  { %3034 = vmatprep.subr.mxu0 %v1863_v51  ;;  %3148 = vmatpush2.msra.mxu1 %v2054_v3  ;;  %v2031_v51 = vld [vmem:[#allocation9 + $0x9e8] sm:$0xff] }
 0x4b7   :  { %3035 = vmatpush2.msra.mxu0 %v1862_v43  ;;  %3149 = vmatprep.subr.mxu1 %v2049_v37  ;;  %v1839_v3 = vld [vmem:[#allocation9 + $0x3e8] sm:$0xff]  ;;  %v2030_v43 = vld [vmem:[#allocation9 + $0x9e0] sm:$0xff]  ;;  %v6214_v1 = vpop.f32.mrf.mxu0 }
 0x4b8   :  { %3036 = vmatprep.subr.mxu0 %v1857_v50  ;;  %3150 = vmatpush2.msra.mxu1 %v2048_v7  ;;  %v1838_v37 = vld [vmem:[#allocation9 + $0x3e0] sm:$0xff]  ;;  %v2025_v50 = vld [vmem:[#allocation9 + $0x9b8] sm:$0xff]  ;;  %v6212_v7 = vpop.f32.mrf.mxu1 }
 0x4b9   :  { %3037 = vmatpush2.msra.mxu0 %v1856_v22  ;;  %3151 = vmatprep.subr.mxu1 %v2043_v23  ;;  %v1833_v22 = vld [vmem:[#allocation9 + $0x3b8] sm:$0xff]  ;;  %v2024_v23 = vld [vmem:[#allocation9 + $0x9b0] sm:$0xff]  ;;  %v6218_v26 = vpop.f32.mrf.mxu0 }
 0x4ba   :  { %3038 = vmatprep.subr.mxu0 %v1851_v15  ;;  %3152 = vmatpush2.msra.mxu1 %v2042_v58  ;;  %v1832_v15 = vld [vmem:[#allocation9 + $0x3b0] sm:$0xff]  ;;  %v2019_v58 = vld [vmem:[#allocation9 + $0x988] sm:$0xff]  ;;  %v6216_v0 = vpop.f32.mrf.mxu1 }
 0x4bb   :  { %3039 = vmatpush2.msra.mxu0 %v1850_v49  ;;  %3153 = vmatprep.subr.mxu1 %v2037_v5  ;;  %v1827_v49 = vld [vmem:[#allocation9 + $0x388] sm:$0xff]  ;;  %v2018_v5 = vld [vmem:[#allocation9 + $0x980] sm:$0xff] }
 0x4bc   :  { %3040 = vmatprep.subr.mxu0 %v1845_v28  ;;  %3154 = vmatpush2.msra.mxu1 %v2036_v30  ;;  %v1826_v28 = vld [vmem:[#allocation9 + $0x380] sm:$0xff]  ;;  %v2013_v30 = vld [vmem:[#allocation9 + $0x958] sm:$0xff] }
 0x4bd   :  { %3041 = vmatpush2.msra.mxu0 %v1844_v60  ;;  %3155 = vmatprep.subr.mxu1 %v2031_v51  ;;  %v1821_v60 = vld [vmem:[#allocation9 + $0x358] sm:$0xff]  ;;  %v2012_v51 = vld [vmem:[#allocation9 + $0x950] sm:$0xff] }
 0x4be   :  { %3042 = vmatprep.subr.mxu0 %v1839_v3  ;;  %3156 = vmatpush2.msra.mxu1 %v2030_v43  ;;  %v1820_v3 = vld [vmem:[#allocation9 + $0x350] sm:$0xff]  ;;  %v2007_v43 = vld [vmem:[#allocation9 + $0x928] sm:$0xff] }
 0x4bf   :  { %3043 = vmatpush2.msra.mxu0 %v1838_v37  ;;  %3157 = vmatprep.subr.mxu1 %v2025_v50  ;;  %v1815_v37 = vld [vmem:[#allocation9 + $0x328] sm:$0xff]  ;;  %v2006_v50 = vld [vmem:[#allocation9 + $0x920] sm:$0xff] }
 0x4c0   :  { %3044 = vmatprep.subr.mxu0 %v1833_v22  ;;  %3158 = vmatpush2.msra.mxu1 %v2024_v23  ;;  %v1814_v22 = vld [vmem:[#allocation9 + $0x320] sm:$0xff]  ;;  %v6220_v23 = vpop.f32.mrf.mxu1 }
 0x4c1   :  { %3045 = vmatpush2.msra.mxu0 %v1832_v15  ;;  %3159 = vmatprep.subr.mxu1 %v2019_v58  ;;  %v6222_v15 = vpop.f32.mrf.mxu0  ;;  %v2193_v58 = vld [vmem:[#allocation9 + $0xef8] sm:$0xff] }
 0x4c2   :  { %3046 = vmatprep.subr.mxu0 %v1827_v49  ;;  %3160 = vmatpush2.msra.mxu1 %v2018_v5  ;;  %v3670_v49 = vld [vmem:[#allocation12 + $0x78] sm:$0xff]  ;;  %v7130_v5 = vmov 0.0  }
 0x4c3   :  { %3047 = vmatpush2.msra.mxu0 %v1826_v28  ;;  %3161 = vmatprep.subr.mxu1 %v2013_v30  ;;  %v2192_v28 = vld [vmem:[#allocation9 + $0xef0] sm:$0xff]  ;;  %v6227_v30 = vpop.f32.mrf.mxu1 }
 0x4c4   :  { %3048 = vmatprep.subr.mxu0 %v1821_v60  ;;  %3162 = vmatpush2.msra.mxu1 %v2012_v51  ;;  %v2187_v60 = vld [vmem:[#allocation9 + $0xec8] sm:$0xff]  ;;  %v3669_v51 = vld [vmem:[#allocation12 + $0x70] sm:$0xff] }
 0x4c5   :  { %3049 = vmatpush2.msra.mxu0 %v1820_v3  ;;  %3163 = vmatprep.subr.mxu1 %v2007_v43  ;;  %v6230_v3 = vpop.f32.mrf.mxu0  ;;  %v2186_v43 = vld [vmem:[#allocation9 + $0xec0] sm:$0xff] }
 0x4c6   :  { %3050 = vmatprep.subr.mxu0 %v1815_v37  ;;  %3164 = vmatpush2.msra.mxu1 %v2006_v50  ;;  %v2175_v50 = vld [vmem:[#allocation9 + $0xe68] sm:$0xff] }
 0x4c7   :  { %3051 = vmatpush2.msra.mxu0 %v1814_v22  ;;  %3166 = vmatmul.mubr.f32.vlgmr.msra.gmra.mxu1 %v5761_v31  ;;  %v6234_v31 = vpop.f32.mrf.mxu1  ;;  %v6237_v37 = vpop.f32.mrf.mxu0  ;;  %v3667_v22 = vld [vmem:[#allocation12 + $0x60] sm:$0xff] }
 0x4c8   :  { %3684 = vmatprep.subr.mxu1 %v7130_v5  ;;  %3053 = vmatmul.mubr.f32.vlgmr.msra.gmra.mxu0 %v5729_v42  ;;  %v2181_v42 = vld [vmem:[#allocation9 + $0xe98] sm:$0xff] }
 0x4c9   :  { %3171 = vmatprep.mubr.f32.mxu1 %v5792_v10  ;;  %3214 = vmatprep.subr.mxu0 %v2193_v58  ;;  %v3668_v10 = vld [vmem:[#allocation12 + $0x68] sm:$0xff]  ;;  %v2174_v58 = vld [vmem:[#allocation9 + $0xe60] sm:$0xff] }
 0x4ca   :  { %3685 = vmatpush1.msra.mxu1 %v3670_v49  ;;  %3058 = vmatprep.mubr.f32.mxu0 %v5779_v17  ;;  %v2180_v17 = vld [vmem:[#allocation9 + $0xe90] sm:$0xff]  ;;  %v6243_v49 = vpop.f32.mrf.mxu1 }
 0x4cb   :  { %3215 = vmatpush1.msra.mxu0 %v2192_v28  ;;  %3686 = vmatprep.subr.mxu1 %v7130_v5 }
 0x4cc   :  { %3216 = vmatprep.subr.mxu0 %v2187_v60  ;;  %3687 = vmatpush1.msra.mxu1 %v3669_v51  ;;  %v6251_v28 = vpop.f32.mrf.mxu1  ;;  %v2163_v60 = vld [vmem:[#allocation9 + $0xe08] sm:$0xff]  ;;  %v3665_v51 = vld [vmem:[#allocation12 + $0x50] sm:$0xff] }
 0x4cd   :  { %3172 = vmatmul.mubr.f32.gmra.mxu1 %v5816_v9  ;;  %3217 = vmatpush1.msra.mxu0 %v2186_v43  ;;  %v6246_v9 = vpop.f32.mrf.mxu0 }
 0x4ce   :  { %3688 = vmatprep.subr.mxu1 %v7130_v5  ;;  %3059 = vmatmul.mubr.f32.gmra.mxu0 %v5807_v53  ;;  %v2169_v53 = vld [vmem:[#allocation9 + $0xe38] sm:$0xff] }
 0x4cf   :  { %3177 = vmatprep.mubr.f32.mxu1 %v5841_v40  ;;  %3218 = vmatprep.subr.mxu0 %v2181_v42  ;;  %v3666_v40 = vld [vmem:[#allocation12 + $0x58] sm:$0xff]  ;;  %v6254_v43 = vpop.f32.mrf.mxu0  ;;  %v6258_v42 = vpop.f32.mrf.mxu1 }
 0x4d0   :  { %3689 = vmatpush1.msra.mxu1 %v3668_v10  ;;  %3064 = vmatprep.mubr.f32.mxu0 %v5836_v11  ;;  %v2168_v11 = vld [vmem:[#allocation9 + $0xe30] sm:$0xff] }
 0x4d1   :  { %3219 = vmatpush1.msra.mxu0 %v2180_v17  ;;  %3690 = vmatprep.subr.mxu1 %v7130_v5  ;;  %v6261_v10 = vpop.f32.mrf.mxu0  ;;  %v2151_v17 = vld [vmem:[#allocation9 + $0xda8] sm:$0xff] }
 0x4d2   :  { %3220 = vmatprep.subr.mxu0 %v2175_v50  ;;  %3691 = vmatpush1.msra.mxu1 %v3667_v22  ;;  %v3663_v50 = vld [vmem:[#allocation12 + $0x40] sm:$0xff] }
 0x4d3   :  { %3178 = vmatmul.mubr.f32.gmra.mxu1 %v5853_v57  ;;  %3221 = vmatpush1.msra.mxu0 %v2174_v58  ;;  %v2162_v57 = vld [vmem:[#allocation9 + $0xe00] sm:$0xff]  ;;  %v6267_v58 = vpop.f32.mrf.mxu1 }
 0x4d4   :  { %3692 = vmatprep.subr.mxu1 %v7130_v5  ;;  %3065 = vmatmul.mubr.f32.gmra.mxu0 %v5848_v41  ;;  %v2157_v41 = vld [vmem:[#allocation9 + $0xdd8] sm:$0xff]  ;;  %v2150_v22 = vld [vmem:[#allocation9 + $0xda0] sm:$0xff] }
 0x4d5   :  { %3183 = vmatprep.mubr.f32.mxu1 %v5866_v21  ;;  %3222 = vmatprep.subr.mxu0 %v2169_v53  ;;  %v3664_v21 = vld [vmem:[#allocation12 + $0x48] sm:$0xff]  ;;  %v6275_v53 = vpop.f32.mrf.mxu1 }
 0x4d6   :  { %3693 = vmatpush1.msra.mxu1 %v3666_v40  ;;  %3070 = vmatprep.mubr.f32.mxu0 %v5861_v29  ;;  %v2156_v29 = vld [vmem:[#allocation9 + $0xdd0] sm:$0xff]  ;;  %v2139_v40 = vld [vmem:[#allocation9 + $0xd48] sm:$0xff] }
 0x4d7   :  { %3223 = vmatpush1.msra.mxu0 %v2168_v11  ;;  %3694 = vmatprep.subr.mxu1 %v7130_v5  ;;  %v3661_v11 = vld [vmem:[#allocation12 + $0x30] sm:$0xff] }
 0x4d8   :  { %3224 = vmatprep.subr.mxu0 %v2163_v60  ;;  %3695 = vmatpush1.msra.mxu1 %v3665_v51  ;;  %v6282_v51 = vpop.f32.mrf.mxu1 }
 0x4d9   :  { %3184 = vmatmul.mubr.f32.gmra.mxu1 %v5878_v56  ;;  %3225 = vmatpush1.msra.mxu0 %v2162_v57  ;;  %v6270_v56 = vpop.f32.mrf.mxu0 }
 0x4da   :  { %3696 = vmatprep.subr.mxu1 %v7130_v5  ;;  %3071 = vmatmul.mubr.f32.gmra.mxu0 %v5875_v14  ;;  %v2145_v14 = vld [vmem:[#allocation9 + $0xd78] sm:$0xff] }
 0x4db   :  { %3189 = vmatprep.mubr.f32.mxu1 %v5888_v47  ;;  %3226 = vmatprep.subr.mxu0 %v2157_v41  ;;  %v3662_v47 = vld [vmem:[#allocation12 + $0x38] sm:$0xff]  ;;  %v6278_v60 = vpop.f32.mrf.mxu0  ;;  %v2127_v41 = vld [vmem:[#allocation9 + $0xce8] sm:$0xff] }
 0x4dc   :  { %3697 = vmatpush1.msra.mxu1 %v3664_v21  ;;  %3076 = vmatprep.mubr.f32.mxu0 %v5885_v38  ;;  %v2144_v38 = vld [vmem:[#allocation9 + $0xd70] sm:$0xff]  ;;  %v3659_v21 = vld [vmem:[#allocation12 + $0x20] sm:$0xff] }
 0x4dd   :  { %3227 = vmatpush1.msra.mxu0 %v2156_v29  ;;  %3698 = vmatprep.subr.mxu1 %v7130_v5  ;;  %v6285_v57 = vpop.f32.mrf.mxu0  ;;  %v2126_v29 = vld [vmem:[#allocation9 + $0xce0] sm:$0xff] }
 0x4de   :  { %3228 = vmatprep.subr.mxu0 %v2151_v17  ;;  %3699 = vmatpush1.msra.mxu1 %v3663_v50  ;;  %v6291_v17 = vpop.f32.mrf.mxu1 }
 0x4df   :  { %3190 = vmatmul.mubr.f32.gmra.mxu1 %v5898_v44  ;;  %3229 = vmatpush1.msra.mxu0 %v2150_v22  ;;  %v2138_v44 = vld [vmem:[#allocation9 + $0xd40] sm:$0xff]  ;;  %v2115_v22 = vld [vmem:[#allocation9 + $0xc88] sm:$0xff] }
 0x4e0   :  { %3700 = vmatprep.subr.mxu1 %v7130_v5  ;;  %3077 = vmatmul.mubr.f32.gmra.mxu0 %v5895_v62  ;;  %v2133_v62 = vld [vmem:[#allocation9 + $0xd18] sm:$0xff]  ;;  %v6299_v50 = vpop.f32.mrf.mxu1 }
 0x4e1   :  { %3195 = vmatprep.mubr.f32.mxu1 %v5908_v19  ;;  %3230 = vmatprep.subr.mxu0 %v2145_v14  ;;  %v3660_v19 = vld [vmem:[#allocation12 + $0x28] sm:$0xff]  ;;  %v3657_v14 = vld [vmem:[#allocation12 + $0x10] sm:$0xff] }
 0x4e2   :  { %3701 = vmatpush1.msra.mxu1 %v3662_v47  ;;  %3082 = vmatprep.mubr.f32.mxu0 %v5905_v12  ;;  %v2132_v12 = vld [vmem:[#allocation9 + $0xd10] sm:$0xff] }
 0x4e3   :  { %3231 = vmatpush1.msra.mxu0 %v2144_v38  ;;  %3702 = vmatprep.subr.mxu1 %v7130_v5 }
 0x4e4   :  { %3232 = vmatprep.subr.mxu0 %v2139_v40  ;;  %3703 = vmatpush1.msra.mxu1 %v3661_v11  ;;  %v3656_v40 = vld [vmem:[#allocation12 + $0x8] sm:$0xff]  ;;  %v6308_v11 = vpop.f32.mrf.mxu1 }
 0x4e5   :  { %3196 = vmatmul.mubr.f32.gmra.mxu1 %v5923_v63  ;;  %3233 = vmatpush1.msra.mxu0 %v2138_v44  ;;  %v6294_v63 = vpop.f32.mrf.mxu0  ;;  %v3655_v44 = vld [vmem:[#allocation12] sm:$0xff] }
 0x4e6   :  { %3704 = vmatprep.subr.mxu1 %v7130_v5  ;;  %3083 = vmatmul.mubr.f32.gmra.mxu0 %v5920_v35  ;;  %v2121_v35 = vld [vmem:[#allocation9 + $0xcb8] sm:$0xff] }
 0x4e7   :  { %3201 = vmatprep.mubr.f32.mxu1 %v7125_v61  ;;  %3234 = vmatprep.subr.mxu0 %v2133_v62  ;;  %v3658_v61 = vld [vmem:[#allocation12 + $0x18] sm:$0xff]  ;;  %v6302_v47 = vpop.f32.mrf.mxu0 }
 0x4e8   :  { %3705 = vmatpush1.msra.mxu1 %v3660_v19  ;;  %3088 = vmatprep.mubr.f32.mxu0 %v5932_v39  ;;  %v2120_v39 = vld [vmem:[#allocation9 + $0xcb0] sm:$0xff]  ;;  %v7131_v19 = vld [vmem:[#allocation21_spill] sm:$0xff] }
 0x4e9   :  { %3235 = vmatpush1.msra.mxu0 %v2132_v12  ;;  %3706 = vmatprep.subr.mxu1 %v7130_v5  ;;  %v6306_v38 = vpop.f32.mrf.mxu0  ;;  %v2102_v12 = vld [vmem:[#allocation9 + $0xc20] sm:$0xff] }
 0x4ea   :  { %3236 = vmatprep.subr.mxu0 %v2127_v41  ;;  %3707 = vmatpush1.msra.mxu1 %v3659_v21  ;;  %v6317_v41 = vpop.f32.mrf.mxu1  ;;  %v2240_v21 = vld [vmem:[#allocation9 + $0x1070] sm:$0xf] }
 0x4eb   :  { %3202 = vmatmul.mubr.f32.gmra.mxu1 %v7126_v24  ;;  %3237 = vmatpush1.msra.mxu0 %v2126_v29  ;;  %v2114_v24 = vld [vmem:[#allocation9 + $0xc80] sm:$0xff]  ;;  %v6313_v62 = vpop.f32.mrf.mxu0  ;;  %v2235_v29 = vld [vmem:[#allocation9 + $0x1048] sm:$0xff] }
 0x4ec   :  { %3708 = vmatprep.subr.mxu1 %v7130_v5  ;;  %3089 = vmatmul.mubr.f32.gmra.mxu0 %v5950_v33  ;;  %v2109_v33 = vld [vmem:[#allocation9 + $0xc58] sm:$0xff] }
 0x4ed   :  { %3207 = vmatprep.mubr.f32.mxu1 %v7127_v20  ;;  %3238 = vmatprep.subr.mxu0 %v2121_v35  ;;  %v2108_v20 = vld [vmem:[#allocation9 + $0xc50] sm:$0xff]  ;;  %v3678_v35 = vld [vmem:[#allocation12 + $0xb8] sm:$0xff] }
 0x4ee   :  { %3709 = vmatpush1.msra.mxu1 %v3658_v61  ;;  %3094 = vmatprep.mubr.f32.mxu0 %v5965_v13  ;;  %v2103_v13 = vld [vmem:[#allocation9 + $0xc28] sm:$0xff]  ;;  %v6323_v61 = vpop.f32.mrf.mxu0 }
 0x4ef   :  { %3239 = vmatpush1.msra.mxu0 %v2120_v39  ;;  %3710 = vmatprep.subr.mxu1 %v7130_v5  ;;  %v2234_v39 = vld [vmem:[#allocation9 + $0x1040] sm:$0xff] }
 0x4f0   :  { %3240 = vmatprep.subr.mxu0 %v2115_v22  ;;  %3711 = vmatpush1.msra.mxu1 %v3657_v14  ;;  %v6326_v22 = vpop.f32.mrf.mxu1  ;;  %v3677_v14 = vld [vmem:[#allocation12 + $0xb0] sm:$0xff] }
 0x4f1   :  { %3208 = vmatmul.mubr.f32.gmra.mxu1 %v7128_v45  ;;  %3241 = vmatpush1.msra.mxu0 %v2114_v24  ;;  %v2241_v45 = vld [vmem:[#allocation9 + $0x1078] sm:$0xf]  ;;  %v2228_v24 = vld [vmem:[#allocation9 + $0x1010] sm:$0xff] }
 0x4f2   :  { %3712 = vmatprep.subr.mxu1 %v7130_v5  ;;  %3095 = vmatmul.mubr.f32.gmra.mxu0 %v5985_v2  ;;  %v3679_v2 = vld [vmem:[#allocation12 + $0xc0] sm:$0xff] }
 0x4f3   :  { %3242 = vmatprep.subr.mxu0 %v2109_v33  ;;  %3713 = vmatpush1.msra.mxu1 %v3656_v40  ;;  %v2223_v40 = vld [vmem:[#allocation9 + $0xfe8] sm:$0xff] }
 0x4f4   :  { %4362 = vmatprep.mubr.msk.f32.mxu1 %vm444_vm0, %v7131_v19  ;;  %3243 = vmatpush1.msra.mxu0 %v2108_v20  ;;  %v3676_v20 = vld [vmem:[#allocation12 + $0xa8] sm:$0xff]  ;;  %v7133_v19 = vld [vmem:[#allocation20_spill] sm:$0xff] }
 0x4f5   :  { %4306 = vmatprep.mubr.msk.f32.mxu0 %vm2266_vm8, %v6034_v8  ;;  %3714 = vmatprep.subr.mxu1 %v7130_v5  ;;  %v2229_v8 = vld [vmem:[#allocation9 + $0x1018] sm:$0xff] }
 0x4f6   :  { %3244 = vmatprep.subr.mxu0 %v2103_v13  ;;  %3715 = vmatpush1.msra.mxu1 %v3655_v44  ;;  %v6333_v13 = vpop.f32.mrf.mxu0  ;;  %v2222_v44 = vld [vmem:[#allocation9 + $0xfe0] sm:$0xff] }
 0x4f7   :  { %3245 = vmatpush1.msra.mxu0 %v2102_v12  ;;  %3730 = vmatprep.subr.mxu1 %v7130_v5  ;;  %v6336_v12 = vsub.s32 4, %v7133_v19 }
 0x4f8   :  { %4304 = vmatprep.subr.msk.mxu0 %vm2291_vm6, %v2241_v45  ;;  %3731 = vmatpush2.msra.mxu1 %v3679_v2  ;;  %v2217_v45 = vld [vmem:[#allocation9 + $0xfb8] sm:$0xff]  ;;  %v3675_v2 = vld [vmem:[#allocation12 + $0xa0] sm:$0xff]  ;;  %v6345_v19 = vpop.f32.mrf.mxu0 }
 0x4f9   :  { %4305 = vmatpush2.msk.msra.mxu0 %vm2291_vm6, %v2240_v21  ;;  %3732 = vmatprep.subr.mxu1 %v7130_v5 }
 0x4fa   :  { %3264 = vmatprep.subr.mxu0 %v2235_v29  ;;  %3733 = vmatpush2.msra.mxu1 %v3678_v35  ;;  %v6330_v33 = vpop.f32.mrf.mxu1  ;;  %v2216_v29 = vld [vmem:[#allocation9 + $0xfb0] sm:$0xff] }
 0x4fb   :  { %7132 = vst [vmem:[#allocation38_spill] sm:$0xff] %v6330_v33  ;;  %3265 = vmatpush2.msra.mxu0 %v2234_v39  ;;  %3734 = vmatprep.subr.mxu1 %v7130_v5  ;;  %v4846_v35 = vld [vmem:[#allocation13 + $0x8] sm:$0xff]  ;;  %v2199_v33 = vld [vmem:[#allocation9 + $0xf28] sm:$0xff] }
 0x4fc   :  { %3266 = vmatprep.subr.mxu0 %v2229_v8  ;;  %3735 = vmatpush2.msra.mxu1 %v3677_v14  ;;  %v6339_v21 = vpop.f32.mrf.mxu1  ;;  %v6342_v39 = vrot.slane %v4846_v35, %v6336_v12  ;;  %v2211_v8 = vld [vmem:[#allocation9 + $0xf88] sm:$0xff]  ;;  %v3674_v14 = vld [vmem:[#allocation12 + $0x98] sm:$0xff]  ;;  %v2204_v35 = vld [vmem:[#allocation9 + $0xf50] sm:$0xff] }
 0x4fd   :  { %3267 = vmatpush2.msra.mxu0 %v2228_v24  ;;  %3736 = vmatprep.subr.mxu1 %v7130_v5  ;;  %7134 = vst [vmem:[#allocation39_spill] sm:$0xff] %v6339_v21  ;;  %v2210_v24 = vld [vmem:[#allocation9 + $0xf80] sm:$0xff] }
 0x4fe   :  { %3268 = vmatprep.subr.mxu0 %v2223_v40  ;;  %3737 = vmatpush2.msra.mxu1 %v3676_v20  ;;  %v2205_v40 = vld [vmem:[#allocation9 + $0xf58] sm:$0xff]  ;;  %v3673_v20 = vld [vmem:[#allocation12 + $0x90] sm:$0xff] }
 0x4ff   :  { %3269 = vmatpush2.msra.mxu0 %v2222_v44  ;;  %3738 = vmatprep.subr.mxu1 %v7130_v5  ;;  %v2379_v44 = vadd.f32 %v6208_v59, %v6342_v39 }
 0x500   :  { %3270 = vmatprep.subr.mxu0 %v2217_v45  ;;  %3739 = vmatpush2.msra.mxu1 %v3675_v2  ;;  %v6348_v21 = vpop.f32.mrf.mxu1  ;;  %v3672_v45 = vld [vmem:[#allocation12 + $0x88] sm:$0xff]  ;;  %v6353_v2 = vpop.f32.mrf.mxu0 }
 0x501   :  { %3271 = vmatpush2.msra.mxu0 %v2216_v29  ;;  %3740 = vmatprep.subr.mxu1 %v7130_v5  ;;  %7135 = vst [vmem:[#allocation40_spill] sm:$0xff] %v6348_v21  ;;  %v2198_v29 = vld [vmem:[#allocation9 + $0xf20] sm:$0xff]  ;;  %v2492_v59 = vadd.f32 %v6216_v0, %v2379_v44  ;;  %v7137_v44 = vld [vmem:[#allocation23_spill] sm:$0xff] }
 0x502   :  { %3272 = vmatprep.subr.mxu0 %v2211_v8  ;;  %3741 = vmatpush2.msra.mxu1 %v3674_v14  ;;  %v3671_v21 = vld [vmem:[#allocation12 + $0x80] sm:$0xff]  ;;  %v6356_v8 = vpop.f32.mrf.mxu1  ;;  %v3598_v14 = vld [vmem:[#allocation10 + $0xf8] sm:$0xff] }
 0x503   :  { %3273 = vmatpush2.msra.mxu0 %v2210_v24  ;;  %3742 = vmatprep.subr.mxu1 %v7130_v5  ;;  %v6360_v24 = vpop.f32.mrf.mxu0 }
 0x504   :  { %3274 = vmatprep.subr.mxu0 %v2205_v40  ;;  %3743 = vmatpush2.msra.mxu1 %v3673_v20  ;;  %v3582_v40 = vld [vmem:[#allocation10 + $0x78] sm:$0xff] }
 0x505   :  { %3275 = vmatpush2.msra.mxu0 %v2204_v35  ;;  %3744 = vmatprep.subr.mxu1 %v7130_v5  ;;  %v3630_v20 = vld [vmem:[#allocation10 + $0x1f8] sm:$0xff]  ;;  %v7136_v35 = vld [vmem:[#allocation22_spill] sm:$0xff] }
 0x506   :  { %3276 = vmatprep.subr.mxu0 %v2199_v33  ;;  %3745 = vmatpush2.msra.mxu1 %v3672_v45  ;;  %v3597_v33 = vld [vmem:[#allocation10 + $0xf0] sm:$0xff]  ;;  %v6367_v45 = vadd.f32 %v6313_v62, %v2492_v59  ;;  %v6369_v0 = vpop.f32.mrf.mxu1  ;;  %v7138_v59 = vld [vmem:[#allocation24_spill] sm:$0xff] }
 0x507   :  { %3277 = vmatpush2.msra.mxu0 %v2198_v29  ;;  %3746 = vmatprep.subr.mxu1 %v7130_v5  ;;  %v3614_v29 = vld [vmem:[#allocation10 + $0x178] sm:$0xff] }
 0x508   :  { %3279 = vmatmul.mubr.f32.vlgmr.msra.gmra.mxu0 %v6046_v36  ;;  %3747 = vmatpush2.msra.mxu1 %v3671_v21  ;;  %v3581_v36 = vld [vmem:[#allocation10 + $0x70] sm:$0xff]  ;;  %v6373_v21 = vpop.f32.mrf.mxu0  ;;  %vm3328_vm11 = vcmp.gt.f32.partialorder %v6367_v45, 0.0 }
 0x509   :  { %4307 = vmatprep.mubr.msk.f32.mxu0 %vm2266_vm8, %v6056_v16  ;;  %3749 = vmatmul.mubr.f32.vlgmr.msra.gmra.mxu1 %v7136_v35  ;;  %v3596_v16 = vld [vmem:[#allocation10 + $0xe8] sm:$0xff] }
 0x50a   :  { %4363 = vmatprep.mubr.msk.f32.mxu1 %vm444_vm0, %v7137_v44  ;;  %4379 = vmatprep.subr.mxu0 %v3598_v14  ;;  %v4847_v35 = vld [vmem:[#allocation13] sm:$0xff]  ;;  %v3377_v14 = vmul.f32 1.442695, %v6367_v45  ;;  %v3629_v44 = vld [vmem:[#allocation10 + $0x1f0] sm:$0xff] }
 0x50b   :  { %4380 = vmatpush3.msra.mxu0 %v3582_v40  ;;  %4435 = vmatprep.subr.mxu1 %v3630_v20  ;;  %v6377_v62 = vrot.slane %v4847_v35, %v6336_v12  ;;  %v6383_v40 = vpop.f32.mrf.mxu1  ;;  %v7140_v20 = vld [vmem:[#allocation25_spill] sm:$0xff]  ;;  %v2385_v35 = vadd.f32 %v6214_v1, %v6342_v39 }
 0x50c   :  { %3285 = vmatmul.mubr.f32.gmra.mxu0 %v6069_v34  ;;  %4381 = vmatprep.subr.mxu0 %v3597_v33  ;;  %7139 = vst [vmem:[#allocation41_spill] sm:$0xff] %v6383_v40  ;;  %v3580_v34 = vld [vmem:[#allocation10 + $0x68] sm:$0xff]  ;;  %v6387_v33 = vpop.f32.mrf.mxu0  ;;  %4746 = vpow2.f32 %v3377_v14  ;;  %v3594_v14 = vld [vmem:[#allocation10 + $0xd8] sm:$0xff] }
 0x50d   :  { %4308 = vmatprep.mubr.msk.f32.mxu0 %vm2266_vm8, %v6073_v27  ;;  %3754 = vmatmul.mubr.f32.gmra.mxu1 %v7138_v59  ;;  %v3595_v27 = vld [vmem:[#allocation10 + $0xe0] sm:$0xff]  ;;  %v3613_v59 = vld [vmem:[#allocation10 + $0x170] sm:$0xff]  ;;  %v2377_v40 = vadd.f32 %v6206_v46, %v6377_v62  ;;  %v2498_v46 = vadd.f32 %v6227_v30, %v2385_v35 }
 0x50e   :  { %4364 = vmatprep.mubr.msk.f32.mxu1 %vm444_vm0, %v7140_v20  ;;  %4382 = vmatpush3.msra.mxu0 %v3581_v36  ;;  %v7141_v36 = vld [vmem:[#allocation26_spill] sm:$0xff]  ;;  %v7142_v20 = vld [vmem:[#allocation27_spill] sm:$0xff]  ;;  %v6401_v1 = vpop.f32.mrf.mxu0  ;;  %v3627_v30 = vld [vmem:[#allocation10 + $0x1e0] sm:$0xff] }
 0x50f   :  { %4383 = vmatprep.subr.mxu0 %v3596_v16  ;;  %4436 = vmatpush3.msra.mxu1 %v3614_v29  ;;  %v6397_v16 = vpop.f32.mrf.mxu1  ;;  %v3628_v29 = vld [vmem:[#allocation10 + $0x1e8] sm:$0xff]  ;;  %v7144_v35 = vld [vmem:[#allocation29_spill] sm:$0xff] }
 0x510   :  { %3291 = vmatmul.mubr.f32.gmra.mxu0 %v6084_v52  ;;  %4437 = vmatprep.subr.mxu1 %v3629_v44  ;;  %v3579_v52 = vld [vmem:[#allocation10 + $0x60] sm:$0xff]  ;;  %v3612_v44 = vld [vmem:[#allocation10 + $0x168] sm:$0xff] }
 0x511   :  { %4309 = vmatprep.mubr.msk.f32.mxu0 %vm2266_vm8, %v6093_v4  ;;  %3759 = vmatmul.mubr.f32.gmra.mxu1 %v7141_v36  ;;  %v2391_v4 = vadd.f32 %v6222_v15, %v6342_v39  ;;  %v2490_v36 = vadd.f32 %v6212_v7, %v2377_v40  ;;  %v6423_v15 = vpop.f32.mrf.mxu0  ;;  %v2397_v40 = vadd.f32 %v6237_v37, %v6342_v39 }
 0x512   :  { %4365 = vmatprep.mubr.msk.f32.mxu1 %vm444_vm0, %v7142_v20  ;;  %4384 = vmatpush3.msra.mxu0 %v3580_v34  ;;  %v2383_v34 = vadd.f32 %v6210_v6, %v6377_v62  ;;  %v3578_v6 = vld [vmem:[#allocation10 + $0x58] sm:$0xff]  ;;  %v3611_v20 = vld [vmem:[#allocation10 + $0x160] sm:$0xff] }
 0x513   :  { %4385 = vmatprep.subr.mxu0 %v3595_v27  ;;  %4438 = vmatpush3.msra.mxu1 %v3613_v59  ;;  %v7143_v27 = vld [vmem:[#allocation28_spill] sm:$0xff]  ;;  %v6413_v59 = vpop.f32.mrf.mxu1  ;;  %v6421_v7 = vadd.f32 %v6306_v38, %v2490_v36  ;;  %v2389_v38 = vadd.f32 %v6218_v26, %v6377_v62  ;;  %v2395_v26 = vadd.f32 %v6230_v3, %v6377_v62 }
 0x514   :  { %3297 = vmatmul.mubr.f32.gmra.mxu0 %v6100_v32  ;;  %4439 = vmatprep.subr.mxu1 %v3628_v29  ;;  %v6418_v32 = vadd.f32 %v6333_v13, %v2498_v46  ;;  %v3593_v29 = vld [vmem:[#allocation10 + $0xd0] sm:$0xff]  ;;  %v2496_v13 = vadd.f32 %v6220_v23, %v2383_v34  ;;  %v2510_v36 = vadd.f32 %v6258_v42, %v2397_v40  ;;  %v3610_v3 = vld [vmem:[#allocation10 + $0x158] sm:$0xff] }
 0x515   :  { %4310 = vmatprep.mubr.msk.f32.mxu0 %vm2266_vm8, %v6105_v48  ;;  %3764 = vmatmul.mubr.f32.gmra.mxu1 %v7143_v27  ;;  %v2504_v48 = vadd.f32 %v6243_v49, %v2391_v4  ;;  %v6435_v46 = vpop.f32.mrf.mxu1  ;;  %v3626_v49 = vld [vmem:[#allocation10 + $0x1d8] sm:$0xff]  ;;  %v7146_v4 = vld [vmem:[#allocation31_spill] sm:$0xff]  ;;  %v3375_v23 = vmul.f32 1.442695, %v6421_v7  ;;  %v2403_v34 = vadd.f32 %v6254_v43, %v6342_v39  ;;  %v2502_v27 = vadd.f32 %v6234_v31, %v2389_v38 }
 0x516   :  { %4366 = vmatprep.mubr.msk.f32.mxu1 %vm444_vm0, %v7144_v35  ;;  %4386 = vmatpush3.msra.mxu0 %v3579_v52  ;;  %v7145_v52 = vld [vmem:[#allocation30_spill] sm:$0xff]  ;;  %v6465_v31 = vadd.f32 %v6373_v21, %v2510_v36  ;;  %v2409_v38 = vadd.f32 %v6270_v56, %v6342_v39  ;;  %v3575_v21 = vld [vmem:[#allocation10 + $0x40] sm:$0xff]  ;;  %vm3334_vm12 = vcmp.gt.f32.partialorder %v6418_v32, 0.0 }
 0x517   :  { %4387 = vmatprep.subr.mxu0 %v3594_v14  ;;  %4440 = vmatpush3.msra.mxu1 %v3612_v44  ;;  %v6441_v37 = vadd.f32 %v6353_v2, %v2504_v48  ;;  %v3577_v14 = vld [vmem:[#allocation10 + $0x50] sm:$0xff]  ;;  %v6449_v44 = vpop.f32.mrf.mxu0  ;;  %v3592_v2 = vld [vmem:[#allocation10 + $0xc8] sm:$0xff]  ;;  %v6459_v35 = vpop.f32.mrf.mxu1  ;;  %v7148_v48 = vld [vmem:[#allocation33_spill] sm:$0xff] }
 0x518   :  { %3303 = vmatmul.mubr.f32.gmra.mxu0 %v6113_v25  ;;  %4441 = vmatprep.subr.mxu1 %v3627_v30  ;;  %v3389_v25 = vmul.f32 1.442695, %v6418_v32  ;;  %v3576_v30 = vld [vmem:[#allocation10 + $0x48] sm:$0xff]  ;;  %vm3346_vm15 = vcmp.gt.f32.partialorder %v6465_v31, 0.0 }
 0x519   :  { %4311 = vmatprep.mubr.msk.f32.mxu0 %vm2266_vm8, %v6118_v18  ;;  %3769 = vmatmul.mubr.f32.gmra.mxu1 %v7145_v52  ;;  %v6447_v18 = vadd.f32 %v6323_v61, %v2496_v13  ;;  %v7147_v61 = vld [vmem:[#allocation32_spill] sm:$0xff]  ;;  %v4747_v42 = vpop.eup %4746  ;;  %v3401_v43 = vmul.f32 1.442695, %v6441_v37  ;;  %v2516_v13 = vadd.f32 %v6275_v53, %v2403_v34  ;;  %v7149_v52 = vld [vmem:[#allocation42_spill] sm:$0xff]  ;;  %v3609_v53 = vld [vmem:[#allocation10 + $0x150] sm:$0xff]  ;;  %vm3340_vm13 = vcmp.gt.f32.partialorder %v6441_v37, 0.0 }
 0x51a   :  { %4367 = vmatprep.mubr.msk.f32.mxu1 %vm444_vm0, %v7146_v4  ;;  %4388 = vmatpush3.msra.mxu0 %v3578_v6  ;;  %v3625_v6 = vld [vmem:[#allocation10 + $0x1d0] sm:$0xff]  ;;  %4748 = vpow2.f32 %v3389_v25  ;;  %v4315_v4 = vadd.f32 -1.0, %v4747_v42  ;;  %v6483_v25 = vpop.f32.mrf.mxu1  ;;  %v7151_v56 = vld [vmem:[#allocation34_spill] sm:$0xff] }
 0x51b   :  { %4389 = vmatprep.subr.mxu0 %v3593_v29  ;;  %4442 = vmatpush3.msra.mxu1 %v3611_v20  ;;  %4750 = vpow2.f32 %v3375_v23  ;;  %v3387_v40 = vmul.f32 1.442695, %v6447_v18  ;;  %v6470_v29 = vadd.f32 %v6345_v19, %v2502_v27  ;;  %v6472_v20 = vpop.f32.mrf.mxu0  ;;  %v3574_v23 = vld [vmem:[#allocation10 + $0x38] sm:$0xff]  ;;  %v3624_v36 = vld [vmem:[#allocation10 + $0x1c8] sm:$0xff]  ;;  %v7152_v34 = vld [vmem:[#allocation35_spill] sm:$0xff]  ;;  %v2522_v27 = vadd.f32 %v6291_v17, %v2409_v38 }
 0x51c   :  { %3309 = vmatmul.mubr.f32.gmra.mxu0 %v6126_v54  ;;  %4443 = vmatprep.subr.mxu1 %v3626_v49  ;;  %v3591_v54 = vld [vmem:[#allocation10 + $0xc0] sm:$0xff]  ;;  %v3590_v49 = vld [vmem:[#allocation10 + $0xb8] sm:$0xff]  ;;  %4752 = vpow2.f32 %v3401_v43  ;;  %v6504_v17 = vpop.f32.mrf.mxu1  ;;  %v3572_v43 = vld [vmem:[#allocation10 + $0x28] sm:$0xff]  ;;  %vm3333_vm14 = vcmp.gt.f32.partialorder %v6447_v18, 0.0 }
 0x51d   :  { %4312 = vmatprep.mubr.msk.f32.mxu0 %vm2266_vm8, %v6131_v55  ;;  %3774 = vmatmul.mubr.f32.gmra.mxu1 %v7147_v61  ;;  %v2508_v55 = vadd.f32 %v6251_v28, %v2395_v26  ;;  %v2401_v28 = vadd.f32 %v6246_v9, %v6377_v62  ;;  %v7150_v26 = vld [vmem:[#allocation43_spill] sm:$0xff]  ;;  %v3413_v9 = vmul.f32 1.442695, %v6465_v31  ;;  %4754 = vpow2.f32 %v3387_v40 }
 0x51e   :  { %4390 = vmatpush3.msra.mxu0 %v3577_v14  ;;  %4368 = vmatprep.mubr.msk.f32.mxu1 %vm444_vm0, %v7148_v48  ;;  %v6490_v14 = vadd.f32 %v6401_v1, %v2516_v13  ;;  %v2415_v61 = vadd.f32 %v6285_v57, %v6342_v39  ;;  %v3588_v48 = vld [vmem:[#allocation10 + $0xa8] sm:$0xff]  ;;  %v7153_v57 = vld [vmem:[#allocation44_spill] sm:$0xff]  ;;  %v2413_v40 = vadd.f32 %v6278_v60, %v6377_v62  ;;  %v3607_v60 = vld [vmem:[#allocation10 + $0x140] sm:$0xff]  ;;  %vm3339_vm1 = vcmp.gt.f32.partialorder %v6470_v29, 0.0 }
 0x51f   :  { %4391 = vmatprep.subr.mxu0 %v3592_v2  ;;  %4444 = vmatpush3.msra.mxu1 %v3610_v3  ;;  %v6481_v19 = vadd.f32 %v6360_v24, %v2508_v55  ;;  %v3399_v24 = vmul.f32 1.442695, %v6470_v29  ;;  %v3589_v2 = vld [vmem:[#allocation10 + $0xb0] sm:$0xff]  ;;  %v2640_v3 = vpop.f32.mrf.mxu0  ;;  %v2514_v1 = vadd.f32 %v6267_v58, %v2401_v28  ;;  %4756 = vpow2.f32 %v3413_v9  ;;  %v7154_v13 = vld [vmem:[#allocation36_spill] sm:$0xff]  ;;  %v3623_v28 = vld [vmem:[#allocation10 + $0x1c0] sm:$0xff] }
 0x520   :  { %4392 = vmatpush3.msra.mxu0 %v3576_v30  ;;  %4445 = vmatprep.subr.mxu1 %v3625_v6  ;;  %v3573_v30 = vld [vmem:[#allocation10 + $0x30] sm:$0xff]  ;;  %v2407_v6 = vadd.f32 %v6261_v10, %v6377_v62  ;;  %v3425_v55 = vmul.f32 1.442695, %v6490_v14  ;;  %v6509_v58 = vadd.f32 %v6449_v44, %v2522_v27  ;;  %v3608_v10 = vld [vmem:[#allocation10 + $0x148] sm:$0xff]  ;;  %v2421_v44 = vadd.f32 %v6302_v47, %v6342_v39  ;;  %v3606_v47 = vld [vmem:[#allocation10 + $0x138] sm:$0xff] }
 0x521   :  { %3315 = vmatmul.mubr.f32.gmra.mxu0 %v7149_v52  ;;  %4393 = vmatprep.subr.mxu0 %v3591_v54  ;;  %v3411_v42 = vmul.f32 1.442695, %v6481_v19  ;;  %v3520_v54 = vsel %vm3328_vm11, %v6367_v45, %v4315_v4  ;;  %4758 = vpow2.f32 %v3399_v24  ;;  %v3587_v45 = vld [vmem:[#allocation10 + $0xa0] sm:$0xff]  ;;  %v6515_v38 = vadd.f32 %v6387_v33, %v2514_v1  ;;  %v3622_v33 = vld [vmem:[#allocation10 + $0x1b8] sm:$0xff]  ;;  %v3584_v1 = vld [vmem:[#allocation10 + $0x88] sm:$0xff] }
 0x522   :  { %4313 = vmatprep.mubr.msk.f32.mxu0 %vm2266_vm8, %v7150_v26  ;;  %3779 = vmatmul.mubr.f32.gmra.mxu1 %v7151_v56  ;;  %v2528_v52 = vadd.f32 %v6308_v11, %v2415_v61  ;;  %v2520_v4 = vadd.f32 %v6282_v51, %v2407_v6  ;;  %v6523_v26 = vpop.f32.mrf.mxu1  ;;  %v3570_v56 = vld [vmem:[#allocation10 + $0x18] sm:$0xff]  ;;  %v3437_v11 = vmul.f32 1.442695, %v6509_v58  ;;  %v2526_v9 = vadd.f32 %v6299_v50, %v2413_v40 }
 0x523   :  { %4394 = vmatpush3.msra.mxu0 %v3575_v21  ;;  %4369 = vmatprep.mubr.msk.f32.mxu1 %vm444_vm0, %v7152_v34  ;;  %v6517_v21 = vpop.f32.mrf.mxu0  ;;  %4760 = vpow2.f32 %v3411_v42  ;;  %v3423_v51 = vmul.f32 1.442695, %v6515_v38  ;;  %v2534_v61 = vadd.f32 %v6326_v22, %v2421_v44  ;;  %v2419_v50 = vadd.f32 %v6294_v63, %v6377_v62  ;;  %v3620_v42 = vld [vmem:[#allocation10 + $0x1a8] sm:$0xff] }
 0x524   :  { %4395 = vmatprep.subr.mxu0 %v3590_v49  ;;  %4446 = vmatpush3.msra.mxu1 %v3609_v53  ;;  %v3571_v49 = vld [vmem:[#allocation10 + $0x20] sm:$0xff]  ;;  %v3586_v53 = vld [vmem:[#allocation10 + $0x98] sm:$0xff]  ;;  %4762 = vpow2.f32 %v3425_v55  ;;  %v6531_v24 = vadd.f32 %v6423_v15, %v2520_v4  ;;  %v6537_v6 = vadd.f32 %v6472_v20, %v2526_v9  ;;  %v6539_v15 = vpop.f32.mrf.mxu1  ;;  %vm3327_vm0 = vcmp.gt.f32.partialorder %v6421_v7, 0.0 }
 0x525   :  { %4396 = vmatpush3.msra.mxu0 %v3574_v23  ;;  %4447 = vmatprep.subr.mxu1 %v3624_v36  ;;  %v6526_v23 = vadd.f32 %v2640_v3, %v2528_v52  ;;  %v3585_v36 = vld [vmem:[#allocation10 + $0x90] sm:$0xff]  ;;  %v2646_v34 = vpop.f32.mrf.mxu0  ;;  %4764 = vpow2.f32 %v3437_v11  ;;  %v3583_v55 = vld [vmem:[#allocation10 + $0x80] sm:$0xff]  ;;  %v2532_v44 = vadd.f32 %v6317_v41, %v2419_v50  ;;  %v3618_v4 = vld [vmem:[#allocation10 + $0x198] sm:$0xff]  ;;  %vm3345_vm2 = vcmp.gt.f32.partialorder %v6481_v19, 0.0 }
 0x526   :  { %3321 = vmatmul.mubr.f32.gmra.mxu0 %v7153_v57  ;;  %4397 = vmatprep.subr.mxu0 %v3589_v2  ;;  %v3621_v2 = vld [vmem:[#allocation10 + $0x1b0] sm:$0xff]  ;;  %v6542_v57 = vadd.f32 %v2646_v34, %v2534_v61  ;;  %4766 = vpow2.f32 %v3423_v51  ;;  %v3435_v20 = vmul.f32 1.442695, %v6531_v24  ;;  %v3603_v52 = vld [vmem:[#allocation10 + $0x120] sm:$0xff]  ;;  %v3602_v41 = vld [vmem:[#allocation10 + $0x118] sm:$0xff]  ;;  %vm3352_vm3 = vcmp.gt.f32.partialorder %v6490_v14, 0.0 }
 0x527   :  { %3784 = vmatmul.mubr.f32.gmra.mxu1 %v7154_v13  ;;  %4398 = vmatpush3.msra.mxu0 %v3573_v30  ;;  %v4749_v39 = vpop.eup %4748  ;;  %v3569_v3 = vld [vmem:[#allocation10 + $0x10] sm:$0xff]  ;;  %v3449_v22 = vmul.f32 1.442695, %v6526_v23  ;;  %v4848_v13 = vld [vmem:[#allocation13 + $0x10] sm:$0xff]  ;;  %v3600_v50 = vld [vmem:[#allocation10 + $0x108] sm:$0xff]  ;;  %vm3358_vm4 = vcmp.gt.f32.partialorder %v6509_v58, 0.0 }
 0x528   :  { %4399 = vmatprep.subr.mxu0 %v3588_v48  ;;  %3880 = vmatprep.mubr.f32.mxu0 %v3520_v54  ;;  %v4751_v27 = vpop.eup %4750  ;;  %v3605_v30 = vld [vmem:[#allocation10 + $0x130] sm:$0xff]  ;;  %v3568_v48 = vld [vmem:[#allocation10 + $0x8] sm:$0xff]  ;;  %v4321_v54 = vadd.f32 -1.0, %v4749_v39  ;;  %v6558_v39 = vadd.f32 %v6517_v21, %v2532_v44  ;;  %v6560_v34 = vld [vmem:[#allocation10 + $0x278] sm:$0xff]  ;;  %vm3351_vm5 = vcmp.gt.f32.partialorder %v6515_v38, 0.0  ;;  %vm3364_vm7 = vcmp.gt.f32.partialorder %v6526_v23, 0.0 }
 0x529   :  { %4400 = vmatpush3.msra.mxu0 %v3572_v43  ;;  %4448 = vmatpush3.msra.mxu1 %v3608_v10  ;;  %v3604_v43 = vld [vmem:[#allocation10 + $0x128] sm:$0xff]  ;;  %v4753_v63 = vpop.eup %4752  ;;  %v4314_v62 = vadd.f32 -1.0, %v4751_v27  ;;  %v3619_v10 = vld [vmem:[#allocation10 + $0x1a0] sm:$0xff]  ;;  %4768 = vpow2.f32 %v3449_v22  ;;  %v3617_v51 = vld [vmem:[#allocation10 + $0x190] sm:$0xff]  ;;  %vm3357_vm9 = vcmp.gt.f32.partialorder %v6531_v24, 0.0  ;;  %vm3363_vm10 = vcmp.gt.f32.partialorder %v6537_v6, 0.0 }
 0x52a   :  { %4401 = vmatprep.subr.mxu0 %v3587_v45  ;;  %4449 = vmatprep.subr.mxu1 %v3623_v28  ;;  %v4755_v40 = vpop.eup %4754  ;;  %v6546_v45 = vrot.slane %v4848_v13, %v6336_v12  ;;  %v3567_v28 = vld [vmem:[#allocation10] sm:$0xff]  ;;  %4770 = vpow2.f32 %v3435_v20  ;;  %v3616_v21 = vld [vmem:[#allocation10 + $0x188] sm:$0xff]  ;;  %v3459_v22 = vmul.f32 1.442695, %v6558_v39  ;;  %vm3370_vm11 = vcmp.gt.f32.partialorder %v6542_v57, 0.0 }
 0x52b   :  { %4402 = vmatpush3.msra.mxu0 %v3571_v49  ;;  %4450 = vmatpush3.msra.mxu1 %v3607_v60  ;;  %v3447_v49 = vmul.f32 1.442695, %v6537_v6  ;;  %v6552_v60 = vpop.f32.mrf.mxu1  ;;  %v4320_v9 = vadd.f32 -1.0, %v4755_v40  ;;  %v3599_v20 = vld [vmem:[#allocation10 + $0x100] sm:$0xff] }
 0x52c   :  { %4403 = vmatprep.subr.mxu0 %v3586_v53  ;;  %4451 = vmatprep.subr.mxu1 %v3622_v33  ;;  %v3526_v53 = vsel %vm3334_vm12, %v6418_v32, %v4321_v54  ;;  %v3461_v33 = vmul.f32 1.442695, %v6542_v57  ;;  %v4757_v11 = vpop.eup %4756  ;;  %v3601_v32 = vld [vmem:[#allocation10 + $0x110] sm:$0xff] }
 0x52d   :  { %4404 = vmatpush3.msra.mxu0 %v3570_v56  ;;  %4452 = vmatpush3.msra.mxu1 %v3606_v47  ;;  %v4327_v56 = vadd.f32 -1.0, %v4753_v63  ;;  %v3519_v47 = vsel %vm3327_vm0, %v6421_v7, %v4314_v62  ;;  %4772 = vpow2.f32 %v3447_v49  ;;  %v6566_v7 = vpop.f32.mrf.mxu1  ;;  %v3525_v54 = vsel %vm3333_vm14, %v6447_v18, %v4320_v9  ;;  %v3615_v62 = vld [vmem:[#allocation10 + $0x180] sm:$0xff] }
 0x52e   :  { %4405 = vmatprep.subr.mxu0 %v3585_v36  ;;  %4453 = vmatprep.subr.mxu1 %v3621_v2  ;;  %v4759_v36 = vpop.eup %4758  ;;  %v4849_v2 = vld [vmem:[#allocation13 + $0x18] sm:$0xff]  ;;  %4774 = vpow2.f32 %v3461_v33  ;;  %vm3369_vm0 = vcmp.gt.f32.partialorder %v6558_v39, 0.0 }
 0x52f   :  { %4406 = vmatpush3.msra.mxu0 %v3569_v3  ;;  %4454 = vmatpush3.msra.mxu1 %v3605_v30  ;;  %v6563_v27 = vrot.slane %v4849_v2, %v6336_v12  ;;  %v3532_v3 = vsel %vm3340_vm13, %v6441_v37, %v4327_v56  ;;  %v4333_v30 = vadd.f32 -1.0, %v4757_v11  ;;  %4776 = vpow2.f32 %v3459_v22 }
 0x530   :  { %4407 = vmatprep.subr.mxu0 %v3584_v1  ;;  %4455 = vmatprep.subr.mxu1 %v3620_v42  ;;  %v4761_v61 = vpop.eup %4760  ;;  %v7155_v42 = vld [vmem:[#allocation38_spill] sm:$0xff] }
 0x531   :  { %4408 = vmatpush3.msra.mxu0 %v3568_v48  ;;  %4456 = vmatpush3.msra.mxu1 %v3604_v43  ;;  %v4763_v1 = vpop.eup %4762  ;;  %v2716_v48 = vadd.f32 %v7155_v42, %v6546_v45  ;;  %v4326_v43 = vadd.f32 -1.0, %v4759_v36 }
 0x532   :  { %4409 = vmatprep.subr.mxu0 %v3583_v55  ;;  %4457 = vmatprep.subr.mxu1 %v3619_v10  ;;  %v6576_v55 = vld [vmem:[#allocation10 + $0x270] sm:$0xff]  ;;  %v4339_v44 = vadd.f32 -1.0, %v4763_v1 }
 0x533   :  { %4410 = vmatpush3.msra.mxu0 %v3567_v28  ;;  %4458 = vmatpush3.msra.mxu1 %v3603_v52  ;;  %v7156_v10 = vld [vmem:[#allocation39_spill] sm:$0xff]  ;;  %v3538_v28 = vsel %vm3346_vm15, %v6465_v31, %v4333_v30  ;;  %v4332_v52 = vadd.f32 -1.0, %v4761_v61  ;;  %v3531_v33 = vsel %vm3339_vm1, %v6470_v29, %v4326_v43  ;;  %v6592_v31 = vld [vmem:[#allocation10 + $0x260] sm:$0xff]  ;;  %v6606_v30 = vld [vmem:[#allocation10 + $0x258] sm:$0xff] }
 0x534   :  { %3881 = vmatmul.mubr.f32.vlgmr.msra.gmra.mxu0 %v3519_v47  ;;  %4459 = vmatprep.subr.mxu1 %v3618_v4  ;;  %v2718_v40 = vadd.f32 %v7156_v10, %v6563_v27  ;;  %v6584_v4 = vld [vmem:[#allocation10 + $0x268] sm:$0xff]  ;;  %v7157_v47 = vld [vmem:[#allocation40_spill] sm:$0xff] }
 0x535   :  { %3885 = vmatprep.mubr.f32.mxu0 %v3526_v53  ;;  %4460 = vmatpush3.msra.mxu1 %v3602_v41  ;;  %v4765_v53 = vpop.eup %4764  ;;  %v2722_v9 = vadd.f32 %v7157_v47, %v6546_v45  ;;  %v3537_v2 = vsel %vm3345_vm2, %v6481_v19, %v4332_v52  ;;  %v6623_v10 = vld [vmem:[#allocation10 + $0x248] sm:$0xff] }
 0x536   :  { %4461 = vmatprep.subr.mxu1 %v3617_v51  ;;  %4026 = vmatprep.subr.mxu0 %v7130_v5  ;;  %v4767_v11 = vpop.eup %4766  ;;  %v4345_v61 = vadd.f32 -1.0, %v4765_v53  ;;  %v6633_v53 = vld [vmem:[#allocation10 + $0x240] sm:$0xff] }
 0x537   :  { %v2941_v63 = vpop.f32.mrf.mxu1  ;;  %4462 = vmatpush3.msra.mxu1 %v3601_v32  ;;  %4027 = vmatpush1.msra.mxu0 %v6560_v34  ;;  %v2724_v32 = vadd.f32 %v6356_v8, %v6563_v27  ;;  %v4338_v1 = vadd.f32 -1.0, %v4767_v11 }
 0x538   :  { %3886 = vmatmul.mubr.f32.gmra.mxu0 %v3525_v54  ;;  %v2828_v37 = vpop.f32.mrf.mxu0  ;;  %4463 = vmatprep.subr.mxu1 %v3616_v21  ;;  %v3544_v21 = vsel %vm3352_vm3, %v6490_v14, %v4339_v44  ;;  %v6612_v14 = vld [vmem:[#allocation10 + $0x250] sm:$0xff] }
 0x539   :  { %3890 = vmatprep.mubr.f32.mxu0 %v3532_v3  ;;  %v2829_v13 = vadd.f32 %v2828_v37, %v2716_v48  ;;  %v2943_v18 = vpop.f32.mrf.mxu1  ;;  %4464 = vmatpush3.msra.mxu1 %v3600_v50  ;;  %v4769_v50 = vpop.eup %4768  ;;  %v3550_v37 = vsel %vm3358_vm4, %v6509_v58, %v4345_v61 }
 0x53a   :  { %v2830_v49 = vpop.f32.mrf.mxu0  ;;  %4465 = vmatprep.subr.mxu1 %v3615_v62  ;;  %4028 = vmatprep.subr.mxu0 %v7130_v5  ;;  %v4771_v8 = vpop.eup %4770  ;;  %v2728_v62 = vadd.f32 %v6369_v0, %v6546_v45  ;;  %v7158_v0 = vld [vmem:[#allocation41_spill] sm:$0xff] }
 0x53b   :  { %v6587_v56 = vadd.f32 %v2941_v63, %v2829_v13  ;;  %v2831_v41 = vadd.f32 %v2830_v49, %v2718_v40  ;;  %4466 = vmatpush3.msra.mxu1 %v3599_v20  ;;  %4029 = vmatpush1.msra.mxu0 %v6576_v55  ;;  %v4773_v63 = vpop.eup %4772  ;;  %v4351_v20 = vadd.f32 -1.0, %v4769_v50  ;;  %v3543_v13 = vsel %vm3351_vm5, %v6515_v38, %v4338_v1 }
 0x53c   :  { %3891 = vmatmul.mubr.f32.gmra.mxu0 %v3531_v33  ;;  %4030 = vmatprep.subr.mxu0 %v7130_v5  ;;  %v4775_v40 = vpop.eup %4774  ;;  %v2730_v49 = vadd.f32 %v7158_v0, %v6563_v27  ;;  %v4350_v47 = vadd.f32 -1.0, %v4773_v63 }
 0x53d   :  { %3895 = vmatprep.mubr.f32.mxu0 %v3538_v28  ;;  %v3379_v29 = vmul.f32 1.442695, %v6587_v56  ;;  %v6598_v51 = vadd.f32 %v2943_v18, %v2831_v41  ;;  %v2947_v36 = vpop.f32.mrf.mxu1  ;;  %4031 = vmatpush1.msra.mxu0 %v6584_v4  ;;  %v4344_v18 = vadd.f32 -1.0, %v4771_v8  ;;  %v3556_v11 = vsel %vm3364_vm7, %v6526_v23, %v4351_v20  ;;  %v4777_v61 = vpop.eup %4776  ;;  %v6649_v23 = vld [vmem:[#allocation10 + $0x230] sm:$0xff] }
 0x53e   :  { %v2834_v3 = vpop.f32.mrf.mxu0  ;;  %4032 = vmatprep.subr.mxu0 %v7130_v5  ;;  %4491 = vmatprep.subr.mxu1 %v7130_v5  ;;  %vm3329_vm12 = vcmp.gt.f32.partialorder %v6587_v56, 0.0 }
 0x53f   :  { %4778 = vpow2.f32 %v3379_v29  ;;  %v3381_v42 = vmul.f32 1.442695, %v6598_v51  ;;  %v2835_v48 = vadd.f32 %v2834_v3, %v2722_v9  ;;  %v2949_v22 = vpop.f32.mrf.mxu1  ;;  %4033 = vmatpush1.msra.mxu0 %v6592_v31  ;;  %v4357_v9 = vadd.f32 -1.0, %v4775_v40 }
 0x540   :  { %3896 = vmatmul.mubr.f32.gmra.mxu0 %v3537_v2  ;;  %v2836_v19 = vpop.f32.mrf.mxu0  ;;  %4034 = vmatprep.subr.mxu0 %v7130_v5  ;;  %v2734_v3 = vadd.f32 %v6397_v16, %v6546_v45  ;;  %v6663_v16 = vld [vmem:[#allocation10 + $0x228] sm:$0xff]  ;;  %vm3330_vm13 = vcmp.gt.f32.partialorder %v6598_v51, 0.0 }
 0x541   :  { %3900 = vmatprep.mubr.f32.mxu0 %v3544_v21  ;;  %4780 = vpow2.f32 %v3381_v42  ;;  %v6615_v54 = vadd.f32 %v2947_v36, %v2835_v48  ;;  %v2837_v43 = vadd.f32 %v2836_v19, %v2724_v32  ;;  %4035 = vmatpush1.msra.mxu0 %v6606_v30  ;;  %v6641_v36 = vld [vmem:[#allocation10 + $0x238] sm:$0xff]  ;;  %v3549_v32 = vsel %vm3357_vm9, %v6531_v24, %v4344_v18 }
 0x542   :  { %4036 = vmatprep.subr.mxu0 %v7130_v5  ;;  %v2736_v42 = vadd.f32 %v6413_v59, %v6563_v27  ;;  %v3555_v48 = vsel %vm3363_vm10, %v6537_v6, %v4350_v47  ;;  %v4356_v19 = vadd.f32 -1.0, %v4777_v61  ;;  %v6668_v6 = vld [vmem:[#allocation10 + $0x220] sm:$0xff] }
 0x543   :  { %v3391_v28 = vmul.f32 1.442695, %v6615_v54  ;;  %v6627_v52 = vadd.f32 %v2949_v22, %v2837_v43  ;;  %v2953_v44 = vpop.f32.mrf.mxu1  ;;  %4037 = vmatpush1.msra.mxu0 %v6612_v14  ;;  %v3562_v22 = vsel %vm3370_vm11, %v6542_v57, %v4357_v9  ;;  %vm3335_vm15 = vcmp.gt.f32.partialorder %v6615_v54, 0.0 }
 0x544   :  { %3901 = vmatmul.mubr.f32.gmra.mxu0 %v3543_v13  ;;  %v2840_v58 = vpop.f32.mrf.mxu0  ;;  %4038 = vmatprep.subr.mxu0 %v7130_v5  ;;  %v2740_v13 = vadd.f32 %v6435_v46, %v6546_v45 }
 0x545   :  { %3905 = vmatprep.mubr.f32.mxu0 %v3550_v37  ;;  %4782 = vpow2.f32 %v3391_v28  ;;  %v3393_v38 = vmul.f32 1.442695, %v6627_v52  ;;  %v2841_v33 = vadd.f32 %v2840_v58, %v2728_v62  ;;  %v2955_v41 = vpop.f32.mrf.mxu1  ;;  %4039 = vmatpush1.msra.mxu0 %v6623_v10  ;;  %v6677_v28 = vld [vmem:[#allocation10 + $0x218] sm:$0xff]  ;;  %vm3336_vm14 = vcmp.gt.f32.partialorder %v6627_v52, 0.0 }
 0x546   :  { %v2842_v29 = vpop.f32.mrf.mxu0  ;;  %4040 = vmatprep.subr.mxu0 %v7130_v5 }
 0x547   :  { %4784 = vpow2.f32 %v3393_v38  ;;  %v6644_v2 = vadd.f32 %v2953_v44, %v2841_v33  ;;  %v2843_v21 = vadd.f32 %v2842_v29, %v2730_v49  ;;  %4041 = vmatpush1.msra.mxu0 %v6633_v53  ;;  %v3561_v44 = vsel %vm3369_vm0, %v6558_v39, %v4356_v19  ;;  %v6689_v39 = vld [vmem:[#allocation10 + $0x210] sm:$0xff] }
 0x548   :  { %3906 = vmatmul.mubr.f32.gmra.mxu0 %v3549_v32  ;;  %4042 = vmatprep.subr.mxu0 %v7130_v5  ;;  %v2742_v33 = vadd.f32 %v6459_v35, %v6563_v27  ;;  %v2748_v19 = vadd.f32 %v6504_v17, %v6563_v27 }
 0x549   :  { %3910 = vmatprep.mubr.f32.mxu0 %v3556_v11  ;;  %v3403_v24 = vmul.f32 1.442695, %v6644_v2  ;;  %v6655_v50 = vadd.f32 %v2955_v41, %v2843_v21  ;;  %v2959_v1 = vpop.f32.mrf.mxu1  ;;  %4043 = vmatpush1.msra.mxu0 %v6641_v36  ;;  %v6696_v21 = vld [vmem:[#allocation10 + $0x208] sm:$0xff]  ;;  %vm3341_vm2 = vcmp.gt.f32.partialorder %v6644_v2, 0.0 }
 0x54a   :  { %v2846_v8 = vpop.f32.mrf.mxu0  ;;  %4044 = vmatprep.subr.mxu0 %v7130_v5 }
 0x54b   :  { %4786 = vpow2.f32 %v3403_v24  ;;  %v3405_v43 = vmul.f32 1.442695, %v6655_v50  ;;  %v2847_v63 = vadd.f32 %v2846_v8, %v2734_v3  ;;  %v2961_v62 = vpop.f32.mrf.mxu1  ;;  %4045 = vmatpush1.msra.mxu0 %v6649_v23  ;;  %vm3342_vm1 = vcmp.gt.f32.partialorder %v6655_v50, 0.0 }
 0x54c   :  { %v4779_v37 = vpop.eup %4778  ;;  %3911 = vmatmul.mubr.f32.gmra.mxu0 %v3555_v48  ;;  %v2848_v59 = vpop.f32.mrf.mxu0  ;;  %4046 = vmatprep.subr.mxu0 %v7130_v5 }
 0x54d   :  { %3915 = vmatprep.mubr.f32.mxu0 %v3562_v22  ;;  %4788 = vpow2.f32 %v3405_v43  ;;  %v6670_v57 = vadd.f32 %v2959_v1, %v2847_v63  ;;  %v2849_v20 = vadd.f32 %v2848_v59, %v2736_v42  ;;  %4047 = vmatpush1.msra.mxu0 %v6663_v16  ;;  %v4316_v18 = vadd.f32 -1.0, %v4779_v37 }
 0x54e   :  { %v4781_v40 = vpop.eup %4780  ;;  %4048 = vmatprep.subr.mxu0 %v7130_v5  ;;  %v2746_v1 = vadd.f32 %v6483_v25, %v6546_v45  ;;  %v6718_v25 = vld [vmem:[#allocation10 + $0x2b8] sm:$0xf] }
 0x54f   :  { %v3415_v0 = vmul.f32 1.442695, %v6670_v57  ;;  %v6681_v49 = vadd.f32 %v2961_v62, %v2849_v20  ;;  %v2965_v58 = vpop.f32.mrf.mxu1  ;;  %v4317_v38 = vadd.f32 -1.0, %v4781_v40  ;;  %4049 = vmatpush1.msra.mxu0 %v6668_v6  ;;  %v3521_v29 = vsel %vm3329_vm12, %v6587_v56, %v4316_v18  ;;  %v6703_v56 = vld [vmem:[#allocation10 + $0x200] sm:$0xff] }
 0x550   :  { %3916 = vmatmul.mubr.f32.gmra.mxu0 %v3561_v44  ;;  %v2852_v46 = vpop.f32.mrf.mxu0  ;;  %4050 = vmatprep.subr.mxu0 %v7130_v5  ;;  %v6734_v44 = vld [vmem:[#allocation10 + $0x2a8] sm:$0xff]  ;;  %vm3347_vm4 = vcmp.gt.f32.partialorder %v6670_v57, 0.0 }
 0x551   :  { %4790 = vpow2.f32 %v3415_v0  ;;  %v3417_v41 = vmul.f32 1.442695, %v6681_v49  ;;  %v2853_v11 = vadd.f32 %v2852_v46, %v2740_v13  ;;  %v2967_v47 = vpop.f32.mrf.mxu1  ;;  %v3522_v9 = vsel %vm3330_vm13, %v6598_v51, %v4317_v38  ;;  %4051 = vmatpush1.msra.mxu0 %v6677_v28 }
 0x552   :  { %v4783_v35 = vpop.eup %4782  ;;  %v2854_v32 = vpop.f32.mrf.mxu0  ;;  %3985 = vmatprep.mubr.f32.mxu1 %v3522_v9  ;;  %4052 = vmatprep.subr.mxu0 %v7130_v5  ;;  %vm3348_vm3 = vcmp.gt.f32.partialorder %v6681_v49, 0.0 }
 0x553   :  { %4792 = vpow2.f32 %v3417_v41  ;;  %v6698_v61 = vadd.f32 %v2965_v58, %v2853_v11  ;;  %v2855_v3 = vadd.f32 %v2854_v32, %v2742_v33  ;;  %3986 = vmatmul.mubr.f32.vlgmr.msra.gmra.mxu1 %v3521_v29  ;;  %4053 = vmatpush1.msra.mxu0 %v6689_v39  ;;  %v4322_v51 = vadd.f32 -1.0, %v4783_v35 }
 0x554   :  { %v4785_v24 = vpop.eup %4784  ;;  %4054 = vmatprep.subr.mxu0 %v7130_v5  ;;  %4515 = vmatpush1.msra.mxu1 %v6560_v34 }
 0x555   :  { %v3427_v42 = vmul.f32 1.442695, %v6698_v61  ;;  %v6708_v48 = vadd.f32 %v2967_v47, %v2855_v3  ;;  %v2971_v22 = vpop.f32.mrf.mxu1  ;;  %v4323_v8 = vadd.f32 -1.0, %v4785_v24  ;;  %4055 = vmatpush1.msra.mxu0 %v6696_v21  ;;  %4492 = vmatprep.subr.mxu1 %v7130_v5  ;;  %v3527_v20 = vsel %vm3335_vm15, %v6615_v54, %v4322_v51  ;;  %v6762_v24 = vld [vmem:[#allocation10 + $0x298] sm:$0xff] }
 0x556   :  { %v2858_v43 = vpop.f32.mrf.mxu0  ;;  %4056 = vmatprep.subr.mxu0 %v7130_v5  ;;  %4516 = vmatpush1.msra.mxu1 %v6576_v55  ;;  %v6726_v55 = vld [vmem:[#allocation10 + $0x2b0] sm:$0xff]  ;;  %v2752_v54 = vadd.f32 %v6523_v26, %v6546_v45  ;;  %vm3353_vm7 = vcmp.gt.f32.partialorder %v6698_v61, 0.0 }
 0x557   :  { %4794 = vpow2.f32 %v3427_v42  ;;  %v3429_v34 = vmul.f32 1.442695, %v6708_v48  ;;  %v2859_v63 = vadd.f32 %v2858_v43, %v2746_v1  ;;  %v2973_v62 = vpop.f32.mrf.mxu1  ;;  %v3528_v37 = vsel %vm3336_vm14, %v6627_v52, %v4323_v8  ;;  %4057 = vmatpush1.msra.mxu0 %v6703_v56  ;;  %4493 = vmatprep.subr.mxu1 %v7130_v5 }
 0x558   :  { %v4787_v17 = vpop.eup %4786  ;;  %v2860_v59 = vpop.f32.mrf.mxu0  ;;  %3990 = vmatprep.mubr.f32.mxu1 %v3528_v37  ;;  %4074 = vmatprep.subr.mxu0 %v7130_v5  ;;  %v2760_v42 = vadd.f32 %v6566_v7, %v6563_v27  ;;  %vm3354_vm5 = vcmp.gt.f32.partialorder %v6708_v48, 0.0 }
 0x559   :  { %4796 = vpow2.f32 %v3429_v34  ;;  %v6728_v40 = vadd.f32 %v2971_v22, %v2859_v63  ;;  %v2861_v13 = vadd.f32 %v2860_v59, %v2748_v19  ;;  %3991 = vmatmul.mubr.f32.gmra.mxu1 %v3527_v20  ;;  %4370 = vmatpush2.msk.msra.mxu0 %vm2291_vm6, %v6718_v25  ;;  %v4328_v18 = vadd.f32 -1.0, %v4787_v17  ;;  %v6792_v17 = vld [vmem:[#allocation10 + $0x280] sm:$0xff] }
 0x55a   :  { %v4789_v52 = vpop.eup %4788  ;;  %4517 = vmatpush1.msra.mxu1 %v6584_v4  ;;  %4076 = vmatprep.subr.mxu0 %v7130_v5  ;;  %v2754_v4 = vadd.f32 %v6539_v15, %v6563_v27 }
 0x55b   :  { %v3439_v0 = vmul.f32 1.442695, %v6728_v40  ;;  %v6739_v58 = vadd.f32 %v2973_v62, %v2861_v13  ;;  %v2977_v38 = vpop.f32.mrf.mxu1  ;;  %v4329_v33 = vadd.f32 -1.0, %v4789_v52  ;;  %4494 = vmatprep.subr.mxu1 %v7130_v5  ;;  %4077 = vmatpush2.msra.mxu0 %v6726_v55  ;;  %v3533_v35 = vsel %vm3341_vm2, %v6644_v2, %v4328_v18 }
 0x55c   :  { %v2864_v46 = vpop.f32.mrf.mxu0  ;;  %4518 = vmatpush1.msra.mxu1 %v6592_v31  ;;  %4078 = vmatprep.subr.mxu0 %v7130_v5  ;;  %v6755_v31 = vld [vmem:[#allocation10 + $0x2a0] sm:$0xff]  ;;  %vm3359_vm10 = vcmp.gt.f32.partialorder %v6728_v40, 0.0 }
 0x55d   :  { %4798 = vpow2.f32 %v3439_v0  ;;  %v3441_v26 = vmul.f32 1.442695, %v6739_v58  ;;  %v2865_v41 = vadd.f32 %v2864_v46, %v2752_v54  ;;  %v3534_v11 = vsel %vm3342_vm1, %v6655_v50, %v4329_v33  ;;  %4495 = vmatprep.subr.mxu1 %v7130_v5  ;;  %4079 = vmatpush2.msra.mxu0 %v6734_v44  ;;  %v2979_v47 = vpop.f32.mrf.mxu1 }
 0x55e   :  { %v4791_v15 = vpop.eup %4790  ;;  %v2866_v9 = vpop.f32.mrf.mxu0  ;;  %3995 = vmatprep.mubr.f32.mxu1 %v3534_v11  ;;  %4519 = vmatpush1.msra.mxu1 %v6606_v30  ;;  %v2758_v30 = vadd.f32 %v6552_v60, %v6546_v45  ;;  %v6777_v45 = vld [vmem:[#allocation10 + $0x290] sm:$0xff]  ;;  %vm3360_vm9 = vcmp.gt.f32.partialorder %v6739_v58, 0.0 }
 0x55f   :  { %4800 = vpow2.f32 %v3441_v26  ;;  %v6757_v29 = vadd.f32 %v2977_v38, %v2865_v41  ;;  %v2867_v32 = vadd.f32 %v2866_v9, %v2754_v4  ;;  %3996 = vmatmul.mubr.f32.gmra.mxu1 %v3533_v35  ;;  %4496 = vmatprep.subr.mxu1 %v7130_v5  ;;  %v4334_v3 = vadd.f32 -1.0, %v4791_v15 }
 0x560   :  { %v4793_v50 = vpop.eup %4792  ;;  %4080 = vmatprep.subr.mxu0 %v7130_v5  ;;  %4520 = vmatpush1.msra.mxu1 %v6612_v14 }
 0x561   :  { %v3451_v2 = vmul.f32 1.442695, %v6757_v29  ;;  %v6767_v51 = vadd.f32 %v2979_v47, %v2867_v32  ;;  %v4335_v1 = vadd.f32 -1.0, %v4793_v50  ;;  %4081 = vmatpush2.msra.mxu0 %v6755_v31  ;;  %4497 = vmatprep.subr.mxu1 %v7130_v5  ;;  %v2983_v22 = vpop.f32.mrf.mxu1  ;;  %v3539_v43 = vsel %vm3347_vm4, %v6670_v57, %v4334_v3 }
 0x562   :  { %v2870_v8 = vpop.f32.mrf.mxu0  ;;  %4082 = vmatprep.subr.mxu0 %v7130_v5  ;;  %4521 = vmatpush1.msra.mxu1 %v6623_v10  ;;  %v6785_v10 = vld [vmem:[#allocation10 + $0x288] sm:$0xff]  ;;  %vm3365_vm0 = vcmp.gt.f32.partialorder %v6757_v29, 0.0 }
 0x563   :  { %4802 = vpow2.f32 %v3451_v2  ;;  %v3453_v60 = vmul.f32 1.442695, %v6767_v51  ;;  %v2871_v14 = vadd.f32 %v2870_v8, %v2758_v30  ;;  %v3540_v19 = vsel %vm3348_vm3, %v6681_v49, %v4335_v1  ;;  %4083 = vmatpush2.msra.mxu0 %v6762_v24  ;;  %4498 = vmatprep.subr.mxu1 %v7130_v5  ;;  %v2985_v62 = vpop.f32.mrf.mxu1 }
 0x564   :  { %v4795_v27 = vpop.eup %4794  ;;  %v2872_v7 = vpop.f32.mrf.mxu0  ;;  %4000 = vmatprep.mubr.f32.mxu1 %v3540_v19  ;;  %4084 = vmatprep.subr.mxu0 %v7130_v5  ;;  %vm3366_vm11 = vcmp.gt.f32.partialorder %v6767_v51, 0.0 }
 0x565   :  { %4804 = vpow2.f32 %v3453_v60  ;;  %v6787_v34 = vadd.f32 %v2983_v22, %v2871_v14  ;;  %v2873_v63 = vadd.f32 %v2872_v7, %v2760_v42  ;;  %4001 = vmatmul.mubr.f32.gmra.mxu1 %v3539_v43  ;;  %4085 = vmatpush2.msra.mxu0 %v6777_v45  ;;  %v4340_v37 = vadd.f32 -1.0, %v4795_v27  ;;  %v4850_v14 = vld [vmem:[#allocation13 + $0x20] sm:$0xff]  ;;  %v4851_v7 = vld [vmem:[#allocation13 + $0x28] sm:$0xff] }
 0x566   :  { %v4797_v49 = vpop.eup %4796  ;;  %4522 = vmatpush1.msra.mxu1 %v6633_v53  ;;  %4086 = vmatprep.subr.mxu0 %v7130_v5  ;;  %v6870_v19 = vrot.slane %v4850_v14, %v6336_v12  ;;  %v6875_v43 = vrot.slane %v4851_v7, %v6336_v12 }
 0x567   :  { %v3463_v57 = vmul.f32 1.442695, %v6787_v34  ;;  %v2986_v59 = vadd.f32 %v2985_v62, %v2873_v63  ;;  %v4341_v20 = vadd.f32 -1.0, %v4797_v49  ;;  %4499 = vmatprep.subr.mxu1 %v7130_v5  ;;  %4087 = vmatpush2.msra.mxu0 %v6785_v10  ;;  %v3545_v18 = vsel %vm3353_vm7, %v6698_v61, %v4340_v37 }
 0x568   :  { %4523 = vmatpush1.msra.mxu1 %v6641_v36  ;;  %4088 = vmatprep.subr.mxu0 %v7130_v5  ;;  %vm3371_vm13 = vcmp.gt.f32.partialorder %v6787_v34, 0.0 }
 0x569   :  { %4806 = vpow2.f32 %v3463_v57  ;;  %v3465_v53 = vmul.f32 1.442695, %v2986_v59  ;;  %v3546_v13 = vsel %vm3354_vm5, %v6708_v48, %v4341_v20  ;;  %4500 = vmatprep.subr.mxu1 %v7130_v5  ;;  %4089 = vmatpush2.msra.mxu0 %v6792_v17  ;;  %vm3372_vm12 = vcmp.gt.f32.partialorder %v2986_v59, 0.0 }
 0x56a   :  { %v4799_v52 = vpop.eup %4798  ;;  %4005 = vmatprep.mubr.f32.mxu1 %v3546_v13  ;;  %4524 = vmatpush1.msra.mxu1 %v6649_v23 }
 0x56b   :  { %4808 = vpow2.f32 %v3465_v53  ;;  %4006 = vmatmul.mubr.f32.gmra.mxu1 %v3545_v18  ;;  %4501 = vmatprep.subr.mxu1 %v7130_v5  ;;  %v4346_v54 = vadd.f32 -1.0, %v4799_v52 }
 0x56c   :  { %v4801_v36 = vpop.eup %4800  ;;  %4525 = vmatpush1.msra.mxu1 %v6663_v16 }
 0x56d   :  { %v4347_v48 = vadd.f32 -1.0, %v4801_v36  ;;  %4502 = vmatprep.subr.mxu1 %v7130_v5  ;;  %v3551_v61 = vsel %vm3359_vm10, %v6728_v40, %v4346_v54 }
 0x56e   :  { %4526 = vmatpush1.msra.mxu1 %v6668_v6 }
 0x56f   :  { %v3552_v0 = vsel %vm3360_vm9, %v6739_v58, %v4347_v48  ;;  %4503 = vmatprep.subr.mxu1 %v7130_v5 }
 0x570   :  { %v4803_v23 = vpop.eup %4802  ;;  %4010 = vmatprep.mubr.f32.mxu1 %v3552_v0  ;;  %4527 = vmatpush1.msra.mxu1 %v6677_v28 }
 0x571   :  { %4011 = vmatmul.mubr.f32.gmra.mxu1 %v3551_v61  ;;  %4504 = vmatprep.subr.mxu1 %v7130_v5  ;;  %v4352_v38 = vadd.f32 -1.0, %v4803_v23 }
 0x572   :  { %v4805_v16 = vpop.eup %4804  ;;  %4528 = vmatpush1.msra.mxu1 %v6689_v39 }
 0x573   :  { %v4353_v6 = vadd.f32 -1.0, %v4805_v16  ;;  %4505 = vmatprep.subr.mxu1 %v7130_v5  ;;  %v3557_v40 = vsel %vm3365_vm0, %v6757_v29, %v4352_v38 }
 0x574   :  { %4529 = vmatpush1.msra.mxu1 %v6696_v21 }
 0x575   :  { %v3558_v58 = vsel %vm3366_vm11, %v6767_v51, %v4353_v6  ;;  %4506 = vmatprep.subr.mxu1 %v7130_v5 }
 0x576   :  { %v4807_v28 = vpop.eup %4806  ;;  %4015 = vmatprep.mubr.f32.mxu1 %v3558_v58  ;;  %4530 = vmatpush1.msra.mxu1 %v6703_v56 }
 0x577   :  { %4016 = vmatmul.mubr.f32.gmra.mxu1 %v3557_v40  ;;  %4507 = vmatprep.subr.mxu1 %v7130_v5  ;;  %v4358_v33 = vadd.f32 -1.0, %v4807_v28 }
 0x578   :  { %v4809_v39 = vpop.eup %4808  ;;  %4531 = vmatpush2.msk.msra.mxu1 %vm2291_vm6, %v6718_v25 }
 0x579   :  { %v4359_v21 = vadd.f32 -1.0, %v4809_v39  ;;  %4508 = vmatprep.subr.mxu1 %v7130_v5  ;;  %v3563_v56 = vsel %vm3371_vm13, %v6787_v34, %v4358_v33 }
 0x57a   :  { %4532 = vmatpush2.msra.mxu1 %v6726_v55 }
 0x57b   :  { %v3564_v4 = vsel %vm3372_vm12, %v2986_v59, %v4359_v21  ;;  %4509 = vmatprep.subr.mxu1 %v7130_v5 }
 0x57c   :  { %4020 = vmatprep.mubr.f32.mxu1 %v3564_v4  ;;  %4533 = vmatpush2.msra.mxu1 %v6734_v44 }
 0x57d   :  { %4021 = vmatmul.mubr.f32.gmra.mxu1 %v3563_v56  ;;  %4510 = vmatprep.subr.mxu1 %v7130_v5 }
 0x57e   :  { %4534 = vmatpush2.msra.mxu1 %v6755_v31 }
 0x57f   :  { %4511 = vmatprep.subr.mxu1 %v7130_v5 }
 0x580   :  { %4535 = vmatpush2.msra.mxu1 %v6762_v24 }
 0x581   :  { %4512 = vmatprep.subr.mxu1 %v7130_v5 }
 0x582   :  { %4536 = vmatpush2.msra.mxu1 %v6777_v45 }
 0x583   :  { %4513 = vmatprep.subr.mxu1 %v7130_v5 }
 0x584   :  { %4537 = vmatpush2.msra.mxu1 %v6785_v10 }
 0x585   :  { %4514 = vmatprep.subr.mxu1 %v7130_v5 }
 0x586   :  { %4538 = vmatpush2.msra.mxu1 %v6792_v17 }
 0x587   :  { %v3167_v55 = vpop.f32.mrf.mxu1 }
 0x588   :  { %v3054_v25 = vpop.f32.mrf.mxu0 }
 0x589   :  { %v3169_v46 = vpop.f32.mrf.mxu1  ;;  %v3055_v34 = vadd.f32 %v3054_v25, %v6870_v19 }
 0x58a   :  { %v3056_v44 = vpop.f32.mrf.mxu0 }
 0x58b   :  { %v3057_v49 = vadd.f32 %v3056_v44, %v6875_v43  ;;  %v3168_v57 = vadd.f32 %v3167_v55, %v3055_v34 }
 0x58d   :  { %v3173_v41 = vpop.f32.mrf.mxu1  ;;  %v3170_v13 = vadd.f32 %v3169_v46, %v3057_v49 }
 0x58e   :  { %v3060_v26 = vpop.f32.mrf.mxu0 }
 0x58f   :  { %v3175_v15 = vpop.f32.mrf.mxu1  ;;  %v3061_v37 = vadd.f32 %v3060_v26, %v6870_v19 }
 0x590   :  { %v3062_v11 = vpop.f32.mrf.mxu0 }
 0x591   :  { %v3063_v20 = vadd.f32 %v3062_v11, %v6875_v43  ;;  %v3174_v0 = vadd.f32 %v3173_v41, %v3061_v37 }
 0x593   :  { %v3179_v9 = vpop.f32.mrf.mxu1  ;;  %v3176_v58 = vadd.f32 %v3175_v15, %v3063_v20 }
 0x594   :  { %v3066_v47 = vpop.f32.mrf.mxu0 }
 0x595   :  { %v3181_v31 = vpop.f32.mrf.mxu1  ;;  %v3067_v52 = vadd.f32 %v3066_v47, %v6870_v19 }
 0x596   :  { %v3068_v35 = vpop.f32.mrf.mxu0 }
 0x597   :  { %v3069_v23 = vadd.f32 %v3068_v35, %v6875_v43  ;;  %v3180_v40 = vadd.f32 %v3179_v9, %v3067_v52 }
 0x599   :  { %v6845_v32 = vpop.f32.mrf.mxu1  ;;  %v3182_v25 = vadd.f32 %v3181_v31, %v3069_v23 }
 0x59a   :  { %v3072_v29 = vpop.f32.mrf.mxu0 }
 0x59b   :  { %v6847_v3 = vpop.f32.mrf.mxu1  ;;  %v3073_v39 = vadd.f32 %v3072_v29, %v6870_v19 }
 0x59c   :  { %v3074_v50 = vpop.f32.mrf.mxu0 }
 0x59d   :  { %v3075_v55 = vadd.f32 %v3074_v50, %v6875_v43  ;;  %v3186_v35 = vadd.f32 %v6845_v32, %v3073_v39 }
 0x59f   :  { %v6849_v24 = vpop.f32.mrf.mxu1  ;;  %v3188_v7 = vadd.f32 %v6847_v3, %v3075_v55 }
 0x5a0   :  { %v3078_v5 = vpop.f32.mrf.mxu0 }
 0x5a1   :  { %v6853_v2 = vpop.f32.mrf.mxu1  ;;  %v3079_v41 = vadd.f32 %v3078_v5, %v6870_v19 }
 0x5a2   :  { %v6851_v30 = vpop.f32.mrf.mxu0 }
 0x5a3   :  { %v3081_v5 = vadd.f32 %v6851_v30, %v6875_v43  ;;  %v3192_v49 = vadd.f32 %v6849_v24, %v3079_v41 }
 0x5a5   :  { %v6857_v1 = vpop.f32.mrf.mxu1 }
 0x5a6   :  { %v6855_v51 = vpop.f32.mrf.mxu0 }
 0x5a7   :  { %v6861_v22 = vpop.f32.mrf.mxu1  ;;  %v3085_v37 = vadd.f32 %v6855_v51, %v6870_v19  ;;  %v3194_v51 = vadd.f32 %v6853_v2, %v3081_v5 }
 0x5a8   :  { %v6859_v42 = vpop.f32.mrf.mxu0 }
 0x5ab   :  { %v6865_v45 = vpop.f32.mrf.mxu1 }
 0x5ac   :  { %v6863_v8 = vpop.f32.mrf.mxu0 }
 0x5ad   :  { %v6872_v27 = vpop.f32.mrf.mxu1 }
 0x5ae   :  { %v6867_v60 = vpop.f32.mrf.mxu0 }
 0x5b1   :  { %v6880_v63 = vpop.f32.mrf.mxu1 }
 0x5b2   :  { %v6877_v10 = vpop.f32.mrf.mxu0 }
 0x5b3   :  { %v6886_v17 = vpop.f32.mrf.mxu1 }
 0x5b4   :  { %v6883_v62 = vpop.f32.mrf.mxu0 }
 0x5c8   :  { %v3280_v59 = vpop.f32.mrf.mxu0 }
 0x5c9   :  { %v6889_v12 = vadd.f32 %v3280_v59, %v3168_v57  ;;  %v6891_v53 = vpop.f32.mrf.mxu1 }
 0x5ca   :  { %v3282_v18 = vpop.f32.mrf.mxu0 }
 0x5cb   :  { %v3383_v36 = vmul.f32 1.442695, %v6889_v12  ;;  %v6895_v54 = vadd.f32 %v3282_v18, %v3170_v13  ;;  %v3752_v48 = vpop.f32.mrf.mxu1  ;;  %v3087_v13 = vadd.f32 %v6859_v42, %v6875_v43  ;;  %v3091_v42 = vadd.f32 %v6863_v8, %v6870_v19 }
 0x5cc   :  { %v3286_v61 = vpop.f32.mrf.mxu0  ;;  %vm3331_vm14 = vcmp.gt.f32.partialorder %v6889_v12, 0.0 }
 0x5cd   :  { %4810 = vpow2.f32 %v3383_v36  ;;  %v3385_v16 = vmul.f32 1.442695, %v6895_v54  ;;  %v6899_v38 = vadd.f32 %v3286_v61, %v3174_v0  ;;  %v6901_v6 = vpop.f32.mrf.mxu1  ;;  %v3198_v0 = vadd.f32 %v6857_v1, %v3085_v37 }
 0x5ce   :  { %v3288_v28 = vpop.f32.mrf.mxu0  ;;  %v3200_v2 = vadd.f32 %v6861_v22, %v3087_v13  ;;  %v3093_v1 = vadd.f32 %v6867_v60, %v6875_v43  ;;  %vm3332_vm6 = vcmp.gt.f32.partialorder %v6895_v54, 0.0  ;;  %v3204_v60 = vadd.f32 %v6865_v45, %v3091_v42 }
 0x5cf   :  { %4812 = vpow2.f32 %v3385_v16  ;;  %v3395_v33 = vmul.f32 1.442695, %v6899_v38  ;;  %v6905_v21 = vadd.f32 %v3288_v28, %v3176_v58  ;;  %v3757_v4 = vpop.f32.mrf.mxu1  ;;  %vm3337_vm1 = vcmp.gt.f32.partialorder %v6899_v38, 0.0 }
 0x5d0   :  { %v3292_v56 = vpop.f32.mrf.mxu0  ;;  %v3206_v45 = vadd.f32 %v6872_v27, %v3093_v1 }
 0x5d1   :  { %4814 = vpow2.f32 %v3395_v33  ;;  %v3397_v44 = vmul.f32 1.442695, %v6905_v21  ;;  %v6909_v46 = vadd.f32 %v3292_v56, %v3180_v40  ;;  %v6911_v26 = vpop.f32.mrf.mxu1  ;;  %vm3338_vm15 = vcmp.gt.f32.partialorder %v6905_v21, 0.0 }
 0x5d2   :  { %v3294_v11 = vpop.f32.mrf.mxu0 }
 0x5d3   :  { %4816 = vpow2.f32 %v3397_v44  ;;  %v3407_v15 = vmul.f32 1.442695, %v6909_v46  ;;  %v6915_v47 = vadd.f32 %v3294_v11, %v3182_v25  ;;  %v3762_v9 = vpop.f32.mrf.mxu1  ;;  %vm3343_vm3 = vcmp.gt.f32.partialorder %v6909_v46, 0.0 }
 0x5d4   :  { %v3298_v31 = vpop.f32.mrf.mxu0 }
 0x5d5   :  { %4818 = vpow2.f32 %v3407_v15  ;;  %v3409_v29 = vmul.f32 1.442695, %v6915_v47  ;;  %v6919_v50 = vadd.f32 %v3298_v31, %v3186_v35  ;;  %v6921_v14 = vpop.f32.mrf.mxu1  ;;  %v3097_v15 = vadd.f32 %v6877_v10, %v6870_v19 }
 0x5d6   :  { %v3300_v34 = vpop.f32.mrf.mxu0  ;;  %vm3344_vm2 = vcmp.gt.f32.partialorder %v6915_v47, 0.0 }
 0x5d7   :  { %4820 = vpow2.f32 %v3409_v29  ;;  %v3419_v32 = vmul.f32 1.442695, %v6919_v50  ;;  %v6930_v57 = vadd.f32 %v3300_v34, %v3188_v7  ;;  %v3767_v59 = vpop.f32.mrf.mxu1  ;;  %v3099_v7 = vadd.f32 %v6883_v62, %v6875_v43 }
 0x5d8   :  { %v3304_v20 = vpop.f32.mrf.mxu0  ;;  %v3210_v59 = vadd.f32 %v6880_v63, %v3097_v15  ;;  %vm3349_vm5 = vcmp.gt.f32.partialorder %v6919_v50, 0.0 }
 0x5d9   :  { %4822 = vpow2.f32 %v3419_v32  ;;  %v3421_v3 = vmul.f32 1.442695, %v6930_v57  ;;  %v6935_v30 = vadd.f32 %v3304_v20, %v3192_v49  ;;  %v6937_v52 = vpop.f32.mrf.mxu1  ;;  %vm3350_vm4 = vcmp.gt.f32.partialorder %v6930_v57, 0.0 }
 0x5da   :  { %v4811_v24 = vpop.eup %4810  ;;  %v3306_v18 = vpop.f32.mrf.mxu0 }
 0x5db   :  { %4824 = vpow2.f32 %v3421_v3  ;;  %v3431_v36 = vmul.f32 1.442695, %v6935_v30  ;;  %v3772_v48 = vpop.f32.mrf.mxu1  ;;  %v4318_v61 = vadd.f32 -1.0, %v4811_v24  ;;  %v6944_v16 = vadd.f32 %v3306_v18, %v3194_v51 }
 0x5dc   :  { %v4813_v23 = vpop.eup %4812  ;;  %v3310_v58 = vpop.f32.mrf.mxu0  ;;  %v3212_v24 = vadd.f32 %v6886_v17, %v3099_v7  ;;  %vm3355_vm9 = vcmp.gt.f32.partialorder %v6935_v30, 0.0 }
 0x5dd   :  { %4826 = vpow2.f32 %v3431_v36  ;;  %v6946_v28 = vadd.f32 %v3310_v58, %v3198_v0  ;;  %v6948_v40 = vpop.f32.mrf.mxu1  ;;  %v4319_v39 = vadd.f32 -1.0, %v4813_v23  ;;  %v3433_v8 = vmul.f32 1.442695, %v6944_v16 }
 0x5de   :  { %v4815_v33 = vpop.eup %4814  ;;  %v3312_v4 = vpop.f32.mrf.mxu0  ;;  %v3523_v41 = vsel %vm3331_vm14, %v6889_v12, %v4318_v61  ;;  %vm3356_vm7 = vcmp.gt.f32.partialorder %v6944_v16, 0.0 }
 0x5df   :  { %v3443_v56 = vmul.f32 1.442695, %v6946_v28  ;;  %v6957_v25 = vadd.f32 %v3312_v4, %v3200_v2  ;;  %v3777_v55 = vpop.f32.mrf.mxu1  ;;  %v3524_v44 = vsel %vm3332_vm6, %v6895_v54, %v4319_v39  ;;  %4828 = vpow2.f32 %v3433_v8 }
 0x5e0   :  { %v4817_v22 = vpop.eup %4816  ;;  %4371 = vmatprep.mubr.msk.f32.mxu0 %vm2266_vm8, %v3524_v44  ;;  %v4324_v11 = vadd.f32 -1.0, %v4815_v33  ;;  %vm3361_vm11 = vcmp.gt.f32.partialorder %v6946_v28, 0.0 }
 0x5e1   :  { %4830 = vpow2.f32 %v3443_v56  ;;  %v3445_v9 = vmul.f32 1.442695, %v6957_v25  ;;  %v3316_v35 = vpop.f32.mrf.mxu0  ;;  %4091 = vmatmul.mubr.f32.vlgmr.msra.gmra.mxu0 %v3523_v41  ;;  %v4325_v31 = vadd.f32 -1.0, %v4817_v22  ;;  %vm3362_vm10 = vcmp.gt.f32.partialorder %v6957_v25, 0.0 }
 0x5e2   :  { %v4819_v29 = vpop.eup %4818  ;;  %v6967_v54 = vadd.f32 %v3316_v35, %v3204_v60  ;;  %v6969_v12 = vpop.f32.mrf.mxu1  ;;  %v3529_v32 = vsel %vm3337_vm1, %v6899_v38, %v4324_v11 }
 0x5e3   :  { %4832 = vpow2.f32 %v3445_v9  ;;  %v3318_v19 = vpop.f32.mrf.mxu0  ;;  %v3530_v10 = vsel %vm3338_vm15, %v6905_v21, %v4325_v31  ;;  %v4330_v27 = vadd.f32 -1.0, %v4819_v29 }
 0x5e4   :  { %v4821_v5 = vpop.eup %4820  ;;  %v3455_v34 = vmul.f32 1.442695, %v6967_v54  ;;  %v6977_v49 = vadd.f32 %v3318_v19, %v3206_v45  ;;  %v3782_v37 = vpop.f32.mrf.mxu1  ;;  %4372 = vmatprep.mubr.msk.f32.mxu0 %vm2266_vm8, %v3530_v10  ;;  %vm3367_vm12 = vcmp.gt.f32.partialorder %v6967_v54, 0.0 }
 0x5e5   :  { %4096 = vmatmul.mubr.f32.gmra.mxu0 %v3529_v32  ;;  %v4331_v43 = vadd.f32 -1.0, %v4821_v5  ;;  %v3535_v18 = vsel %vm3343_vm3, %v6909_v46, %v4330_v27 }
 0x5e6   :  { %v4823_v62 = vpop.eup %4822  ;;  %4834 = vpow2.f32 %v3455_v34  ;;  %v3457_v21 = vmul.f32 1.442695, %v6977_v49  ;;  %v3322_v20 = vpop.f32.mrf.mxu0  ;;  %vm3368_vm0 = vcmp.gt.f32.partialorder %v6977_v49, 0.0 }
 0x5e7   :  { %v3323_v13 = vadd.f32 %v3322_v20, %v3210_v59  ;;  %v6985_v3 = vpop.f32.mrf.mxu1  ;;  %v3536_v38 = vsel %vm3344_vm2, %v6915_v47, %v4331_v43  ;;  %v4336_v36 = vadd.f32 -1.0, %v4823_v62 }
 0x5e8   :  { %v4825_v51 = vpop.eup %4824  ;;  %4836 = vpow2.f32 %v3457_v21  ;;  %v3324_v63 = vpop.f32.mrf.mxu0  ;;  %4373 = vmatprep.mubr.msk.f32.mxu0 %vm2266_vm8, %v3536_v38  ;;  %v7159_v38 = vld [vmem:[#allocation20_spill] sm:$0xff] }
 0x5e9   :  { %v3467_v48 = vmul.f32 1.442695, %v3323_v13  ;;  %v3325_v0 = vadd.f32 %v3324_v63, %v3212_v24  ;;  %v3787_v23 = vpop.f32.mrf.mxu1  ;;  %4101 = vmatmul.mubr.f32.gmra.mxu0 %v3535_v18  ;;  %v4337_v42 = vadd.f32 -1.0, %v4825_v51  ;;  %v3541_v58 = vsel %vm3349_vm5, %v6919_v50, %v4336_v36  ;;  %v4852_v36 = vld [vmem:[#allocation13] sm:$0xff] }
 0x5ea   :  { %v4827_v61 = vpop.eup %4826  ;;  %vm3373_vm6 = vcmp.gt.f32.partialorder %v3323_v13, 0.0  ;;  %v3682_v51 = vsub.s32 5, %v7159_v38 }
 0x5eb   :  { %4838 = vpow2.f32 %v3467_v48  ;;  %v3469_v17 = vmul.f32 1.442695, %v3325_v0  ;;  %v3542_v47 = vsel %vm3350_vm4, %v6930_v57, %v4337_v42  ;;  %v4342_v2 = vadd.f32 -1.0, %v4827_v61 }
 0x5ec   :  { %4374 = vmatprep.mubr.msk.f32.mxu0 %vm2266_vm8, %v3542_v47  ;;  %v4829_v46 = vpop.eup %4828  ;;  %vm3374_vm13 = vcmp.gt.f32.partialorder %v3325_v0, 0.0  ;;  %v7013_v48 = vrot.slane %v4852_v36, %v3682_v51 }
 0x5ed   :  { %4840 = vpow2.f32 %v3469_v17  ;;  %4106 = vmatmul.mubr.f32.gmra.mxu0 %v3541_v58  ;;  %v4343_v33 = vadd.f32 -1.0, %v4829_v46  ;;  %v3547_v57 = vsel %vm3355_vm9, %v6935_v30, %v4342_v2 }
 0x5ee   :  { %v4831_v39 = vpop.eup %4830  ;;  %v3751_v61 = vadd.f32 %v6891_v53, %v7013_v48 }
 0x5ef   :  { %v3548_v8 = vsel %vm3356_vm7, %v6944_v16, %v4343_v33  ;;  %v4348_v56 = vadd.f32 -1.0, %v4831_v39  ;;  %v3756_v39 = vadd.f32 %v6901_v6, %v7013_v48 }
 0x5f0   :  { %v4833_v1 = vpop.eup %4832  ;;  %4375 = vmatprep.mubr.msk.f32.mxu0 %vm2266_vm8, %v3548_v8 }
 0x5f1   :  { %v4349_v4 = vadd.f32 -1.0, %v4833_v1  ;;  %4111 = vmatmul.mubr.f32.gmra.mxu0 %v3547_v57  ;;  %v3553_v22 = vsel %vm3361_vm11, %v6946_v28, %v4348_v56 }
 0x5f3   :  { %v4835_v50 = vpop.eup %4834  ;;  %v3554_v55 = vsel %vm3362_vm10, %v6957_v25, %v4349_v4 }
 0x5f4   :  { %4376 = vmatprep.mubr.msk.f32.mxu0 %vm2266_vm8, %v3554_v55  ;;  %v4354_v16 = vadd.f32 -1.0, %v4835_v50  ;;  %v4411_v31 = vpop.f32.mrf.mxu0 }
 0x5f5   :  { %v4837_v44 = vpop.eup %4836  ;;  %4116 = vmatmul.mubr.f32.gmra.mxu0 %v3553_v22 }
 0x5f6   :  { %v4355_v41 = vadd.f32 -1.0, %v4837_v44  ;;  %v3559_v25 = vsel %vm3367_vm12, %v6967_v54, %v4354_v16  ;;  %v4412_v29 = vpop.f32.mrf.mxu0  ;;  %v3761_v44 = vadd.f32 %v6911_v26, %v7013_v48 }
 0x5f8   :  { %v4839_v30 = vpop.eup %4838  ;;  %v3560_v60 = vsel %vm3368_vm0, %v6977_v49, %v4355_v41  ;;  %v4414_v45 = vpop.f32.mrf.mxu0 }
 0x5f9   :  { %4377 = vmatprep.mubr.msk.f32.mxu0 %vm2266_vm8, %v3560_v60  ;;  %v4360_v15 = vadd.f32 -1.0, %v4839_v30 }
 0x5fa   :  { %v4841_v11 = vpop.eup %4840  ;;  %4121 = vmatmul.mubr.f32.gmra.mxu0 %v3559_v25  ;;  %v4415_v7 = vpop.f32.mrf.mxu0 }
 0x5fb   :  { %v4361_v9 = vadd.f32 -1.0, %v4841_v11  ;;  %v3565_v35 = vsel %vm3373_vm6, %v3323_v13, %v4360_v15  ;;  %v4416_v58 = vadd.f32 %v4415_v7, %v4414_v45  ;;  %v3766_v11 = vadd.f32 %v6921_v14, %v7013_v48 }
 0x5fc   :  { %v4417_v19 = vpop.f32.mrf.mxu0  ;;  %v3771_v14 = vadd.f32 %v6937_v52, %v7013_v48 }
 0x5fd   :  { %v3566_v28 = vsel %vm3374_vm13, %v3325_v0, %v4361_v9  ;;  %v4413_v0 = vadd.f32 %v4412_v29, %v4411_v31  ;;  %v3888_v57 = vadd.f32 %v4416_v58, %v3756_v39 }
 0x5fe   :  { %4378 = vmatprep.mubr.msk.f32.mxu1 %vm2266_vm8, %v3566_v28  ;;  %v4418_v10 = vpop.f32.mrf.mxu0 }
 0x5ff   :  { %4126 = vmatmul.mubr.f32.vlgmr.msra.gmra.mxu1 %v3565_v35  ;;  %v3883_v47 = vadd.f32 %v4413_v0, %v3751_v61  ;;  %v4419_v4 = vadd.f32 %v4418_v10, %v4417_v19 }
 0x600   :  { %v4420_v5 = vpop.f32.mrf.mxu0 }
 0x601   :  { %v3893_v41 = vadd.f32 %v4419_v4, %v3761_v44 }
 0x602   :  { %v4421_v54 = vpop.f32.mrf.mxu0 }
 0x603   :  { %v4422_v6 = vadd.f32 %v4421_v54, %v4420_v5 }
 0x604   :  { %v4423_v37 = vpop.f32.mrf.mxu0 }
 0x605   :  { %v3898_v28 = vadd.f32 %v4422_v6, %v3766_v11 }
 0x606   :  { %v4424_v27 = vpop.f32.mrf.mxu0 }
 0x607   :  { %v4425_v31 = vadd.f32 %v4424_v27, %v4423_v37  ;;  %v3776_v37 = vadd.f32 %v6948_v40, %v7013_v48 }
 0x608   :  { %v4426_v43 = vpop.f32.mrf.mxu0 }
 0x60a   :  { %v4427_v21 = vpop.f32.mrf.mxu0 }
 0x60b   :  { %v4428_v54 = vadd.f32 %v4427_v21, %v4426_v43  ;;  %v3781_v43 = vadd.f32 %v6969_v12, %v7013_v48  ;;  %v3786_v12 = vadd.f32 %v6985_v3, %v7013_v48 }
 0x60c   :  { %v4429_v13 = vpop.f32.mrf.mxu0 }
 0x60e   :  { %v4430_v63 = vpop.f32.mrf.mxu0 }
 0x610   :  { %v7015_v23 = vpop.f32.mrf.mxu0 }
 0x612   :  { %v4433_v46 = vpop.f32.mrf.mxu0 }
 0x613   :  { %v4467_v34 = vpop.f32.mrf.mxu1  ;;  %v4434_v61 = vadd.f32 %v4433_v46, %v7015_v23 }
 0x615   :  { %v4468_v49 = vpop.f32.mrf.mxu1 }
 0x616   :  { %v4469_v17 = vadd.f32 %v4468_v49, %v4467_v34  ;;  %v3903_v34 = vadd.f32 %v4425_v31, %v3771_v14 }
 0x618   :  { %v3988_v1 = vadd.f32 %v4469_v17, %v3883_v47 }
 0x619   :  { %v4470_v32 = vpop.f32.mrf.mxu1 }
 0x61b   :  { %v4471_v59 = vpop.f32.mrf.mxu1 }
 0x61c   :  { %v4472_v33 = vadd.f32 %v4471_v59, %v4470_v32 }
 0x61e   :  { %v3993_v22 = vadd.f32 %v4472_v33, %v3888_v57 }
 0x61f   :  { %v4473_v62 = vpop.f32.mrf.mxu1 }
 0x621   :  { %v4474_v20 = vpop.f32.mrf.mxu1 }
 0x622   :  { %v4475_v53 = vadd.f32 %v4474_v20, %v4473_v62  ;;  %v3908_v20 = vadd.f32 %v4428_v54, %v3776_v37 }
 0x624   :  { %v3998_v26 = vadd.f32 %v4475_v53, %v3893_v41 }
 0x625   :  { %v4476_v24 = vpop.f32.mrf.mxu1 }
 0x627   :  { %v4477_v18 = vpop.f32.mrf.mxu1 }
 0x628   :  { %v4478_v15 = vadd.f32 %v4477_v18, %v4476_v24  ;;  %v4431_v24 = vadd.f32 %v4430_v63, %v4429_v13 }
 0x62a   :  { %v4003_v7 = vadd.f32 %v4478_v15, %v3898_v28  ;;  %v3913_v0 = vadd.f32 %v4431_v24, %v3781_v43 }
 0x62b   :  { %v4479_v42 = vpop.f32.mrf.mxu1 }
 0x62d   :  { %v4480_v2 = vpop.f32.mrf.mxu1 }
 0x62e   :  { %v4481_v19 = vadd.f32 %v4480_v2, %v4479_v42  ;;  %v3918_v2 = vadd.f32 %v4434_v61, %v3786_v12 }
 0x630   :  { %v4008_v59 = vadd.f32 %v4481_v19, %v3903_v34 }
 0x631   :  { %v4482_v50 = vpop.f32.mrf.mxu1 }
 0x633   :  { %v4483_v60 = vpop.f32.mrf.mxu1 }
 0x634   :  { %v4484_v27 = vadd.f32 %v4483_v60, %v4482_v50 }
 0x636   :  { %v4013_v18 = vadd.f32 %v4484_v27, %v3908_v20 }
 0x637   :  { %v4485_v29 = vpop.f32.mrf.mxu1 }
 0x639   :  { %v4486_v49 = vpop.f32.mrf.mxu1 }
 0x63a   :  { %v4487_v21 = vadd.f32 %v4486_v49, %v4485_v29 }
 0x63c   :  { %v4018_v13 = vadd.f32 %v4487_v21, %v3913_v0 }
 0x63d   :  { %v4488_v52 = vpop.f32.mrf.mxu1 }
 0x63f   :  { %v4489_v40 = vpop.f32.mrf.mxu1 }
 0x640   :  { %v4490_v63 = vadd.f32 %v4489_v40, %v4488_v52 }
 0x642   :  { %v4023_v33 = vadd.f32 %v4490_v63, %v3918_v2 }
 0x6a1   :  { %v4092_v8 = vpop.f32.mrf.mxu0 }
 0x6a2   :  { %v4093_v56 = vadd.f32 %v4092_v8, %v3988_v1 }
 0x6a3   :  { %v4094_v55 = vpop.f32.mrf.mxu0 }
 0x6a4   :  { %4131 = vst [vmem:[%s7067_s9] sm:$0xff] %v4093_v56 }
 0x6a5   :  { %v4097_v16 = vpop.f32.mrf.mxu0 }
 0x6a6   :  { %v4098_v30 = vadd.f32 %v4097_v16, %v3993_v22 }
 0x6a7   :  { %v4099_v25 = vpop.f32.mrf.mxu0 }
 0x6a8   :  { %4132 = vst [vmem:[%s7067_s9 + $0x8] sm:$0xff] %v4098_v30 }
 0x6a9   :  { %v4102_v9 = vpop.f32.mrf.mxu0 }
 0x6aa   :  { %v4103_v35 = vadd.f32 %v4102_v9, %v3998_v26 }
 0x6ab   :  { %v4104_v45 = vpop.f32.mrf.mxu0 }
 0x6ac   :  { %4133 = vst [vmem:[%s7067_s9 + $0x10] sm:$0xff] %v4103_v35 }
 0x6ad   :  { %v4107_v10 = vpop.f32.mrf.mxu0 }
 0x6ae   :  { %v4108_v5 = vadd.f32 %v4107_v10, %v4003_v7 }
 0x6af   :  { %v4109_v32 = vpop.f32.mrf.mxu0 }
 0x6b0   :  { %4134 = vst [vmem:[%s7067_s9 + $0x18] sm:$0xff] %v4108_v5 }
 0x6b1   :  { %v4112_v62 = vpop.f32.mrf.mxu0 }
 0x6b2   :  { %v4113_v38 = vadd.f32 %v4112_v62, %v4008_v59 }
 0x6b3   :  { %v4114_v51 = vpop.f32.mrf.mxu0 }
 0x6b4   :  { %4135 = vst [vmem:[%s7067_s9 + $0x20] sm:$0xff] %v4113_v38 }
 0x6b5   :  { %v4117_v36 = vpop.f32.mrf.mxu0 }
 0x6b6   :  { %v4118_v42 = vadd.f32 %v4117_v36, %v4013_v18 }
 0x6b7   :  { %v4119_v17 = vpop.f32.mrf.mxu0 }
 0x6b8   :  { %4136 = vst [vmem:[%s7067_s9 + $0x28] sm:$0xff] %v4118_v42 }
 0x6ba   :  { %v4122_v47 = vpop.f32.mrf.mxu0 }
 0x6bb   :  { %v4123_v58 = vadd.f32 %v4122_v47, %v4018_v13 }
 0x6bc   :  { %v4124_v39 = vpop.f32.mrf.mxu0 }
 0x6bd   :  { %4137 = vst [vmem:[%s7067_s9 + $0x30] sm:$0xff] %v4123_v58 }
 0x6bf   :  { %v4127_v23 = vpop.f32.mrf.mxu1 }
 0x6c0   :  { %v4128_v46 = vadd.f32 %v4127_v23, %v4023_v33 }
 0x6c1   :  { %v4129_v1 = vpop.f32.mrf.mxu1 }
 0x6c2   :  { %4138 = vst [vmem:[%s7067_s9 + $0x38] sm:$0xff] %v4128_v46 }
 0x6c3   :  { %4143 = vsyncpa [#allocation3], 1 }
 0x6c4   :  { %4144 = vsyncpa [#allocation5], 1 }
 0x6c5   :  { %4145 = vsyncpa [#allocation8], 1 }
 0x6c6   :  { %4146 = vsyncpa [#allocation11], 1 }
 0x6c7   :  { %4147 = vsyncpa [#allocation14], 1 }

</bundles_post_ra>
